<compile_context>
chip_gen: v6e
topology: v6e:2x2x1
jax: 0.10.0
libtpu: 0.0.40
codegen_flags: <defaults>
</compile_context>

<pallas_src>
import functools

import jax
import jax.numpy as jnp
from jax.experimental import pallas as pl
from jax.experimental.pallas import tpu as pltpu

NZ = 10
D_IN = 151

# Lane-friendly padded sizes (multiples of 128) used inside the kernel.
D_PAD = 256
NZ_PAD = 128

LAYER_DIMS = [
    (D_IN, 256),   # enc_1
    (256, 256),    # enc_2
    (256, 1024),   # enc_3
    (1024, NZ),    # z_layer
    (NZ, 1024),    # dec_1
    (1024, 256),   # dec_2
    (256, 256),    # dec_3
    (256, D_IN),   # x_bar_layer
]

PAD_LAYER_DIMS = [
    (D_PAD, 256),
    (256, 256),
    (256, 1024),
    (1024, NZ_PAD),
    (NZ_PAD, 1024),
    (1024, 256),
    (256, 256),
    (256, D_PAD),
]

OUT_DIMS = (D_PAD, 256, 256, 1024, NZ_PAD)  # x_bar, h1, h2, h3, z (padded)


def ae_kernel(x_ref,
              w1, b1, w2, b2, w3, b3, wz, bz,
              wd1, bd1, wd2, bd2, wd3, bd3, wx, bx,
              xbar_ref, h1_ref, h2_ref, h3_ref, z_ref):
    """Fused AE forward for one batch tile; all 8 weight matrices VMEM-resident."""
    cdt = x_ref.dtype          # compute dtype (f32 or bf16)
    x = x_ref[...]

    def linear(a, w_ref, b_ref):
        # MXU matmul with f32 accumulation; bias stays f32.
        return jnp.dot(a, w_ref[...], preferred_element_type=jnp.float32) + b_ref[...]

    # Encoder.
    h1 = jnp.maximum(linear(x, w1, b1), 0.0)
    h2 = jnp.maximum(linear(h1.astype(cdt), w2, b2), 0.0)
    h3 = jnp.maximum(linear(h2.astype(cdt), w3, b3), 0.0)
    z = linear(h3.astype(cdt), wz, bz)

    # Decoder.
    d1 = jnp.maximum(linear(z.astype(cdt), wd1, bd1), 0.0)
    d2 = jnp.maximum(linear(d1.astype(cdt), wd2, bd2), 0.0)
    d3 = jnp.maximum(linear(d2.astype(cdt), wd3, bd3), 0.0)
    x_bar = jax.nn.sigmoid(linear(d3.astype(cdt), wx, bx))

    xbar_ref[...] = x_bar.astype(xbar_ref.dtype)
    h1_ref[...] = h1.astype(h1_ref.dtype)
    h2_ref[...] = h2.astype(h2_ref.dtype)
    h3_ref[...] = h3.astype(h3_ref.dtype)
    z_ref[...] = z.astype(z_ref.dtype)


def _round_up(n, m):
    return ((n + m - 1) // m) * m


def _default_bm(batch):
    """Generation-aware batch tile: fills MXU rows while fitting scoped VMEM."""
    try:
        kind = jax.devices()[0].device_kind.lower()
    except Exception:
        kind = ""
    # v7x: 64 MiB VMEM / 2 TensorCores -> smaller tile keeps grid >= 2 sooner.
    # v5e/v6e (128 MiB VMEM): 512 rows; multiple of both 128- and 256-row MXUs.
    cap = 256 if "v7" in kind else 512
    return min(cap, _round_up(max(batch, 1), 8))


@functools.partial(jax.jit, static_argnames=("bm", "compute_dtype"))
def _ae_forward_impl(x, params, *, bm, compute_dtype):
    B, d_in = x.shape
    assert d_in == D_IN
    assert bm % 8 == 0
    cdt = jnp.dtype(compute_dtype)

    # Zero-pad the batch to a multiple of bm (full, unmasked tiles every step)
    # and the feature dim to a lane-dense width.  Padding is exact: padded
    # columns/rows contribute 0 and are sliced off below.
    B_pad = _round_up(B, bm)
    x_p = jnp.pad(x, ((0, B_pad - B), (0, D_PAD - D_IN))).astype(cdt)

    in_specs = [pl.BlockSpec((bm, D_PAD), lambda i: (i, 0))]
    flat_params = []
    for (w, b), (pfi, pfo) in zip(params, PAD_LAYER_DIMS):
        fi, fo = w.shape
        w_p = jnp.pad(w, ((0, pfi - fi), (0, pfo - fo))).astype(cdt)
        b_p = jnp.pad(b, ((0, 0), (0, pfo - fo)))          # biases stay f32
        # Full block + constant index_map -> fetched once and kept resident in
        # VMEM across all grid steps (no re-DMA of the ~4 MiB of weights).
        in_specs.append(pl.BlockSpec((pfi, pfo), lambda i: (0, 0)))
        in_specs.append(pl.BlockSpec((1, pfo), lambda i: (0, 0)))
        flat_params.extend([w_p, b_p])

    grid = (B_pad // bm,)
    out_shape = tuple(jax.ShapeDtypeStruct((B_pad, d), jnp.float32) for d in OUT_DIMS)
    out_specs = tuple(pl.BlockSpec((bm, d), lambda i: (i, 0)) for d in OUT_DIMS)

    n_weight_elems = sum(i * o for i, o in PAD_LAYER_DIMS)
    n_bias_elems = sum(o for _, o in PAD_LAYER_DIMS)
    cost = pl.CostEstimate(
        flops=int(2 * B_pad * n_weight_elems),
        transcendentals=int(B_pad * D_PAD),    # sigmoid
        bytes_accessed=int(n_weight_elems * cdt.itemsize + n_bias_elems * 4
                           + B_pad * D_PAD * cdt.itemsize
                           + B_pad * sum(OUT_DIMS) * 4),
    )

    x_bar_p, h1, h2, h3, z_p = pl.pallas_call(
        ae_kernel,
        out_shape=out_shape,
        grid_spec=pltpu.PrefetchScalarGridSpec(
            num_scalar_prefetch=0,
            grid=grid,
            in_specs=in_specs,
            out_specs=out_specs,
        ),
        compiler_params=pltpu.CompilerParams(
            dimension_semantics=("parallel",),   # batch tiles are independent
            vmem_limit_bytes=48 * 1024 * 1024,   # fits v5e/v6e (128 MiB) and v7x (64 MiB)
        ),
        cost_estimate=cost,
    )(x_p, *flat_params)

    return (x_bar_p[:B, :D_IN], h1[:B], h2[:B], h3[:B], z_p[:B, :NZ])


def ae_forward(x, params, *, bm=None, compute_dtype=jnp.float32):
    """Fused AE forward. x: (B, 151) f32. Returns (x_bar, enc_h1, enc_h2, enc_h3, z)."""
    if bm is None:
        bm = _default_bm(x.shape[0])
    bm = int(_round_up(int(bm), 8))
    return _ae_forward_impl(x, params, bm=bm,
                            compute_dtype=jnp.dtype(compute_dtype))


def init_params(key):
    """Deterministic parameter init (same shapes/init scheme as the PyTorch module)."""
    params = []
    for i, (fan_in, fan_out) in enumerate(LAYER_DIMS):
        kw, kb = jax.random.split(jax.random.fold_in(key, i))
        bound = 1.0 / jnp.sqrt(fan_in)
        w = jax.random.uniform(kw, (fan_in, fan_out), jnp.float32, -bound, bound)
        b = jax.random.uniform(kb, (1, fan_out), jnp.float32, -bound, bound)
        params.append((w, b))
    return params


def ae_forward_ref(x, params):
    """Pure-JAX reference for correctness checking."""
    h = x
    acts = []
    z = None
    x_bar = None
    for idx, (w, b) in enumerate(params):
        h = h @ w + b
        if idx in (0, 1, 2, 4, 5, 6):          # ReLU layers
            h = jnp.maximum(h, 0.0)
        if idx in (0, 1, 2):
            acts.append(h)                      # enc_h1, enc_h2, enc_h3
        if idx == 3:
            z = h                               # latent (no activation)
        if idx == 7:
            x_bar = jax.nn.sigmoid(h)
    return (x_bar, acts[0], acts[1], acts[2], z)


if __name__ == "__main__":
    key = jax.random.PRNGKey(0)
    k_x, k_p = jax.random.split(key)
    params = init_params(k_p)

    # Small deterministic test: single batch tile, lane-dense everywhere.
    B = 64
    x = jax.random.normal(k_x, (B, D_IN), jnp.float32)
    outs = jax.block_until_ready(ae_forward(x, params))
    refs = ae_forward_ref(x, params)
    for o, r in zip(outs, refs):
        assert o.shape == r.shape and o.dtype == r.dtype
        assert jnp.allclose(o, r, atol=1e-5, rtol=1e-5), "f32 mismatch vs reference"

    # Ragged batch: exercises host-side batch padding + multi-step grid.
    B2 = 37
    x2 = jax.random.normal(jax.random.fold_in(k_x, 1), (B2, D_IN), jnp.float32)
    outs2 = jax.block_until_ready(ae_forward(x2, params, bm=16))
    refs2 = ae_forward_ref(x2, params)
    for o, r in zip(outs2, refs2):
        assert o.shape == r.shape
        assert jnp.allclose(o, r, atol=1e-5, rtol=1e-5), "ragged-batch mismatch"

    print("KERNEL_OK")
</pallas_src>

<mosaic_0001>
module attributes {stable_mosaic.version = 11 : i64} {
  func.func @ae_kernel(%arg0: i32, %arg1: memref<64x256xf32, #tpu.memory_space<vmem>>, %arg2: memref<256x256xf32, #tpu.memory_space<vmem>>, %arg3: memref<1x256xf32, #tpu.memory_space<vmem>>, %arg4: memref<256x256xf32, #tpu.memory_space<vmem>>, %arg5: memref<1x256xf32, #tpu.memory_space<vmem>>, %arg6: memref<256x1024xf32, #tpu.memory_space<vmem>>, %arg7: memref<1x1024xf32, #tpu.memory_space<vmem>>, %arg8: memref<1024x128xf32, #tpu.memory_space<vmem>>, %arg9: memref<1x128xf32, #tpu.memory_space<vmem>>, %arg10: memref<128x1024xf32, #tpu.memory_space<vmem>>, %arg11: memref<1x1024xf32, #tpu.memory_space<vmem>>, %arg12: memref<1024x256xf32, #tpu.memory_space<vmem>>, %arg13: memref<1x256xf32, #tpu.memory_space<vmem>>, %arg14: memref<256x256xf32, #tpu.memory_space<vmem>>, %arg15: memref<1x256xf32, #tpu.memory_space<vmem>>, %arg16: memref<256x256xf32, #tpu.memory_space<vmem>>, %arg17: memref<1x256xf32, #tpu.memory_space<vmem>>, %arg18: memref<64x256xf32, #tpu.memory_space<vmem>>, %arg19: memref<64x256xf32, #tpu.memory_space<vmem>>, %arg20: memref<64x256xf32, #tpu.memory_space<vmem>>, %arg21: memref<64x1024xf32, #tpu.memory_space<vmem>>, %arg22: memref<64x128xf32, #tpu.memory_space<vmem>>) attributes {dimension_semantics = [#tpu.dimension_semantics<parallel>], iteration_bounds = array<i64: 1>, scalar_prefetch = 0 : i64, scratch_operands = 0 : i64, tpu.core_type = #tpu.core_type<tc>, window_params = [{transform_indices = @transform_0, window_bounds = array<i64: 64, 256>}, {pipeline_mode = #tpu.pipeline_mode<synchronous>, transform_indices = @transform_1, window_bounds = array<i64: 256, 256>}, {pipeline_mode = #tpu.pipeline_mode<synchronous>, transform_indices = @transform_2, window_bounds = array<i64: 1, 256>}, {pipeline_mode = #tpu.pipeline_mode<synchronous>, transform_indices = @transform_3, window_bounds = array<i64: 256, 256>}, {pipeline_mode = #tpu.pipeline_mode<synchronous>, transform_indices = @transform_4, window_bounds = array<i64: 1, 256>}, {pipeline_mode = #tpu.pipeline_mode<synchronous>, transform_indices = @transform_5, window_bounds = array<i64: 256, 1024>}, {pipeline_mode = #tpu.pipeline_mode<synchronous>, transform_indices = @transform_6, window_bounds = array<i64: 1, 1024>}, {pipeline_mode = #tpu.pipeline_mode<synchronous>, transform_indices = @transform_7, window_bounds = array<i64: 1024, 128>}, {pipeline_mode = #tpu.pipeline_mode<synchronous>, transform_indices = @transform_8, window_bounds = array<i64: 1, 128>}, {pipeline_mode = #tpu.pipeline_mode<synchronous>, transform_indices = @transform_9, window_bounds = array<i64: 128, 1024>}, {pipeline_mode = #tpu.pipeline_mode<synchronous>, transform_indices = @transform_10, window_bounds = array<i64: 1, 1024>}, {pipeline_mode = #tpu.pipeline_mode<synchronous>, transform_indices = @transform_11, window_bounds = array<i64: 1024, 256>}, {pipeline_mode = #tpu.pipeline_mode<synchronous>, transform_indices = @transform_12, window_bounds = array<i64: 1, 256>}, {pipeline_mode = #tpu.pipeline_mode<synchronous>, transform_indices = @transform_13, window_bounds = array<i64: 256, 256>}, {pipeline_mode = #tpu.pipeline_mode<synchronous>, transform_indices = @transform_14, window_bounds = array<i64: 1, 256>}, {pipeline_mode = #tpu.pipeline_mode<synchronous>, transform_indices = @transform_15, window_bounds = array<i64: 256, 256>}, {pipeline_mode = #tpu.pipeline_mode<synchronous>, transform_indices = @transform_16, window_bounds = array<i64: 1, 256>}, {transform_indices = @transform_17, window_bounds = array<i64: 64, 256>}, {transform_indices = @transform_18, window_bounds = array<i64: 64, 256>}, {transform_indices = @transform_19, window_bounds = array<i64: 64, 256>}, {transform_indices = @transform_20, window_bounds = array<i64: 64, 1024>}, {transform_indices = @transform_21, window_bounds = array<i64: 64, 128>}]} {
    %c0 = arith.constant 0 : index
    %c0_0 = arith.constant 0 : index
    %0 = vector.load %arg1[%c0, %c0_0] : memref<64x256xf32, #tpu.memory_space<vmem>>, vector<64x256xf32>
    %c0_1 = arith.constant 0 : index
    %c0_2 = arith.constant 0 : index
    %1 = vector.load %arg2[%c0_1, %c0_2] : memref<256x256xf32, #tpu.memory_space<vmem>>, vector<256x256xf32>
    %cst = arith.constant dense<0.000000e+00> : vector<64x256xf32>
    %2 = tpu.matmul %0, %1, %cst {dimension_numbers = #tpu.dot_dimension_numbers<[1], [0], [0], [1], [0, 0, 1, 1], [], []>} : vector<64x256xf32>, vector<256x256xf32>, vector<64x256xf32> -> vector<64x256xf32>
    %c0_3 = arith.constant 0 : index
    %c0_4 = arith.constant 0 : index
    %3 = vector.load %arg3[%c0_3, %c0_4] : memref<1x256xf32, #tpu.memory_space<vmem>>, vector<1x256xf32>
    %4 = vector.broadcast %3 : vector<1x256xf32> to vector<64x256xf32>
    %5 = arith.addf %2, %4 : vector<64x256xf32>
    %cst_5 = arith.constant 0.000000e+00 : f32
    %6 = vector.broadcast %cst_5 : f32 to vector<64x256xf32>
    %7 = arith.maximumf %5, %6 : vector<64x256xf32>
    %c0_6 = arith.constant 0 : index
    %c0_7 = arith.constant 0 : index
    %8 = vector.load %arg4[%c0_6, %c0_7] : memref<256x256xf32, #tpu.memory_space<vmem>>, vector<256x256xf32>
    %cst_8 = arith.constant dense<0.000000e+00> : vector<64x256xf32>
    %9 = tpu.matmul %7, %8, %cst_8 {dimension_numbers = #tpu.dot_dimension_numbers<[1], [0], [0], [1], [0, 0, 1, 1], [], []>} : vector<64x256xf32>, vector<256x256xf32>, vector<64x256xf32> -> vector<64x256xf32>
    %c0_9 = arith.constant 0 : index
    %c0_10 = arith.constant 0 : index
    %10 = vector.load %arg5[%c0_9, %c0_10] : memref<1x256xf32, #tpu.memory_space<vmem>>, vector<1x256xf32>
    %11 = vector.broadcast %10 : vector<1x256xf32> to vector<64x256xf32>
    %12 = arith.addf %9, %11 : vector<64x256xf32>
    %cst_11 = arith.constant 0.000000e+00 : f32
    %13 = vector.broadcast %cst_11 : f32 to vector<64x256xf32>
    %14 = arith.maximumf %12, %13 : vector<64x256xf32>
    %c0_12 = arith.constant 0 : index
    %c0_13 = arith.constant 0 : index
    %15 = vector.load %arg6[%c0_12, %c0_13] : memref<256x1024xf32, #tpu.memory_space<vmem>>, vector<256x1024xf32>
    %cst_14 = arith.constant dense<0.000000e+00> : vector<64x1024xf32>
    %16 = tpu.matmul %14, %15, %cst_14 {dimension_numbers = #tpu.dot_dimension_numbers<[1], [0], [0], [1], [0, 0, 1, 1], [], []>} : vector<64x256xf32>, vector<256x1024xf32>, vector<64x1024xf32> -> vector<64x1024xf32>
    %c0_15 = arith.constant 0 : index
    %c0_16 = arith.constant 0 : index
    %17 = vector.load %arg7[%c0_15, %c0_16] : memref<1x1024xf32, #tpu.memory_space<vmem>>, vector<1x1024xf32>
    %18 = vector.broadcast %17 : vector<1x1024xf32> to vector<64x1024xf32>
    %19 = arith.addf %16, %18 : vector<64x1024xf32>
    %cst_17 = arith.constant 0.000000e+00 : f32
    %20 = vector.broadcast %cst_17 : f32 to vector<64x1024xf32>
    %21 = arith.maximumf %19, %20 : vector<64x1024xf32>
    %c0_18 = arith.constant 0 : index
    %c0_19 = arith.constant 0 : index
    %22 = vector.load %arg8[%c0_18, %c0_19] : memref<1024x128xf32, #tpu.memory_space<vmem>>, vector<1024x128xf32>
    %cst_20 = arith.constant dense<0.000000e+00> : vector<64x128xf32>
    %23 = tpu.matmul %21, %22, %cst_20 {dimension_numbers = #tpu.dot_dimension_numbers<[1], [0], [0], [1], [0, 0, 1, 1], [], []>} : vector<64x1024xf32>, vector<1024x128xf32>, vector<64x128xf32> -> vector<64x128xf32>
    %c0_21 = arith.constant 0 : index
    %c0_22 = arith.constant 0 : index
    %24 = vector.load %arg9[%c0_21, %c0_22] : memref<1x128xf32, #tpu.memory_space<vmem>>, vector<1x128xf32>
    %25 = vector.broadcast %24 : vector<1x128xf32> to vector<64x128xf32>
    %26 = arith.addf %23, %25 : vector<64x128xf32>
    %c0_23 = arith.constant 0 : index
    %c0_24 = arith.constant 0 : index
    %27 = vector.load %arg10[%c0_23, %c0_24] : memref<128x1024xf32, #tpu.memory_space<vmem>>, vector<128x1024xf32>
    %cst_25 = arith.constant dense<0.000000e+00> : vector<64x1024xf32>
    %28 = tpu.matmul %26, %27, %cst_25 {dimension_numbers = #tpu.dot_dimension_numbers<[1], [0], [0], [1], [0, 0, 1, 1], [], []>} : vector<64x128xf32>, vector<128x1024xf32>, vector<64x1024xf32> -> vector<64x1024xf32>
    %c0_26 = arith.constant 0 : index
    %c0_27 = arith.constant 0 : index
    %29 = vector.load %arg11[%c0_26, %c0_27] : memref<1x1024xf32, #tpu.memory_space<vmem>>, vector<1x1024xf32>
    %30 = vector.broadcast %29 : vector<1x1024xf32> to vector<64x1024xf32>
    %31 = arith.addf %28, %30 : vector<64x1024xf32>
    %cst_28 = arith.constant 0.000000e+00 : f32
    %32 = vector.broadcast %cst_28 : f32 to vector<64x1024xf32>
    %33 = arith.maximumf %31, %32 : vector<64x1024xf32>
    %c0_29 = arith.constant 0 : index
    %c0_30 = arith.constant 0 : index
    %34 = vector.load %arg12[%c0_29, %c0_30] : memref<1024x256xf32, #tpu.memory_space<vmem>>, vector<1024x256xf32>
    %cst_31 = arith.constant dense<0.000000e+00> : vector<64x256xf32>
    %35 = tpu.matmul %33, %34, %cst_31 {dimension_numbers = #tpu.dot_dimension_numbers<[1], [0], [0], [1], [0, 0, 1, 1], [], []>} : vector<64x1024xf32>, vector<1024x256xf32>, vector<64x256xf32> -> vector<64x256xf32>
    %c0_32 = arith.constant 0 : index
    %c0_33 = arith.constant 0 : index
    %36 = vector.load %arg13[%c0_32, %c0_33] : memref<1x256xf32, #tpu.memory_space<vmem>>, vector<1x256xf32>
    %37 = vector.broadcast %36 : vector<1x256xf32> to vector<64x256xf32>
    %38 = arith.addf %35, %37 : vector<64x256xf32>
    %cst_34 = arith.constant 0.000000e+00 : f32
    %39 = vector.broadcast %cst_34 : f32 to vector<64x256xf32>
    %40 = arith.maximumf %38, %39 : vector<64x256xf32>
    %c0_35 = arith.constant 0 : index
    %c0_36 = arith.constant 0 : index
    %41 = vector.load %arg14[%c0_35, %c0_36] : memref<256x256xf32, #tpu.memory_space<vmem>>, vector<256x256xf32>
    %cst_37 = arith.constant dense<0.000000e+00> : vector<64x256xf32>
    %42 = tpu.matmul %40, %41, %cst_37 {dimension_numbers = #tpu.dot_dimension_numbers<[1], [0], [0], [1], [0, 0, 1, 1], [], []>} : vector<64x256xf32>, vector<256x256xf32>, vector<64x256xf32> -> vector<64x256xf32>
    %c0_38 = arith.constant 0 : index
    %c0_39 = arith.constant 0 : index
    %43 = vector.load %arg15[%c0_38, %c0_39] : memref<1x256xf32, #tpu.memory_space<vmem>>, vector<1x256xf32>
    %44 = vector.broadcast %43 : vector<1x256xf32> to vector<64x256xf32>
    %45 = arith.addf %42, %44 : vector<64x256xf32>
    %cst_40 = arith.constant 0.000000e+00 : f32
    %46 = vector.broadcast %cst_40 : f32 to vector<64x256xf32>
    %47 = arith.maximumf %45, %46 : vector<64x256xf32>
    %c0_41 = arith.constant 0 : index
    %c0_42 = arith.constant 0 : index
    %48 = vector.load %arg16[%c0_41, %c0_42] : memref<256x256xf32, #tpu.memory_space<vmem>>, vector<256x256xf32>
    %cst_43 = arith.constant dense<0.000000e+00> : vector<64x256xf32>
    %49 = tpu.matmul %47, %48, %cst_43 {dimension_numbers = #tpu.dot_dimension_numbers<[1], [0], [0], [1], [0, 0, 1, 1], [], []>} : vector<64x256xf32>, vector<256x256xf32>, vector<64x256xf32> -> vector<64x256xf32>
    %c0_44 = arith.constant 0 : index
    %c0_45 = arith.constant 0 : index
    %50 = vector.load %arg17[%c0_44, %c0_45] : memref<1x256xf32, #tpu.memory_space<vmem>>, vector<1x256xf32>
    %51 = vector.broadcast %50 : vector<1x256xf32> to vector<64x256xf32>
    %52 = arith.addf %49, %51 : vector<64x256xf32>
    %53 = arith.negf %52 : vector<64x256xf32>
    %54 = math.exp %53 : vector<64x256xf32>
    %cst_46 = arith.constant 1.000000e+00 : f32
    %55 = vector.broadcast %cst_46 : f32 to vector<64x256xf32>
    %56 = arith.addf %55, %54 : vector<64x256xf32>
    %57 = arith.divf %55, %56 : vector<64x256xf32>
    %c0_47 = arith.constant 0 : index
    %c0_48 = arith.constant 0 : index
    %58 = vector.load %arg18[%c0_47, %c0_48] : memref<64x256xf32, #tpu.memory_space<vmem>>, vector<64x256xf32>
    tpu.vector_store %arg18[%c0_47, %c0_48], %57 {strides = array<i32>} : memref<64x256xf32, #tpu.memory_space<vmem>>, vector<64x256xf32>,
    %c0_49 = arith.constant 0 : index
    %c0_50 = arith.constant 0 : index
    %59 = vector.load %arg19[%c0_49, %c0_50] : memref<64x256xf32, #tpu.memory_space<vmem>>, vector<64x256xf32>
    tpu.vector_store %arg19[%c0_49, %c0_50], %7 {strides = array<i32>} : memref<64x256xf32, #tpu.memory_space<vmem>>, vector<64x256xf32>,
    %c0_51 = arith.constant 0 : index
    %c0_52 = arith.constant 0 : index
    %60 = vector.load %arg20[%c0_51, %c0_52] : memref<64x256xf32, #tpu.memory_space<vmem>>, vector<64x256xf32>
    tpu.vector_store %arg20[%c0_51, %c0_52], %14 {strides = array<i32>} : memref<64x256xf32, #tpu.memory_space<vmem>>, vector<64x256xf32>,
    %c0_53 = arith.constant 0 : index
    %c0_54 = arith.constant 0 : index
    %61 = vector.load %arg21[%c0_53, %c0_54] : memref<64x1024xf32, #tpu.memory_space<vmem>>, vector<64x1024xf32>
    tpu.vector_store %arg21[%c0_53, %c0_54], %21 {strides = array<i32>} : memref<64x1024xf32, #tpu.memory_space<vmem>>, vector<64x1024xf32>,
    %c0_55 = arith.constant 0 : index
    %c0_56 = arith.constant 0 : index
    %62 = vector.load %arg22[%c0_55, %c0_56] : memref<64x128xf32, #tpu.memory_space<vmem>>, vector<64x128xf32>
    tpu.vector_store %arg22[%c0_55, %c0_56], %26 {strides = array<i32>} : memref<64x128xf32, #tpu.memory_space<vmem>>, vector<64x128xf32>,
    return
  }
  func.func @transform_0(%arg0: i32) -> (i32, i32) {
    %c0_i32 = arith.constant 0 : i32
    %c0_i32_0 = arith.constant 0 : i32
    return %arg0, %c0_i32 : i32, i32
  }
  func.func @transform_1(%arg0: i32) -> (i32, i32) {
    %c0_i32 = arith.constant 0 : i32
    %c0_i32_0 = arith.constant 0 : i32
    %c0_i32_1 = arith.constant 0 : i32
    return %c0_i32, %c0_i32_0 : i32, i32
  }
  func.func @transform_2(%arg0: i32) -> (i32, i32) {
    %c0_i32 = arith.constant 0 : i32
    %c0_i32_0 = arith.constant 0 : i32
    %c0_i32_1 = arith.constant 0 : i32
    return %c0_i32, %c0_i32_0 : i32, i32
  }
  func.func @transform_3(%arg0: i32) -> (i32, i32) {
    %c0_i32 = arith.constant 0 : i32
    %c0_i32_0 = arith.constant 0 : i32
    %c0_i32_1 = arith.constant 0 : i32
    return %c0_i32, %c0_i32_0 : i32, i32
  }
  func.func @transform_4(%arg0: i32) -> (i32, i32) {
    %c0_i32 = arith.constant 0 : i32
    %c0_i32_0 = arith.constant 0 : i32
    %c0_i32_1 = arith.constant 0 : i32
    return %c0_i32, %c0_i32_0 : i32, i32
  }
  func.func @transform_5(%arg0: i32) -> (i32, i32) {
    %c0_i32 = arith.constant 0 : i32
    %c0_i32_0 = arith.constant 0 : i32
    %c0_i32_1 = arith.constant 0 : i32
    return %c0_i32, %c0_i32_0 : i32, i32
  }
  func.func @transform_6(%arg0: i32) -> (i32, i32) {
    %c0_i32 = arith.constant 0 : i32
    %c0_i32_0 = arith.constant 0 : i32
    %c0_i32_1 = arith.constant 0 : i32
    return %c0_i32, %c0_i32_0 : i32, i32
  }
  func.func @transform_7(%arg0: i32) -> (i32, i32) {
    %c0_i32 = arith.constant 0 : i32
    %c0_i32_0 = arith.constant 0 : i32
    %c0_i32_1 = arith.constant 0 : i32
    return %c0_i32, %c0_i32_0 : i32, i32
  }
  func.func @transform_8(%arg0: i32) -> (i32, i32) {
    %c0_i32 = arith.constant 0 : i32
    %c0_i32_0 = arith.constant 0 : i32
    %c0_i32_1 = arith.constant 0 : i32
    return %c0_i32, %c0_i32_0 : i32, i32
  }
  func.func @transform_9(%arg0: i32) -> (i32, i32) {
    %c0_i32 = arith.constant 0 : i32
    %c0_i32_0 = arith.constant 0 : i32
    %c0_i32_1 = arith.constant 0 : i32
    return %c0_i32, %c0_i32_0 : i32, i32
  }
  func.func @transform_10(%arg0: i32) -> (i32, i32) {
    %c0_i32 = arith.constant 0 : i32
    %c0_i32_0 = arith.constant 0 : i32
    %c0_i32_1 = arith.constant 0 : i32
    return %c0_i32, %c0_i32_0 : i32, i32
  }
  func.func @transform_11(%arg0: i32) -> (i32, i32) {
    %c0_i32 = arith.constant 0 : i32
    %c0_i32_0 = arith.constant 0 : i32
    %c0_i32_1 = arith.constant 0 : i32
    return %c0_i32, %c0_i32_0 : i32, i32
  }
  func.func @transform_12(%arg0: i32) -> (i32, i32) {
    %c0_i32 = arith.constant 0 : i32
    %c0_i32_0 = arith.constant 0 : i32
    %c0_i32_1 = arith.constant 0 : i32
    return %c0_i32, %c0_i32_0 : i32, i32
  }
  func.func @transform_13(%arg0: i32) -> (i32, i32) {
    %c0_i32 = arith.constant 0 : i32
    %c0_i32_0 = arith.constant 0 : i32
    %c0_i32_1 = arith.constant 0 : i32
    return %c0_i32, %c0_i32_0 : i32, i32
  }
  func.func @transform_14(%arg0: i32) -> (i32, i32) {
    %c0_i32 = arith.constant 0 : i32
    %c0_i32_0 = arith.constant 0 : i32
    %c0_i32_1 = arith.constant 0 : i32
    return %c0_i32, %c0_i32_0 : i32, i32
  }
  func.func @transform_15(%arg0: i32) -> (i32, i32) {
    %c0_i32 = arith.constant 0 : i32
    %c0_i32_0 = arith.constant 0 : i32
    %c0_i32_1 = arith.constant 0 : i32
    return %c0_i32, %c0_i32_0 : i32, i32
  }
  func.func @transform_16(%arg0: i32) -> (i32, i32) {
    %c0_i32 = arith.constant 0 : i32
    %c0_i32_0 = arith.constant 0 : i32
    %c0_i32_1 = arith.constant 0 : i32
    return %c0_i32, %c0_i32_0 : i32, i32
  }
  func.func @transform_17(%arg0: i32) -> (i32, i32) {
    %c0_i32 = arith.constant 0 : i32
    %c0_i32_0 = arith.constant 0 : i32
    return %arg0, %c0_i32 : i32, i32
  }
  func.func @transform_18(%arg0: i32) -> (i32, i32) {
    %c0_i32 = arith.constant 0 : i32
    %c0_i32_0 = arith.constant 0 : i32
    return %arg0, %c0_i32 : i32, i32
  }
  func.func @transform_19(%arg0: i32) -> (i32, i32) {
    %c0_i32 = arith.constant 0 : i32
    %c0_i32_0 = arith.constant 0 : i32
    return %arg0, %c0_i32 : i32, i32
  }
  func.func @transform_20(%arg0: i32) -> (i32, i32) {
    %c0_i32 = arith.constant 0 : i32
    %c0_i32_0 = arith.constant 0 : i32
    return %arg0, %c0_i32 : i32, i32
  }
  func.func @transform_21(%arg0: i32) -> (i32, i32) {
    %c0_i32 = arith.constant 0 : i32
    %c0_i32_0 = arith.constant 0 : i32
    return %arg0, %c0_i32 : i32, i32
  }
}

</mosaic_0001>

<bundles_post_ra>
// kernel: _ae_forward_impl.1
= control target key start
LH: loop header
LB: loop body
LE: loop exit
PB: predicated region body
PF: predicated region fallthrough
CT: control target
= control target key end

     0   :  { %s8377_s0 = inlined_call_operand.vmem [shape: f32[64,256], index: 0, kind: input, shape index: {}]   ;;  %s8378_s1 = inlined_call_operand.vmem [shape: f32[256,256], index: 1, kind: input, shape index: {}]   ;;  %s8379_s2 = inlined_call_operand.vmem [shape: f32[1,256], index: 2, kind: input, shape index: {}]   ;;  %s8380_s3 = inlined_call_operand.vmem [shape: f32[256,256], index: 3, kind: input, shape index: {}]   ;;  %s8381_s4 = inlined_call_operand.vmem [shape: f32[1,256], index: 4, kind: input, shape index: {}]   ;;  %s8382_s5 = inlined_call_operand.vmem [shape: f32[256,1024], index: 5, kind: input, shape index: {}]   ;;  %s8383_s6 = inlined_call_operand.vmem [shape: f32[1,1024], index: 6, kind: input, shape index: {}]   ;;  %s8384_s7 = inlined_call_operand.vmem [shape: f32[1024,128], index: 7, kind: input, shape index: {}]   ;;  %s8385_s8 = inlined_call_operand.vmem [shape: f32[1,128], index: 8, kind: input, shape index: {}]   ;;  %s8386_s9 = inlined_call_operand.vmem [shape: f32[128,1024], index: 9, kind: input, shape index: {}]   ;;  %s8387_s10 = inlined_call_operand.vmem [shape: f32[1,1024], index: 10, kind: input, shape index: {}]   ;;  %s8388_s11 = inlined_call_operand.vmem [shape: f32[1024,256], index: 11, kind: input, shape index: {}]   ;;  %s8389_s12 = inlined_call_operand.vmem [shape: f32[1,256], index: 12, kind: input, shape index: {}]   ;;  %s8390_s13 = inlined_call_operand.vmem [shape: f32[256,256], index: 13, kind: input, shape index: {}]   ;;  %s8391_s14 = inlined_call_operand.vmem [shape: f32[1,256], index: 14, kind: input, shape index: {}]   ;;  %s8392_s15 = inlined_call_operand.vmem [shape: f32[256,256], index: 15, kind: input, shape index: {}]   ;;  %s8393_s16 = inlined_call_operand.vmem [shape: f32[1,256], index: 16, kind: input, shape index: {}]   ;;  %s8394_s17 = inlined_call_operand.hbm [shape: f32[64,256], index: 17, kind: output, shape index: {0}]   ;;  %s8395_s18 = inlined_call_operand.hbm [shape: f32[64,256], index: 18, kind: output, shape index: {1}]   ;;  %s8396_s19 = inlined_call_operand.hbm [shape: f32[64,256], index: 19, kind: output, shape index: {2}]   ;;  %s8397_s20 = inlined_call_operand.hbm [shape: f32[64,1024], index: 20, kind: output, shape index: {3}]   ;;  %s8398_s21 = inlined_call_operand.vmem [shape: f32[64,128], index: 21, kind: output, shape index: {4}]  }
   0x1   :  { %8403 = sst [smem:[#allocation12_spill]] %s8377_s0 }
   0x2   :  { %8404 = sst [smem:[#allocation13_spill]] %s8378_s1 }
   0x3   :  { %8405 = sst [smem:[#allocation14_spill]] %s8379_s2 }
   0x4   :  { %8406 = sst [smem:[#allocation15_spill]] %s8380_s3 }
   0x5   :  { %8407 = sst [smem:[#allocation16_spill]] %s8381_s4 }
   0x6   :  { %8408 = sst [smem:[#allocation17_spill]] %s8382_s5 }
   0x7   :  { %27 = vsyncpa [#allocation3], 0 }
   0x8   :  { %28 = vsyncpa [#allocation5], 0  ;;  %s8409_s26 = sld [smem:[#allocation13_spill]] }
   0x9   :  { %s8410_s30 = sld [smem:[#allocation12_spill]] }
   0xa   :  { %s8411_s22 = sld [smem:[#allocation15_spill]] }
   0xe   :  { %v111_v0 = vld [vmem:[%s8409_s26 + $0xf8] sm:$0xff]  ;;  %v110_v1 = vld [vmem:[%s8409_s26 + $0xf0] sm:$0xff]  ;;  %v109_v2 = vld [vmem:[%s8409_s26 + $0xe8] sm:$0xff] }
   0xf   :  { %156 = vmatprep.subr.mxu0 %v111_v0  ;;  %v108_v3 = vld [vmem:[%s8409_s26 + $0xe0] sm:$0xff]  ;;  %v107_v4 = vld [vmem:[%s8409_s26 + $0xd8] sm:$0xff]  ;;  %v106_v5 = vld [vmem:[%s8409_s26 + $0xd0] sm:$0xff] }
  0x10   :  { %157 = vmatpush1.msra.mxu0 %v110_v1  ;;  %v105_v6 = vld [vmem:[%s8409_s26 + $0xc8] sm:$0xff]  ;;  %v104_v7 = vld [vmem:[%s8409_s26 + $0xc0] sm:$0xff]  ;;  %v103_v8 = vld [vmem:[%s8409_s26 + $0xb8] sm:$0xff] }
  0x11   :  { %158 = vmatprep.subr.mxu0 %v109_v2  ;;  %v102_v9 = vld [vmem:[%s8409_s26 + $0xb0] sm:$0xff]  ;;  %v101_v10 = vld [vmem:[%s8409_s26 + $0xa8] sm:$0xff]  ;;  %v100_v11 = vld [vmem:[%s8409_s26 + $0xa0] sm:$0xff] }
  0x12   :  { %159 = vmatpush1.msra.mxu0 %v108_v3  ;;  %v99_v12 = vld [vmem:[%s8409_s26 + $0x98] sm:$0xff]  ;;  %v98_v13 = vld [vmem:[%s8409_s26 + $0x90] sm:$0xff]  ;;  %v97_v14 = vld [vmem:[%s8409_s26 + $0x88] sm:$0xff] }
  0x13   :  { %160 = vmatprep.subr.mxu0 %v107_v4  ;;  %v96_v15 = vld [vmem:[%s8409_s26 + $0x80] sm:$0xff]  ;;  %v95_v16 = vld [vmem:[%s8409_s26 + $0x78] sm:$0xff]  ;;  %v94_v17 = vld [vmem:[%s8409_s26 + $0x70] sm:$0xff] }
  0x14   :  { %161 = vmatpush1.msra.mxu0 %v106_v5  ;;  %v93_v18 = vld [vmem:[%s8409_s26 + $0x68] sm:$0xff]  ;;  %v92_v19 = vld [vmem:[%s8409_s26 + $0x60] sm:$0xff]  ;;  %v91_v20 = vld [vmem:[%s8409_s26 + $0x58] sm:$0xff] }
  0x15   :  { %162 = vmatprep.subr.mxu0 %v105_v6  ;;  %v90_v21 = vld [vmem:[%s8409_s26 + $0x50] sm:$0xff]  ;;  %v89_v22 = vld [vmem:[%s8409_s26 + $0x48] sm:$0xff]  ;;  %v88_v23 = vld [vmem:[%s8409_s26 + $0x40] sm:$0xff] }
  0x16   :  { %163 = vmatpush1.msra.mxu0 %v104_v7  ;;  %v65_v24 = vld [vmem:[%s8410_s30 + $0x8] sm:$0xff]  ;;  %v87_v25 = vld [vmem:[%s8409_s26 + $0x38] sm:$0xff]  ;;  %v86_v26 = vld [vmem:[%s8409_s26 + $0x30] sm:$0xff] }
  0x17   :  { %164 = vmatprep.subr.mxu0 %v103_v8  ;;  %220 = vmatprep.mubr.f32.mxu0 %v65_v24  ;;  %v85_v27 = vld [vmem:[%s8409_s26 + $0x28] sm:$0xff]  ;;  %v84_v28 = vld [vmem:[%s8409_s26 + $0x20] sm:$0xff]  ;;  %v83_v29 = vld [vmem:[%s8409_s26 + $0x18] sm:$0xff] }
  0x18   :  { %165 = vmatpush1.msra.mxu0 %v102_v9  ;;  %v82_v30 = vld [vmem:[%s8409_s26 + $0x10] sm:$0xff]  ;;  %v316_v31 = vld [vmem:[%s8411_s22 + $0xf8] sm:$0xff]  ;;  %v314_v33 = vld [vmem:[%s8411_s22 + $0xe8] sm:$0xff] }
  0x19   :  { %166 = vmatprep.subr.mxu0 %v101_v10  ;;  %361 = vmatprep.subr.mxu1 %v316_v31  ;;  %v315_v32 = vld [vmem:[%s8411_s22 + $0xf0] sm:$0xff]  ;;  %v313_v34 = vld [vmem:[%s8411_s22 + $0xe0] sm:$0xff]  ;;  %v81_v35 = vld [vmem:[%s8409_s26 + $0x8] sm:$0xff] }
  0x1a   :  { %167 = vmatpush1.msra.mxu0 %v100_v11  ;;  %362 = vmatpush1.msra.mxu1 %v315_v32  ;;  %v312_v36 = vld [vmem:[%s8411_s22 + $0xd8] sm:$0xff]  ;;  %v80_v37 = vld [vmem:[%s8409_s26] sm:$0xff]  ;;  %v311_v38 = vld [vmem:[%s8411_s22 + $0xd0] sm:$0xff] }
  0x1b   :  { %168 = vmatprep.subr.mxu0 %v99_v12  ;;  %363 = vmatprep.subr.mxu1 %v314_v33  ;;  %v143_v39 = vld [vmem:[%s8409_s26 + $0x1f8] sm:$0xff]  ;;  %v310_v40 = vld [vmem:[%s8411_s22 + $0xc8] sm:$0xff]  ;;  %v142_v41 = vld [vmem:[%s8409_s26 + $0x1f0] sm:$0xff] }
  0x1c   :  { %169 = vmatpush1.msra.mxu0 %v98_v13  ;;  %364 = vmatpush1.msra.mxu1 %v313_v34  ;;  %v309_v42 = vld [vmem:[%s8411_s22 + $0xc0] sm:$0xff]  ;;  %v141_v43 = vld [vmem:[%s8409_s26 + $0x1e8] sm:$0xff]  ;;  %v308_v44 = vld [vmem:[%s8411_s22 + $0xb8] sm:$0xff] }
  0x1d   :  { %170 = vmatprep.subr.mxu0 %v97_v14  ;;  %365 = vmatprep.subr.mxu1 %v312_v36  ;;  %v140_v45 = vld [vmem:[%s8409_s26 + $0x1e0] sm:$0xff]  ;;  %v307_v46 = vld [vmem:[%s8411_s22 + $0xb0] sm:$0xff]  ;;  %v139_v47 = vld [vmem:[%s8409_s26 + $0x1d8] sm:$0xff] }
  0x1e   :  { %171 = vmatpush1.msra.mxu0 %v96_v15  ;;  %366 = vmatpush1.msra.mxu1 %v311_v38  ;;  %v306_v48 = vld [vmem:[%s8411_s22 + $0xa8] sm:$0xff]  ;;  %v138_v49 = vld [vmem:[%s8409_s26 + $0x1d0] sm:$0xff]  ;;  %v305_v50 = vld [vmem:[%s8411_s22 + $0xa0] sm:$0xff] }
  0x1f   :  { %172 = vmatprep.subr.mxu0 %v95_v16  ;;  %367 = vmatprep.subr.mxu1 %v310_v40  ;;  %v137_v51 = vld [vmem:[%s8409_s26 + $0x1c8] sm:$0xff]  ;;  %v304_v52 = vld [vmem:[%s8411_s22 + $0x98] sm:$0xff]  ;;  %v136_v53 = vld [vmem:[%s8409_s26 + $0x1c0] sm:$0xff] }
  0x20   :  { %173 = vmatpush1.msra.mxu0 %v94_v17  ;;  %368 = vmatpush1.msra.mxu1 %v309_v42  ;;  %v303_v54 = vld [vmem:[%s8411_s22 + $0x90] sm:$0xff]  ;;  %v135_v55 = vld [vmem:[%s8409_s26 + $0x1b8] sm:$0xff]  ;;  %v302_v56 = vld [vmem:[%s8411_s22 + $0x88] sm:$0xff] }
  0x21   :  { %174 = vmatprep.subr.mxu0 %v93_v18  ;;  %369 = vmatprep.subr.mxu1 %v308_v44  ;;  %v134_v57 = vld [vmem:[%s8409_s26 + $0x1b0] sm:$0xff]  ;;  %v301_v58 = vld [vmem:[%s8411_s22 + $0x80] sm:$0xff]  ;;  %v133_v59 = vld [vmem:[%s8409_s26 + $0x1a8] sm:$0xff] }
  0x22   :  { %175 = vmatpush1.msra.mxu0 %v92_v19  ;;  %370 = vmatpush1.msra.mxu1 %v307_v46  ;;  %v300_v60 = vld [vmem:[%s8411_s22 + $0x78] sm:$0xff]  ;;  %v132_v61 = vld [vmem:[%s8409_s26 + $0x1a0] sm:$0xff]  ;;  %v299_v62 = vld [vmem:[%s8411_s22 + $0x70] sm:$0xff] }
  0x23   :  { %176 = vmatprep.subr.mxu0 %v91_v20  ;;  %371 = vmatprep.subr.mxu1 %v306_v48  ;;  %v131_v63 = vld [vmem:[%s8409_s26 + $0x198] sm:$0xff]  ;;  %v298_v0 = vld [vmem:[%s8411_s22 + $0x68] sm:$0xff]  ;;  %v130_v1 = vld [vmem:[%s8409_s26 + $0x190] sm:$0xff] }
  0x24   :  { %177 = vmatpush1.msra.mxu0 %v90_v21  ;;  %372 = vmatpush1.msra.mxu1 %v305_v50  ;;  %v297_v2 = vld [vmem:[%s8411_s22 + $0x60] sm:$0xff]  ;;  %v129_v3 = vld [vmem:[%s8409_s26 + $0x188] sm:$0xff]  ;;  %v296_v4 = vld [vmem:[%s8411_s22 + $0x58] sm:$0xff] }
  0x25   :  { %178 = vmatprep.subr.mxu0 %v89_v22  ;;  %373 = vmatprep.subr.mxu1 %v304_v52  ;;  %v128_v5 = vld [vmem:[%s8409_s26 + $0x180] sm:$0xff]  ;;  %v295_v6 = vld [vmem:[%s8411_s22 + $0x50] sm:$0xff] }
  0x26   :  { %179 = vmatpush1.msra.mxu0 %v88_v23  ;;  %374 = vmatpush1.msra.mxu1 %v303_v54 }
  0x27   :  { %180 = vmatprep.subr.mxu0 %v87_v25  ;;  %375 = vmatprep.subr.mxu1 %v302_v56 }
  0x28   :  { %181 = vmatpush1.msra.mxu0 %v86_v26  ;;  %376 = vmatpush1.msra.mxu1 %v301_v58 }
  0x29   :  { %182 = vmatprep.subr.mxu0 %v85_v27  ;;  %377 = vmatprep.subr.mxu1 %v300_v60 }
  0x2a   :  { %183 = vmatpush1.msra.mxu0 %v84_v28  ;;  %378 = vmatpush1.msra.mxu1 %v299_v62 }
  0x2b   :  { %184 = vmatprep.subr.mxu0 %v83_v29  ;;  %379 = vmatprep.subr.mxu1 %v298_v0 }
  0x2c   :  { %185 = vmatpush1.msra.mxu0 %v82_v30 }
  0x2d   :  { %186 = vmatprep.subr.mxu0 %v81_v35 }
  0x2e   :  { %187 = vmatpush1.msra.mxu0 %v80_v37 }
  0x2f   :  { %188 = vmatprep.subr.mxu0 %v143_v39 }
  0x30   :  { %189 = vmatpush2.msra.mxu0 %v142_v41 }
  0x31   :  { %190 = vmatprep.subr.mxu0 %v141_v43 }
  0x32   :  { %191 = vmatpush2.msra.mxu0 %v140_v45 }
  0x33   :  { %192 = vmatprep.subr.mxu0 %v139_v47 }
  0x34   :  { %193 = vmatpush2.msra.mxu0 %v138_v49 }
  0x35   :  { %194 = vmatprep.subr.mxu0 %v137_v51 }
  0x36   :  { %195 = vmatpush2.msra.mxu0 %v136_v53 }
  0x37   :  { %196 = vmatprep.subr.mxu0 %v135_v55 }
  0x38   :  { %197 = vmatpush2.msra.mxu0 %v134_v57 }
  0x39   :  { %198 = vmatprep.subr.mxu0 %v133_v59 }
  0x3a   :  { %199 = vmatpush2.msra.mxu0 %v132_v61 }
  0x3b   :  { %200 = vmatprep.subr.mxu0 %v131_v63 }
  0x3c   :  { %29 = vsyncpa [#allocation8], 0  ;;  %201 = vmatpush2.msra.mxu0 %v130_v1  ;;  %v127_v7 = vld [vmem:[%s8409_s26 + $0x178] sm:$0xff]  ;;  %380 = vmatpush1.msra.mxu1 %v297_v2  ;;  %v294_v8 = vld [vmem:[%s8411_s22 + $0x48] sm:$0xff]  ;;  %s8412_s2 = sld [smem:[#allocation17_spill]] }
  0x3d   :  { %202 = vmatprep.subr.mxu0 %v129_v3  ;;  %v126_v9 = vld [vmem:[%s8409_s26 + $0x170] sm:$0xff]  ;;  %381 = vmatprep.subr.mxu1 %v296_v4  ;;  %v293_v10 = vld [vmem:[%s8411_s22 + $0x40] sm:$0xff]  ;;  %v125_v11 = vld [vmem:[%s8409_s26 + $0x168] sm:$0xff]  ;;  %s8413_s3 = sld [smem:[#allocation14_spill]] }
  0x3e   :  { %203 = vmatpush2.msra.mxu0 %v128_v5  ;;  %382 = vmatpush1.msra.mxu1 %v295_v6  ;;  %v292_v12 = vld [vmem:[%s8411_s22 + $0x38] sm:$0xff]  ;;  %v124_v13 = vld [vmem:[%s8409_s26 + $0x160] sm:$0xff]  ;;  %v291_v14 = vld [vmem:[%s8411_s22 + $0x30] sm:$0xff]  ;;  %s8414_s23 = sld [smem:[#allocation16_spill]] }
  0x3f   :  { %204 = vmatprep.subr.mxu0 %v127_v7  ;;  %383 = vmatprep.subr.mxu1 %v294_v8  ;;  %v123_v15 = vld [vmem:[%s8409_s26 + $0x158] sm:$0xff]  ;;  %v290_v16 = vld [vmem:[%s8411_s22 + $0x28] sm:$0xff]  ;;  %v122_v17 = vld [vmem:[%s8409_s26 + $0x150] sm:$0xff] }
  0x40   :  { %205 = vmatpush2.msra.mxu0 %v126_v9  ;;  %384 = vmatpush1.msra.mxu1 %v293_v10  ;;  %v289_v18 = vld [vmem:[%s8411_s22 + $0x20] sm:$0xff]  ;;  %v121_v19 = vld [vmem:[%s8409_s26 + $0x148] sm:$0xff]  ;;  %v288_v20 = vld [vmem:[%s8411_s22 + $0x18] sm:$0xff] }
  0x41   :  { %206 = vmatprep.subr.mxu0 %v125_v11  ;;  %385 = vmatprep.subr.mxu1 %v292_v12  ;;  %v120_v21 = vld [vmem:[%s8409_s26 + $0x140] sm:$0xff]  ;;  %v287_v22 = vld [vmem:[%s8411_s22 + $0x10] sm:$0xff]  ;;  %v119_v23 = vld [vmem:[%s8409_s26 + $0x138] sm:$0xff] }
  0x42   :  { %207 = vmatpush2.msra.mxu0 %v124_v13  ;;  %386 = vmatpush1.msra.mxu1 %v291_v14  ;;  %v286_v24 = vld [vmem:[%s8411_s22 + $0x8] sm:$0xff]  ;;  %v118_v25 = vld [vmem:[%s8409_s26 + $0x130] sm:$0xff]  ;;  %v285_v26 = vld [vmem:[%s8411_s22] sm:$0xff] }
  0x43   :  { %208 = vmatprep.subr.mxu0 %v123_v15  ;;  %387 = vmatprep.subr.mxu1 %v290_v16  ;;  %v117_v27 = vld [vmem:[%s8409_s26 + $0x128] sm:$0xff]  ;;  %v348_v28 = vld [vmem:[%s8411_s22 + $0x1f8] sm:$0xff]  ;;  %v116_v29 = vld [vmem:[%s8409_s26 + $0x120] sm:$0xff] }
  0x44   :  { %209 = vmatpush2.msra.mxu0 %v122_v17  ;;  %388 = vmatpush1.msra.mxu1 %v289_v18  ;;  %v347_v30 = vld [vmem:[%s8411_s22 + $0x1f0] sm:$0xff]  ;;  %v115_v31 = vld [vmem:[%s8409_s26 + $0x118] sm:$0xff]  ;;  %v346_v32 = vld [vmem:[%s8411_s22 + $0x1e8] sm:$0xff] }
  0x45   :  { %210 = vmatprep.subr.mxu0 %v121_v19  ;;  %389 = vmatprep.subr.mxu1 %v288_v20  ;;  %v114_v33 = vld [vmem:[%s8409_s26 + $0x110] sm:$0xff]  ;;  %v345_v34 = vld [vmem:[%s8411_s22 + $0x1e0] sm:$0xff]  ;;  %v113_v35 = vld [vmem:[%s8409_s26 + $0x108] sm:$0xff] }
  0x46   :  { %211 = vmatpush2.msra.mxu0 %v120_v21  ;;  %390 = vmatpush1.msra.mxu1 %v287_v22  ;;  %v344_v36 = vld [vmem:[%s8411_s22 + $0x1d8] sm:$0xff]  ;;  %v112_v37 = vld [vmem:[%s8409_s26 + $0x100] sm:$0xff]  ;;  %v343_v38 = vld [vmem:[%s8411_s22 + $0x1d0] sm:$0xff] }
  0x47   :  { %212 = vmatprep.subr.mxu0 %v119_v23  ;;  %391 = vmatprep.subr.mxu1 %v286_v24  ;;  %v64_v39 = vld [vmem:[%s8410_s30] sm:$0xff]  ;;  %v342_v40 = vld [vmem:[%s8411_s22 + $0x1c8] sm:$0xff]  ;;  %v67_v41 = vld [vmem:[%s8410_s30 + $0x18] sm:$0xff] }
  0x48   :  { %213 = vmatpush2.msra.mxu0 %v118_v25  ;;  %392 = vmatpush1.msra.mxu1 %v285_v26  ;;  %v341_v42 = vld [vmem:[%s8411_s22 + $0x1c0] sm:$0xff]  ;;  %v340_v43 = vld [vmem:[%s8411_s22 + $0x1b8] sm:$0xff]  ;;  %v339_v44 = vld [vmem:[%s8411_s22 + $0x1b0] sm:$0xff] }
  0x49   :  { %214 = vmatprep.subr.mxu0 %v117_v27  ;;  %393 = vmatprep.subr.mxu1 %v348_v28  ;;  %v66_v45 = vld [vmem:[%s8410_s30 + $0x10] sm:$0xff]  ;;  %v338_v46 = vld [vmem:[%s8411_s22 + $0x1a8] sm:$0xff]  ;;  %v337_v48 = vld [vmem:[%s8411_s22 + $0x1a0] sm:$0xff] }
  0x4a   :  { %215 = vmatpush2.msra.mxu0 %v116_v29  ;;  %394 = vmatpush2.msra.mxu1 %v347_v30  ;;  %v69_v47 = vld [vmem:[%s8410_s30 + $0x28] sm:$0xff]  ;;  %v336_v49 = vld [vmem:[%s8411_s22 + $0x198] sm:$0xff]  ;;  %v335_v50 = vld [vmem:[%s8411_s22 + $0x190] sm:$0xff] }
  0x4b   :  { %216 = vmatprep.subr.mxu0 %v115_v31  ;;  %395 = vmatprep.subr.mxu1 %v346_v32  ;;  %v68_v51 = vld [vmem:[%s8410_s30 + $0x20] sm:$0xff]  ;;  %v334_v52 = vld [vmem:[%s8411_s22 + $0x188] sm:$0xff]  ;;  %v71_v53 = vld [vmem:[%s8410_s30 + $0x38] sm:$0xff] }
  0x4c   :  { %217 = vmatpush2.msra.mxu0 %v114_v33  ;;  %396 = vmatpush2.msra.mxu1 %v345_v34  ;;  %v333_v54 = vld [vmem:[%s8411_s22 + $0x180] sm:$0xff]  ;;  %v332_v55 = vld [vmem:[%s8411_s22 + $0x178] sm:$0xff]  ;;  %v331_v56 = vld [vmem:[%s8411_s22 + $0x170] sm:$0xff] }
  0x4d   :  { %218 = vmatprep.subr.mxu0 %v113_v35  ;;  %397 = vmatprep.subr.mxu1 %v344_v36  ;;  %v70_v57 = vld [vmem:[%s8410_s30 + $0x30] sm:$0xff]  ;;  %v330_v58 = vld [vmem:[%s8411_s22 + $0x168] sm:$0xff]  ;;  %v329_v60 = vld [vmem:[%s8411_s22 + $0x160] sm:$0xff] }
  0x4e   :  { %219 = vmatpush2.msra.mxu0 %v112_v37  ;;  %398 = vmatpush2.msra.mxu1 %v343_v38  ;;  %v73_v59 = vld [vmem:[%s8410_s30 + $0x48] sm:$0xff]  ;;  %v328_v61 = vld [vmem:[%s8411_s22 + $0x158] sm:$0xff]  ;;  %v327_v62 = vld [vmem:[%s8411_s22 + $0x150] sm:$0xff] }
  0x4f   :  { %221 = vmatmul.mubr.f32.vlgmr.msra.gmra.mxu0 %v64_v39  ;;  %399 = vmatprep.subr.mxu1 %v342_v40  ;;  %v72_v63 = vld [vmem:[%s8410_s30 + $0x40] sm:$0xff]  ;;  %v326_v0 = vld [vmem:[%s8411_s22 + $0x148] sm:$0xff]  ;;  %v75_v1 = vld [vmem:[%s8410_s30 + $0x58] sm:$0xff] }
  0x50   :  { %226 = vmatprep.mubr.f32.mxu0 %v67_v41  ;;  %400 = vmatpush2.msra.mxu1 %v341_v42  ;;  %v325_v2 = vld [vmem:[%s8411_s22 + $0x140] sm:$0xff]  ;;  %v74_v3 = vld [vmem:[%s8410_s30 + $0x50] sm:$0xff]  ;;  %v77_v4 = vld [vmem:[%s8410_s30 + $0x68] sm:$0xff] }
  0x51   :  { %401 = vmatprep.subr.mxu1 %v340_v43  ;;  %v76_v5 = vld [vmem:[%s8410_s30 + $0x60] sm:$0xff]  ;;  %v79_v6 = vld [vmem:[%s8410_s30 + $0x78] sm:$0xff]  ;;  %v78_v7 = vld [vmem:[%s8410_s30 + $0x70] sm:$0xff] }
  0x52   :  { %402 = vmatpush2.msra.mxu1 %v339_v44  ;;  %v324_v8 = vld [vmem:[%s8411_s22 + $0x138] sm:$0xff]  ;;  %v323_v9 = vld [vmem:[%s8411_s22 + $0x130] sm:$0xff]  ;;  %v322_v10 = vld [vmem:[%s8411_s22 + $0x128] sm:$0xff] }
  0x53   :  { %227 = vmatmul.mubr.f32.gmra.mxu0 %v66_v45  ;;  %403 = vmatprep.subr.mxu1 %v338_v46  ;;  %v321_v11 = vld [vmem:[%s8411_s22 + $0x120] sm:$0xff]  ;;  %v320_v12 = vld [vmem:[%s8411_s22 + $0x118] sm:$0xff]  ;;  %v319_v13 = vld [vmem:[%s8411_s22 + $0x110] sm:$0xff] }
  0x54   :  { %232 = vmatprep.mubr.f32.mxu0 %v69_v47  ;;  %404 = vmatpush2.msra.mxu1 %v337_v48  ;;  %v318_v14 = vld [vmem:[%s8411_s22 + $0x108] sm:$0xff]  ;;  %v317_v15 = vld [vmem:[%s8411_s22 + $0x100] sm:$0xff]  ;;  %v613_v17 = vld [vmem:[%s8412_s2 + $0x3d8] sm:$0xff] }
  0x55   :  { %405 = vmatprep.subr.mxu1 %v336_v49  ;;  %v611_v16 = vld [vmem:[%s8412_s2 + $0x3c8] sm:$0xff]  ;;  %v610_v18 = vld [vmem:[%s8412_s2 + $0x3c0] sm:$0xff] }
  0x56   :  { %406 = vmatpush2.msra.mxu1 %v335_v50  ;;  %788 = vmatprep.subr.mxu0 %v611_v16  ;;  %v603_v19 = vld [vmem:[%s8412_s2 + $0x388] sm:$0xff]  ;;  %v602_v20 = vld [vmem:[%s8412_s2 + $0x380] sm:$0xff] }
  0x57   :  { %233 = vmatmul.mubr.f32.gmra.mxu0 %v68_v51  ;;  %407 = vmatprep.subr.mxu1 %v334_v52  ;;  %v595_v21 = vld [vmem:[%s8412_s2 + $0x348] sm:$0xff]  ;;  %v594_v22 = vld [vmem:[%s8412_s2 + $0x340] sm:$0xff] }
  0x58   :  { %238 = vmatprep.mubr.f32.mxu0 %v71_v53  ;;  %408 = vmatpush2.msra.mxu1 %v333_v54  ;;  %v587_v23 = vld [vmem:[%s8412_s2 + $0x308] sm:$0xff]  ;;  %v586_v24 = vld [vmem:[%s8412_s2 + $0x300] sm:$0xff] }
  0x59   :  { %409 = vmatprep.subr.mxu1 %v332_v55  ;;  %789 = vmatpush1.msra.mxu0 %v610_v18  ;;  %v579_v25 = vld [vmem:[%s8412_s2 + $0x2c8] sm:$0xff]  ;;  %v578_v26 = vld [vmem:[%s8412_s2 + $0x2c0] sm:$0xff] }
  0x5a   :  { %410 = vmatpush2.msra.mxu1 %v331_v56  ;;  %790 = vmatprep.subr.mxu0 %v603_v19  ;;  %v571_v27 = vld [vmem:[%s8412_s2 + $0x288] sm:$0xff]  ;;  %v570_v28 = vld [vmem:[%s8412_s2 + $0x280] sm:$0xff] }
  0x5b   :  { %239 = vmatmul.mubr.f32.gmra.mxu0 %v70_v57  ;;  %411 = vmatprep.subr.mxu1 %v330_v58  ;;  %v563_v29 = vld [vmem:[%s8412_s2 + $0x248] sm:$0xff]  ;;  %v562_v30 = vld [vmem:[%s8412_s2 + $0x240] sm:$0xff] }
  0x5c   :  { %244 = vmatprep.mubr.f32.mxu0 %v73_v59  ;;  %412 = vmatpush2.msra.mxu1 %v329_v60  ;;  %v555_v31 = vld [vmem:[%s8412_s2 + $0x208] sm:$0xff]  ;;  %v554_v32 = vld [vmem:[%s8412_s2 + $0x200] sm:$0xff] }
  0x5d   :  { %413 = vmatprep.subr.mxu1 %v328_v61  ;;  %791 = vmatpush1.msra.mxu0 %v602_v20  ;;  %v547_v33 = vld [vmem:[%s8412_s2 + $0x1c8] sm:$0xff]  ;;  %v546_v34 = vld [vmem:[%s8412_s2 + $0x1c0] sm:$0xff] }
  0x5e   :  { %414 = vmatpush2.msra.mxu1 %v327_v62  ;;  %792 = vmatprep.subr.mxu0 %v595_v21  ;;  %v539_v35 = vld [vmem:[%s8412_s2 + $0x188] sm:$0xff]  ;;  %v538_v36 = vld [vmem:[%s8412_s2 + $0x180] sm:$0xff] }
  0x5f   :  { %245 = vmatmul.mubr.f32.gmra.mxu0 %v72_v63  ;;  %415 = vmatprep.subr.mxu1 %v326_v0  ;;  %v531_v37 = vld [vmem:[%s8412_s2 + $0x148] sm:$0xff]  ;;  %v530_v38 = vld [vmem:[%s8412_s2 + $0x140] sm:$0xff] }
  0x60   :  { %250 = vmatprep.mubr.f32.mxu0 %v75_v1  ;;  %416 = vmatpush2.msra.mxu1 %v325_v2  ;;  %v523_v39 = vld [vmem:[%s8412_s2 + $0x108] sm:$0xff]  ;;  %v522_v40 = vld [vmem:[%s8412_s2 + $0x100] sm:$0xff] }
  0x61   :  { %417 = vmatprep.subr.mxu1 %v324_v8  ;;  %793 = vmatpush1.msra.mxu0 %v594_v22  ;;  %v515_v41 = vld [vmem:[%s8412_s2 + $0xc8] sm:$0xff]  ;;  %v514_v42 = vld [vmem:[%s8412_s2 + $0xc0] sm:$0xff] }
  0x62   :  { %418 = vmatpush2.msra.mxu1 %v323_v9  ;;  %794 = vmatprep.subr.mxu0 %v587_v23  ;;  %v507_v43 = vld [vmem:[%s8412_s2 + $0x88] sm:$0xff]  ;;  %v506_v44 = vld [vmem:[%s8412_s2 + $0x80] sm:$0xff] }
  0x63   :  { %251 = vmatmul.mubr.f32.gmra.mxu0 %v74_v3  ;;  %419 = vmatprep.subr.mxu1 %v322_v10  ;;  %v499_v45 = vld [vmem:[%s8412_s2 + $0x48] sm:$0xff]  ;;  %v498_v46 = vld [vmem:[%s8412_s2 + $0x40] sm:$0xff]  ;;  %v146_v10 = vlaneseq }
  0x64   :  { %256 = vmatprep.mubr.f32.mxu0 %v77_v4  ;;  %420 = vmatpush2.msra.mxu1 %v321_v11  ;;  %v491_v47 = vld [vmem:[%s8412_s2 + $0x8] sm:$0xff]  ;;  %v490_v48 = vld [vmem:[%s8412_s2] sm:$0xff] }
  0x65   :  { %421 = vmatprep.subr.mxu1 %v320_v12  ;;  %795 = vmatpush1.msra.mxu0 %v586_v24  ;;  %v739_v49 = vld [vmem:[%s8412_s2 + $0x7c8] sm:$0xff]  ;;  %v738_v50 = vld [vmem:[%s8412_s2 + $0x7c0] sm:$0xff]  ;;  %v5083_v11 = vshrl.u32 %v146_v10, 7  ;;  %v533_v10 = vld [vmem:[%s8412_s2 + $0x158] sm:$0xff] }
  0x66   :  { %422 = vmatpush2.msra.mxu1 %v319_v13  ;;  %796 = vmatprep.subr.mxu0 %v579_v25  ;;  %v731_v51 = vld [vmem:[%s8412_s2 + $0x788] sm:$0xff]  ;;  %v730_v52 = vld [vmem:[%s8412_s2 + $0x780] sm:$0xff] }
  0x67   :  { %257 = vmatmul.mubr.f32.gmra.mxu0 %v76_v5  ;;  %423 = vmatprep.subr.mxu1 %v318_v14  ;;  %v723_v53 = vld [vmem:[%s8412_s2 + $0x748] sm:$0xff]  ;;  %v722_v54 = vld [vmem:[%s8412_s2 + $0x740] sm:$0xff]  ;;  %v5086_v12 = vsub.s32 0, %v5083_v11  ;;  %v5092_v14 = vsub.s32 1, %v5083_v11 }
  0x68   :  { %262 = vmatprep.mubr.f32.mxu0 %v79_v6  ;;  %424 = vmatpush2.msra.mxu1 %v317_v15  ;;  %v715_v55 = vld [vmem:[%s8412_s2 + $0x708] sm:$0xff]  ;;  %v714_v56 = vld [vmem:[%s8412_s2 + $0x700] sm:$0xff] }
  0x69   :  { %901 = vmatprep.subr.mxu1 %v613_v17  ;;  %797 = vmatpush1.msra.mxu0 %v578_v26  ;;  %v707_v57 = vld [vmem:[%s8412_s2 + $0x6c8] sm:$0xff]  ;;  %v706_v58 = vld [vmem:[%s8412_s2 + $0x6c0] sm:$0xff]  ;;  %v612_v26 = vld [vmem:[%s8412_s2 + $0x3d0] sm:$0xff] }
  0x6a   :  { %798 = vmatprep.subr.mxu0 %v571_v27  ;;  %v699_v59 = vld [vmem:[%s8412_s2 + $0x688] sm:$0xff]  ;;  %v698_v60 = vld [vmem:[%s8412_s2 + $0x680] sm:$0xff] }
  0x6b   :  { %263 = vmatmul.mubr.f32.gmra.mxu0 %v78_v7  ;;  %v691_v61 = vld [vmem:[%s8412_s2 + $0x648] sm:$0xff]  ;;  %v690_v62 = vld [vmem:[%s8412_s2 + $0x640] sm:$0xff] }
  0x6c   :  { %799 = vmatpush1.msra.mxu0 %v570_v28  ;;  %v683_v63 = vld [vmem:[%s8412_s2 + $0x608] sm:$0xff]  ;;  %v682_v0 = vld [vmem:[%s8412_s2 + $0x600] sm:$0xff] }
  0x6d   :  { %800 = vmatprep.subr.mxu0 %v563_v29  ;;  %v675_v1 = vld [vmem:[%s8412_s2 + $0x5c8] sm:$0xff]  ;;  %v674_v2 = vld [vmem:[%s8412_s2 + $0x5c0] sm:$0xff]  ;;  %v605_v29 = vld [vmem:[%s8412_s2 + $0x398] sm:$0xff] }
  0x6e   :  { %801 = vmatpush1.msra.mxu0 %v562_v30  ;;  %v667_v3 = vld [vmem:[%s8412_s2 + $0x588] sm:$0xff]  ;;  %v666_v4 = vld [vmem:[%s8412_s2 + $0x580] sm:$0xff] }
  0x6f   :  { %802 = vmatprep.subr.mxu0 %v555_v31  ;;  %v659_v5 = vld [vmem:[%s8412_s2 + $0x548] sm:$0xff]  ;;  %v658_v6 = vld [vmem:[%s8412_s2 + $0x540] sm:$0xff]  ;;  %v604_v31 = vld [vmem:[%s8412_s2 + $0x390] sm:$0xff] }
  0x70   :  { %803 = vmatpush1.msra.mxu0 %v554_v32  ;;  %v651_v7 = vld [vmem:[%s8412_s2 + $0x508] sm:$0xff]  ;;  %v650_v8 = vld [vmem:[%s8412_s2 + $0x500] sm:$0xff] }
  0x71   :  { %804 = vmatprep.subr.mxu0 %v547_v33  ;;  %v643_v9 = vld [vmem:[%s8412_s2 + $0x4c8] sm:$0xff]  ;;  %v144_v13 = vld [vmem:[%s8413_s3] sm:$0x3] }
  0x72   :  { %805 = vmatpush1.msra.mxu0 %v546_v34  ;;  %v5095_v15 = vrot.slane %v144_v13, %v5086_v12  ;;  %v5098_v16 = vrot.slane %v144_v13, %v5092_v14  ;;  %v597_v34 = vld [vmem:[%s8412_s2 + $0x358] sm:$0xff] }
  0x73   :  { %806 = vmatprep.subr.mxu0 %v539_v35 }
  0x74   :  { %807 = vmatpush1.msra.mxu0 %v538_v36  ;;  %v596_v36 = vld [vmem:[%s8412_s2 + $0x350] sm:$0xff] }
  0x75   :  { %808 = vmatprep.subr.mxu0 %v531_v37 }
  0x76   :  { %809 = vmatpush1.msra.mxu0 %v530_v38 }
  0x77   :  { %810 = vmatprep.subr.mxu0 %v523_v39  ;;  %v589_v39 = vld [vmem:[%s8412_s2 + $0x318] sm:$0xff] }
  0x78   :  { %811 = vmatpush1.msra.mxu0 %v522_v40 }
  0x79   :  { %812 = vmatprep.subr.mxu0 %v515_v41  ;;  %v588_v41 = vld [vmem:[%s8412_s2 + $0x310] sm:$0xff] }
  0x7a   :  { %813 = vmatpush1.msra.mxu0 %v514_v42 }
  0x7b   :  { %814 = vmatprep.subr.mxu0 %v507_v43 }
  0x7c   :  { %815 = vmatpush1.msra.mxu0 %v506_v44  ;;  %v581_v44 = vld [vmem:[%s8412_s2 + $0x2d8] sm:$0xff] }
  0x7d   :  { %816 = vmatprep.subr.mxu0 %v499_v45 }
  0x7e   :  { %817 = vmatpush1.msra.mxu0 %v498_v46  ;;  %v580_v46 = vld [vmem:[%s8412_s2 + $0x2d0] sm:$0xff] }
  0x7f   :  { %818 = vmatprep.subr.mxu0 %v491_v47 }
  0x80   :  { %819 = vmatpush1.msra.mxu0 %v490_v48 }
  0x81   :  { %820 = vmatprep.subr.mxu0 %v739_v49  ;;  %v573_v49 = vld [vmem:[%s8412_s2 + $0x298] sm:$0xff] }
  0x82   :  { %821 = vmatpush2.msra.mxu0 %v738_v50 }
  0x83   :  { %822 = vmatprep.subr.mxu0 %v731_v51  ;;  %v572_v51 = vld [vmem:[%s8412_s2 + $0x290] sm:$0xff] }
  0x84   :  { %823 = vmatpush2.msra.mxu0 %v730_v52 }
  0x85   :  { %824 = vmatprep.subr.mxu0 %v723_v53 }
  0x86   :  { %825 = vmatpush2.msra.mxu0 %v722_v54  ;;  %v565_v54 = vld [vmem:[%s8412_s2 + $0x258] sm:$0xff] }
  0x87   :  { %826 = vmatprep.subr.mxu0 %v715_v55 }
  0x88   :  { %827 = vmatpush2.msra.mxu0 %v714_v56  ;;  %v564_v56 = vld [vmem:[%s8412_s2 + $0x250] sm:$0xff] }
  0x89   :  { %828 = vmatprep.subr.mxu0 %v707_v57 }
  0x8a   :  { %829 = vmatpush2.msra.mxu0 %v706_v58 }
  0x8b   :  { %830 = vmatprep.subr.mxu0 %v699_v59  ;;  %v557_v59 = vld [vmem:[%s8412_s2 + $0x218] sm:$0xff] }
  0x8c   :  { %831 = vmatpush2.msra.mxu0 %v698_v60 }
  0x8d   :  { %832 = vmatprep.subr.mxu0 %v691_v61  ;;  %v556_v61 = vld [vmem:[%s8412_s2 + $0x210] sm:$0xff] }
  0x8e   :  { %833 = vmatpush2.msra.mxu0 %v690_v62 }
  0x8f   :  { %834 = vmatprep.subr.mxu0 %v683_v63 }
  0x90   :  { %835 = vmatpush2.msra.mxu0 %v682_v0  ;;  %v549_v0 = vld [vmem:[%s8412_s2 + $0x1d8] sm:$0xff] }
  0x91   :  { %836 = vmatprep.subr.mxu0 %v675_v1 }
  0x92   :  { %837 = vmatpush2.msra.mxu0 %v674_v2  ;;  %v548_v2 = vld [vmem:[%s8412_s2 + $0x1d0] sm:$0xff] }
  0x93   :  { %838 = vmatprep.subr.mxu0 %v667_v3 }
  0x94   :  { %839 = vmatpush2.msra.mxu0 %v666_v4 }
  0x95   :  { %840 = vmatprep.subr.mxu0 %v659_v5  ;;  %v541_v5 = vld [vmem:[%s8412_s2 + $0x198] sm:$0xff] }
  0x96   :  { %841 = vmatpush2.msra.mxu0 %v658_v6 }
  0x97   :  { %842 = vmatprep.subr.mxu0 %v651_v7  ;;  %v540_v7 = vld [vmem:[%s8412_s2 + $0x190] sm:$0xff] }
  0x98   :  { %843 = vmatpush2.msra.mxu0 %v650_v8 }
  0x99   :  { %844 = vmatprep.subr.mxu0 %v643_v9 }
 0x10f   :  { %v222_v17 = vpop.f32.mrf.mxu0 }
 0x110   :  { %v223_v18 = vadd.f32 %v222_v17, %v5095_v15  ;;  %v532_v17 = vld [vmem:[%s8412_s2 + $0x150] sm:$0xff] }
 0x111   :  { %v224_v19 = vpop.f32.mrf.mxu0 }
 0x112   :  { %v269_v20 = vmax.f32 %v223_v18, 0.0  ;;  %v225_v21 = vadd.f32 %v224_v19, %v5098_v16 }
 0x113   :  { %v228_v22 = vpop.f32.mrf.mxu0 }
 0x114   :  { %3787 = vst [vmem:[#allocation4] sm:$0xff] %v269_v20  ;;  %v229_v23 = vadd.f32 %v228_v22, %v5095_v15  ;;  %v270_v24 = vmax.f32 %v225_v21, 0.0  ;;  %v524_v22 = vld [vmem:[%s8412_s2 + $0x110] sm:$0xff] }
 0x115   :  { %v230_v25 = vpop.f32.mrf.mxu0 }
 0x116   :  { %v271_v27 = vmax.f32 %v229_v23, 0.0  ;;  %v231_v28 = vadd.f32 %v230_v25, %v5098_v16  ;;  %425 = vmatprep.mubr.f32.mxu1 %v270_v24  ;;  %3788 = vst [vmem:[#allocation4 + $0x8] sm:$0xff] %v270_v24  ;;  %v517_v25 = vld [vmem:[%s8412_s2 + $0xd8] sm:$0xff] }
 0x117   :  { %v234_v30 = vpop.f32.mrf.mxu0  ;;  %426 = vmatmul.mubr.f32.vlgmr.msra.gmra.mxu1 %v269_v20  ;;  %v525_v20 = vld [vmem:[%s8412_s2 + $0x118] sm:$0xff] }
 0x118   :  { %3789 = vst [vmem:[#allocation4 + $0x10] sm:$0xff] %v271_v27  ;;  %v272_v32 = vmax.f32 %v231_v28, 0.0  ;;  %v235_v33 = vadd.f32 %v234_v30, %v5095_v15  ;;  %902 = vmatpush1.msra.mxu1 %v612_v26  ;;  %v508_v30 = vld [vmem:[%s8412_s2 + $0x90] sm:$0xff] }
 0x119   :  { %v236_v35 = vpop.f32.mrf.mxu0  ;;  %903 = vmatprep.subr.mxu1 %v605_v29 }
 0x11a   :  { %3790 = vst [vmem:[#allocation4 + $0x18] sm:$0xff] %v272_v32  ;;  %v273_v37 = vmax.f32 %v235_v33, 0.0  ;;  %v237_v38 = vadd.f32 %v236_v35, %v5098_v16  ;;  %431 = vmatprep.mubr.f32.mxu1 %v272_v32  ;;  %904 = vmatpush1.msra.mxu1 %v604_v31  ;;  %v501_v32 = vld [vmem:[%s8412_s2 + $0x58] sm:$0xff] }
 0x11b   :  { %v240_v40 = vpop.f32.mrf.mxu0  ;;  %432 = vmatmul.mubr.f32.gmra.mxu1 %v271_v27  ;;  %905 = vmatprep.subr.mxu1 %v597_v34  ;;  %v516_v27 = vld [vmem:[%s8412_s2 + $0xd0] sm:$0xff]  ;;  %v493_v33 = vld [vmem:[%s8412_s2 + $0x18] sm:$0xff] }
 0x11c   :  { %3791 = vst [vmem:[#allocation4 + $0x20] sm:$0xff] %v273_v37  ;;  %v274_v42 = vmax.f32 %v237_v38, 0.0  ;;  %v241_v43 = vadd.f32 %v240_v40, %v5095_v15  ;;  %906 = vmatpush1.msra.mxu1 %v596_v36  ;;  %v492_v34 = vld [vmem:[%s8412_s2 + $0x10] sm:$0xff]  ;;  %v741_v35 = vld [vmem:[%s8412_s2 + $0x7d8] sm:$0xff] }
 0x11d   :  { %v242_v45 = vpop.f32.mrf.mxu0  ;;  %907 = vmatprep.subr.mxu1 %v589_v39  ;;  %v740_v36 = vld [vmem:[%s8412_s2 + $0x7d0] sm:$0xff]  ;;  %v725_v39 = vld [vmem:[%s8412_s2 + $0x758] sm:$0xff] }
 0x11e   :  { %3792 = vst [vmem:[#allocation4 + $0x28] sm:$0xff] %v274_v42  ;;  %v275_v47 = vmax.f32 %v241_v43, 0.0  ;;  %v243_v48 = vadd.f32 %v242_v45, %v5098_v16  ;;  %437 = vmatprep.mubr.f32.mxu1 %v274_v42  ;;  %908 = vmatpush1.msra.mxu1 %v588_v41  ;;  %v732_v38 = vld [vmem:[%s8412_s2 + $0x790] sm:$0xff]  ;;  %v717_v41 = vld [vmem:[%s8412_s2 + $0x718] sm:$0xff] }
 0x11f   :  { %v246_v50 = vpop.f32.mrf.mxu0  ;;  %438 = vmatmul.mubr.f32.gmra.mxu1 %v273_v37  ;;  %909 = vmatprep.subr.mxu1 %v581_v44  ;;  %v733_v37 = vld [vmem:[%s8412_s2 + $0x798] sm:$0xff]  ;;  %v724_v40 = vld [vmem:[%s8412_s2 + $0x750] sm:$0xff] }
 0x120   :  { %3793 = vst [vmem:[#allocation4 + $0x30] sm:$0xff] %v275_v47  ;;  %v276_v52 = vmax.f32 %v243_v48, 0.0  ;;  %v247_v53 = vadd.f32 %v246_v50, %v5095_v15  ;;  %910 = vmatpush1.msra.mxu1 %v580_v46  ;;  %v716_v42 = vld [vmem:[%s8412_s2 + $0x710] sm:$0xff]  ;;  %v709_v43 = vld [vmem:[%s8412_s2 + $0x6d8] sm:$0xff] }
 0x121   :  { %v248_v55 = vpop.f32.mrf.mxu0  ;;  %911 = vmatprep.subr.mxu1 %v573_v49  ;;  %v708_v44 = vld [vmem:[%s8412_s2 + $0x6d0] sm:$0xff]  ;;  %v701_v45 = vld [vmem:[%s8412_s2 + $0x698] sm:$0xff] }
 0x122   :  { %3794 = vst [vmem:[#allocation4 + $0x38] sm:$0xff] %v276_v52  ;;  %v277_v57 = vmax.f32 %v247_v53, 0.0  ;;  %v249_v58 = vadd.f32 %v248_v55, %v5098_v16  ;;  %443 = vmatprep.mubr.f32.mxu1 %v276_v52  ;;  %912 = vmatpush1.msra.mxu1 %v572_v51  ;;  %v700_v46 = vld [vmem:[%s8412_s2 + $0x690] sm:$0xff]  ;;  %v685_v49 = vld [vmem:[%s8412_s2 + $0x618] sm:$0xff] }
 0x123   :  { %v252_v60 = vpop.f32.mrf.mxu0  ;;  %444 = vmatmul.mubr.f32.gmra.mxu1 %v275_v47  ;;  %913 = vmatprep.subr.mxu1 %v565_v54  ;;  %v693_v47 = vld [vmem:[%s8412_s2 + $0x658] sm:$0xff]  ;;  %v692_v48 = vld [vmem:[%s8412_s2 + $0x650] sm:$0xff] }
 0x124   :  { %3795 = vst [vmem:[#allocation4 + $0x40] sm:$0xff] %v277_v57  ;;  %v278_v62 = vmax.f32 %v249_v58, 0.0  ;;  %v253_v63 = vadd.f32 %v252_v60, %v5095_v15  ;;  %914 = vmatpush1.msra.mxu1 %v564_v56  ;;  %v684_v50 = vld [vmem:[%s8412_s2 + $0x610] sm:$0xff]  ;;  %v677_v51 = vld [vmem:[%s8412_s2 + $0x5d8] sm:$0xff]  ;;  %v642_v60 = vld [vmem:[%s8412_s2 + $0x4c0] sm:$0xff] }
 0x125   :  { %v254_v1 = vpop.f32.mrf.mxu0  ;;  %915 = vmatprep.subr.mxu1 %v557_v59  ;;  %v676_v52 = vld [vmem:[%s8412_s2 + $0x5d0] sm:$0xff]  ;;  %v669_v53 = vld [vmem:[%s8412_s2 + $0x598] sm:$0xff]  ;;  %845 = vmatpush2.msra.mxu0 %v642_v60  ;;  %v582_v60 = vld [vmem:[%s8412_s2 + $0x2e0] sm:$0xff] }
 0x126   :  { %3796 = vst [vmem:[#allocation4 + $0x48] sm:$0xff] %v278_v62  ;;  %v279_v3 = vmax.f32 %v253_v63, 0.0  ;;  %v255_v4 = vadd.f32 %v254_v1, %v5098_v16  ;;  %449 = vmatprep.mubr.f32.mxu1 %v278_v62  ;;  %916 = vmatpush1.msra.mxu1 %v556_v61  ;;  %v668_v54 = vld [vmem:[%s8412_s2 + $0x590] sm:$0xff]  ;;  %v661_v55 = vld [vmem:[%s8412_s2 + $0x558] sm:$0xff]  ;;  %v635_v62 = vld [vmem:[%s8412_s2 + $0x488] sm:$0xff] }
 0x127   :  { %v258_v6 = vpop.f32.mrf.mxu0  ;;  %450 = vmatmul.mubr.f32.gmra.mxu1 %v277_v57  ;;  %917 = vmatprep.subr.mxu1 %v549_v0  ;;  %v660_v56 = vld [vmem:[%s8412_s2 + $0x550] sm:$0xff]  ;;  %v653_v57 = vld [vmem:[%s8412_s2 + $0x518] sm:$0xff]  ;;  %v634_v0 = vld [vmem:[%s8412_s2 + $0x480] sm:$0xff] }
 0x128   :  { %3797 = vst [vmem:[#allocation4 + $0x50] sm:$0xff] %v279_v3  ;;  %v280_v8 = vmax.f32 %v255_v4, 0.0  ;;  %v259_v9 = vadd.f32 %v258_v6, %v5095_v15  ;;  %918 = vmatpush1.msra.mxu1 %v548_v2  ;;  %v652_v58 = vld [vmem:[%s8412_s2 + $0x510] sm:$0xff]  ;;  %v645_v59 = vld [vmem:[%s8412_s2 + $0x4d8] sm:$0xff]  ;;  %846 = vmatprep.subr.mxu0 %v635_v62  ;;  %v627_v2 = vld [vmem:[%s8412_s2 + $0x448] sm:$0xff] }
 0x129   :  { %v260_v13 = vpop.f32.mrf.mxu0  ;;  %919 = vmatprep.subr.mxu1 %v541_v5  ;;  %v644_v61 = vld [vmem:[%s8412_s2 + $0x4d0] sm:$0xff]  ;;  %v637_v63 = vld [vmem:[%s8412_s2 + $0x498] sm:$0xff]  ;;  %847 = vmatpush2.msra.mxu0 %v634_v0  ;;  %v626_v4 = vld [vmem:[%s8412_s2 + $0x440] sm:$0xff] }
 0x12a   :  { %3798 = vst [vmem:[#allocation4 + $0x58] sm:$0xff] %v280_v8  ;;  %v281_v18 = vmax.f32 %v259_v9, 0.0  ;;  %v261_v19 = vadd.f32 %v260_v13, %v5098_v16  ;;  %455 = vmatprep.mubr.f32.mxu1 %v280_v8  ;;  %920 = vmatpush1.msra.mxu1 %v540_v7  ;;  %v636_v1 = vld [vmem:[%s8412_s2 + $0x490] sm:$0xff]  ;;  %v619_v6 = vld [vmem:[%s8412_s2 + $0x408] sm:$0xff]  ;;  %v621_v7 = vld [vmem:[%s8412_s2 + $0x418] sm:$0xff] }
 0x12b   :  { %v264_v21 = vpop.f32.mrf.mxu0  ;;  %456 = vmatmul.mubr.f32.gmra.mxu1 %v279_v3  ;;  %921 = vmatprep.subr.mxu1 %v533_v10  ;;  %v629_v3 = vld [vmem:[%s8412_s2 + $0x458] sm:$0xff]  ;;  %v628_v5 = vld [vmem:[%s8412_s2 + $0x450] sm:$0xff]  ;;  %v618_v8 = vld [vmem:[%s8412_s2 + $0x400] sm:$0xff] }
 0x12c   :  { %3799 = vst [vmem:[#allocation4 + $0x60] sm:$0xff] %v281_v18  ;;  %v282_v23 = vmax.f32 %v261_v19, 0.0  ;;  %v265_v24 = vadd.f32 %v264_v21, %v5095_v15  ;;  %922 = vmatpush1.msra.mxu1 %v532_v17  ;;  %v509_v15 = vld [vmem:[%s8412_s2 + $0x98] sm:$0xff]  ;;  %848 = vmatprep.subr.mxu0 %v627_v2  ;;  %v620_v9 = vld [vmem:[%s8412_s2 + $0x410] sm:$0xff]  ;;  %v615_v10 = vld [vmem:[%s8412_s2 + $0x3e8] sm:$0xff] }
 0x12d   :  { %v266_v26 = vpop.f32.mrf.mxu0  ;;  %923 = vmatprep.subr.mxu1 %v525_v20  ;;  %849 = vmatpush2.msra.mxu0 %v626_v4  ;;  %v617_v13 = vld [vmem:[%s8412_s2 + $0x3f8] sm:$0xff]  ;;  %v349_v17 = vld [vmem:[%s8414_s23] sm:$0x3]  ;;  %v575_v0 = vld [vmem:[%s8412_s2 + $0x2a8] sm:$0xff] }
 0x12e   :  { %3800 = vst [vmem:[#allocation4 + $0x68] sm:$0xff] %v282_v23  ;;  %v283_v28 = vmax.f32 %v265_v24, 0.0  ;;  %v267_v29 = vadd.f32 %v266_v26, %v5098_v16  ;;  %461 = vmatprep.mubr.f32.mxu1 %v282_v23  ;;  %924 = vmatpush1.msra.mxu1 %v524_v22  ;;  %v500_v16 = vld [vmem:[%s8412_s2 + $0x50] sm:$0xff]  ;;  %v5339_v19 = vrot.slane %v349_v17, %v5092_v14 }
 0x12f   :  { %462 = vmatmul.mubr.f32.gmra.mxu1 %v281_v18  ;;  %925 = vmatprep.subr.mxu1 %v517_v25  ;;  %v5336_v18 = vrot.slane %v349_v17, %v5086_v12  ;;  %v576_v4 = vld [vmem:[%s8412_s2 + $0x2b0] sm:$0xff] }
 0x130   :  { %3801 = vst [vmem:[#allocation4 + $0x70] sm:$0xff] %v283_v28  ;;  %v284_v31 = vmax.f32 %v267_v29, 0.0  ;;  %926 = vmatpush1.msra.mxu1 %v516_v27  ;;  %850 = vmatprep.subr.mxu0 %v619_v6  ;;  %v614_v29 = vld [vmem:[%s8412_s2 + $0x3e0] sm:$0xff] }
 0x131   :  { %927 = vmatprep.subr.mxu1 %v509_v15  ;;  %851 = vmatpush2.msra.mxu0 %v618_v8  ;;  %v616_v15 = vld [vmem:[%s8412_s2 + $0x3f0] sm:$0xff]  ;;  %v567_v8 = vld [vmem:[%s8412_s2 + $0x268] sm:$0xff] }
 0x132   :  { %3802 = vst [vmem:[#allocation4 + $0x78] sm:$0xff] %v284_v31  ;;  %467 = vmatprep.mubr.f32.mxu1 %v284_v31  ;;  %928 = vmatpush1.msra.mxu1 %v508_v30 }
 0x133   :  { %468 = vmatmul.mubr.f32.gmra.mxu1 %v283_v28  ;;  %929 = vmatprep.subr.mxu1 %v501_v32  ;;  %v607_v32 = vld [vmem:[%s8412_s2 + $0x3a8] sm:$0xff] }
 0x134   :  { %930 = vmatpush1.msra.mxu1 %v500_v16  ;;  %1014 = vmatprep.subr.mxu0 %v615_v10  ;;  %v609_v16 = vld [vmem:[%s8412_s2 + $0x3b8] sm:$0xff] }
 0x135   :  { %931 = vmatprep.subr.mxu1 %v493_v33 }
 0x136   :  { %932 = vmatpush1.msra.mxu1 %v492_v34  ;;  %v606_v34 = vld [vmem:[%s8412_s2 + $0x3a0] sm:$0xff] }
 0x137   :  { %933 = vmatprep.subr.mxu1 %v741_v35  ;;  %v608_v35 = vld [vmem:[%s8412_s2 + $0x3b0] sm:$0xff] }
 0x138   :  { %934 = vmatpush2.msra.mxu1 %v740_v36 }
 0x139   :  { %935 = vmatprep.subr.mxu1 %v733_v37 }
 0x13a   :  { %936 = vmatpush2.msra.mxu1 %v732_v38 }
 0x13b   :  { %937 = vmatprep.subr.mxu1 %v725_v39  ;;  %v599_v39 = vld [vmem:[%s8412_s2 + $0x368] sm:$0xff] }
 0x13c   :  { %938 = vmatpush2.msra.mxu1 %v724_v40  ;;  %v601_v40 = vld [vmem:[%s8412_s2 + $0x378] sm:$0xff] }
 0x13d   :  { %939 = vmatprep.subr.mxu1 %v717_v41 }
 0x13e   :  { %940 = vmatpush2.msra.mxu1 %v716_v42 }
 0x13f   :  { %941 = vmatprep.subr.mxu1 %v709_v43 }
 0x140   :  { %942 = vmatpush2.msra.mxu1 %v708_v44  ;;  %v598_v44 = vld [vmem:[%s8412_s2 + $0x360] sm:$0xff] }
 0x141   :  { %943 = vmatprep.subr.mxu1 %v701_v45  ;;  %v600_v45 = vld [vmem:[%s8412_s2 + $0x370] sm:$0xff] }
 0x142   :  { %944 = vmatpush2.msra.mxu1 %v700_v46 }
 0x143   :  { %945 = vmatprep.subr.mxu1 %v693_v47 }
 0x144   :  { %946 = vmatpush2.msra.mxu1 %v692_v48  ;;  %v591_v48 = vld [vmem:[%s8412_s2 + $0x328] sm:$0xff] }
 0x145   :  { %947 = vmatprep.subr.mxu1 %v685_v49  ;;  %v593_v49 = vld [vmem:[%s8412_s2 + $0x338] sm:$0xff] }
 0x146   :  { %948 = vmatpush2.msra.mxu1 %v684_v50 }
 0x147   :  { %949 = vmatprep.subr.mxu1 %v677_v51  ;;  %v590_v51 = vld [vmem:[%s8412_s2 + $0x320] sm:$0xff] }
 0x148   :  { %950 = vmatpush2.msra.mxu1 %v676_v52  ;;  %v592_v52 = vld [vmem:[%s8412_s2 + $0x330] sm:$0xff] }
 0x149   :  { %951 = vmatprep.subr.mxu1 %v669_v53 }
 0x14a   :  { %952 = vmatpush2.msra.mxu1 %v668_v54 }
 0x14b   :  { %953 = vmatprep.subr.mxu1 %v661_v55  ;;  %v583_v55 = vld [vmem:[%s8412_s2 + $0x2e8] sm:$0xff] }
 0x14c   :  { %954 = vmatpush2.msra.mxu1 %v660_v56  ;;  %v585_v56 = vld [vmem:[%s8412_s2 + $0x2f8] sm:$0xff] }
 0x14d   :  { %955 = vmatprep.subr.mxu1 %v653_v57 }
 0x14e   :  { %956 = vmatpush2.msra.mxu1 %v652_v58 }
 0x14f   :  { %957 = vmatprep.subr.mxu1 %v645_v59 }
 0x150   :  { %958 = vmatpush2.msra.mxu1 %v644_v61  ;;  %v584_v61 = vld [vmem:[%s8412_s2 + $0x2f0] sm:$0xff] }
 0x151   :  { %959 = vmatprep.subr.mxu1 %v637_v63 }
 0x152   :  { %960 = vmatpush2.msra.mxu1 %v636_v1  ;;  %v577_v1 = vld [vmem:[%s8412_s2 + $0x2b8] sm:$0xff] }
 0x153   :  { %961 = vmatprep.subr.mxu1 %v629_v3  ;;  %v574_v3 = vld [vmem:[%s8412_s2 + $0x2a0] sm:$0xff] }
 0x154   :  { %962 = vmatpush2.msra.mxu1 %v628_v5 }
 0x155   :  { %963 = vmatprep.subr.mxu1 %v621_v7 }
 0x156   :  { %964 = vmatpush2.msra.mxu1 %v620_v9  ;;  %v569_v9 = vld [vmem:[%s8412_s2 + $0x278] sm:$0xff] }
 0x157   :  { %1127 = vmatprep.subr.mxu1 %v617_v13 }
 0x1d7   :  { %v427_v20 = vpop.f32.mrf.mxu1 }
 0x1d8   :  { %v428_v21 = vadd.f32 %v427_v20, %v5336_v18  ;;  %v566_v20 = vld [vmem:[%s8412_s2 + $0x260] sm:$0xff] }
 0x1d9   :  { %v429_v22 = vpop.f32.mrf.mxu1 }
 0x1da   :  { %v5342_v23 = vmax.f32 %v428_v21, 0.0  ;;  %v430_v24 = vadd.f32 %v429_v22, %v5339_v19  ;;  %v568_v21 = vld [vmem:[%s8412_s2 + $0x270] sm:$0xff] }
 0x1db   :  { %v433_v25 = vpop.f32.mrf.mxu1 }
 0x1dc   :  { %3803 = vst [vmem:[#allocation6] sm:$0xff] %v5342_v23  ;;  %v5346_v26 = vmax.f32 %v430_v24, 0.0  ;;  %v434_v27 = vadd.f32 %v433_v25, %v5336_v18  ;;  %v559_v24 = vld [vmem:[%s8412_s2 + $0x228] sm:$0xff]  ;;  %v561_v25 = vld [vmem:[%s8412_s2 + $0x238] sm:$0xff] }
 0x1dd   :  { %v435_v28 = vpop.f32.mrf.mxu1 }
 0x1de   :  { %3804 = vst [vmem:[#allocation6 + $0x8] sm:$0xff] %v5346_v26  ;;  %v5356_v30 = vmax.f32 %v434_v27, 0.0  ;;  %v436_v31 = vadd.f32 %v435_v28, %v5339_v19  ;;  %852 = vmatprep.mubr.f32.mxu0 %v5346_v26  ;;  %965 = vmatprep.mubr.f32.mxu1 %v5346_v26 }
 0x1df   :  { %v439_v33 = vpop.f32.mrf.mxu1  ;;  %853 = vmatmul.mubr.f32.vlgmr.msra.gmra.mxu0 %v5342_v23  ;;  %966 = vmatmul.mubr.f32.vlgmr.msra.gmra.mxu1 %v5342_v23 }
 0x1e0   :  { %3805 = vst [vmem:[#allocation6 + $0x10] sm:$0xff] %v5356_v30  ;;  %v5376_v36 = vmax.f32 %v436_v31, 0.0  ;;  %v440_v37 = vadd.f32 %v439_v33, %v5336_v18  ;;  %1015 = vmatpush1.msra.mxu0 %v614_v29  ;;  %1128 = vmatpush1.msra.mxu1 %v616_v15  ;;  %v558_v29 = vld [vmem:[%s8412_s2 + $0x220] sm:$0xff]  ;;  %v560_v15 = vld [vmem:[%s8412_s2 + $0x230] sm:$0xff]  ;;  %v551_v33 = vld [vmem:[%s8412_s2 + $0x1e8] sm:$0xff] }
 0x1e1   :  { %1016 = vmatprep.subr.mxu0 %v607_v32  ;;  %1129 = vmatprep.subr.mxu1 %v609_v16  ;;  %v441_v38 = vpop.f32.mrf.mxu1 }
 0x1e2   :  { %3806 = vst [vmem:[#allocation6 + $0x18] sm:$0xff] %v5376_v36  ;;  %v5386_v41 = vmax.f32 %v440_v37, 0.0  ;;  %v442_v42 = vadd.f32 %v441_v38, %v5339_v19  ;;  %1017 = vmatpush1.msra.mxu0 %v606_v34  ;;  %1130 = vmatpush1.msra.mxu1 %v608_v35  ;;  %v553_v34 = vld [vmem:[%s8412_s2 + $0x1f8] sm:$0xff] }
 0x1e3   :  { %858 = vmatprep.mubr.f32.mxu0 %v5376_v36  ;;  %971 = vmatprep.mubr.f32.mxu1 %v5376_v36  ;;  %v445_v43 = vpop.f32.mrf.mxu1 }
 0x1e4   :  { %3807 = vst [vmem:[#allocation6 + $0x20] sm:$0xff] %v5386_v41  ;;  %v5398_v46 = vmax.f32 %v442_v42, 0.0  ;;  %1018 = vmatprep.subr.mxu0 %v599_v39  ;;  %1131 = vmatprep.subr.mxu1 %v601_v40  ;;  %v446_v47 = vadd.f32 %v445_v43, %v5336_v18  ;;  %v550_v39 = vld [vmem:[%s8412_s2 + $0x1e0] sm:$0xff]  ;;  %v552_v40 = vld [vmem:[%s8412_s2 + $0x1f0] sm:$0xff]  ;;  %v543_v43 = vld [vmem:[%s8412_s2 + $0x1a8] sm:$0xff] }
 0x1e5   :  { %859 = vmatmul.mubr.f32.gmra.mxu0 %v5356_v30  ;;  %972 = vmatmul.mubr.f32.gmra.mxu1 %v5356_v30  ;;  %v447_v50 = vpop.f32.mrf.mxu1 }
 0x1e6   :  { %3808 = vst [vmem:[#allocation6 + $0x28] sm:$0xff] %v5398_v46  ;;  %v5416_v53 = vmax.f32 %v446_v47, 0.0  ;;  %1019 = vmatpush1.msra.mxu0 %v598_v44  ;;  %1132 = vmatpush1.msra.mxu1 %v600_v45  ;;  %v448_v54 = vadd.f32 %v447_v50, %v5339_v19  ;;  %v542_v47 = vld [vmem:[%s8412_s2 + $0x1a0] sm:$0xff]  ;;  %v537_v50 = vld [vmem:[%s8412_s2 + $0x178] sm:$0xff] }
 0x1e7   :  { %1020 = vmatprep.subr.mxu0 %v591_v48  ;;  %1133 = vmatprep.subr.mxu1 %v593_v49  ;;  %v451_v57 = vpop.f32.mrf.mxu1  ;;  %v544_v48 = vld [vmem:[%s8412_s2 + $0x1b0] sm:$0xff] }
 0x1e8   :  { %3809 = vst [vmem:[#allocation6 + $0x30] sm:$0xff] %v5416_v53  ;;  %v5426_v58 = vmax.f32 %v448_v54, 0.0  ;;  %1021 = vmatpush1.msra.mxu0 %v590_v51  ;;  %1134 = vmatpush1.msra.mxu1 %v592_v52  ;;  %v452_v59 = vadd.f32 %v451_v57, %v5336_v18  ;;  %v534_v51 = vld [vmem:[%s8412_s2 + $0x160] sm:$0xff]  ;;  %v536_v52 = vld [vmem:[%s8412_s2 + $0x170] sm:$0xff]  ;;  %v527_v54 = vld [vmem:[%s8412_s2 + $0x128] sm:$0xff] }
 0x1e9   :  { %864 = vmatprep.mubr.f32.mxu0 %v5398_v46  ;;  %977 = vmatprep.mubr.f32.mxu1 %v5398_v46  ;;  %v453_v62 = vpop.f32.mrf.mxu1  ;;  %v528_v57 = vld [vmem:[%s8412_s2 + $0x130] sm:$0xff] }
 0x1ea   :  { %3810 = vst [vmem:[#allocation6 + $0x38] sm:$0xff] %v5426_v58  ;;  %1022 = vmatprep.subr.mxu0 %v583_v55  ;;  %1135 = vmatprep.subr.mxu1 %v585_v56  ;;  %v5438_v63 = vmax.f32 %v452_v59, 0.0  ;;  %v454_v2 = vadd.f32 %v453_v62, %v5339_v19  ;;  %v529_v55 = vld [vmem:[%s8412_s2 + $0x138] sm:$0xff]  ;;  %v526_v56 = vld [vmem:[%s8412_s2 + $0x120] sm:$0xff]  ;;  %v519_v59 = vld [vmem:[%s8412_s2 + $0xe8] sm:$0xff] }
 0x1eb   :  { %865 = vmatmul.mubr.f32.gmra.mxu0 %v5386_v41  ;;  %978 = vmatmul.mubr.f32.gmra.mxu1 %v5386_v41  ;;  %v457_v5 = vpop.f32.mrf.mxu1  ;;  %v520_v62 = vld [vmem:[%s8412_s2 + $0xf0] sm:$0xff] }
 0x1ec   :  { %3811 = vst [vmem:[#allocation6 + $0x40] sm:$0xff] %v5438_v63  ;;  %1023 = vmatpush1.msra.mxu0 %v582_v60  ;;  %1136 = vmatpush1.msra.mxu1 %v584_v61  ;;  %v5456_v6 = vmax.f32 %v454_v2, 0.0  ;;  %v458_v7 = vadd.f32 %v457_v5, %v5336_v18  ;;  %v521_v60 = vld [vmem:[%s8412_s2 + $0xf8] sm:$0xff]  ;;  %v518_v61 = vld [vmem:[%s8412_s2 + $0xe0] sm:$0xff] }
 0x1ed   :  { %1024 = vmatprep.subr.mxu0 %v575_v0  ;;  %1137 = vmatprep.subr.mxu1 %v577_v1  ;;  %v459_v10 = vpop.f32.mrf.mxu1  ;;  %v511_v0 = vld [vmem:[%s8412_s2 + $0xa8] sm:$0xff]  ;;  %v513_v1 = vld [vmem:[%s8412_s2 + $0xb8] sm:$0xff]  ;;  %v510_v2 = vld [vmem:[%s8412_s2 + $0xa0] sm:$0xff] }
 0x1ee   :  { %3812 = vst [vmem:[#allocation6 + $0x48] sm:$0xff] %v5456_v6  ;;  %1025 = vmatpush1.msra.mxu0 %v574_v3  ;;  %1138 = vmatpush1.msra.mxu1 %v576_v4  ;;  %v5466_v13 = vmax.f32 %v458_v7, 0.0  ;;  %v460_v17 = vadd.f32 %v459_v10, %v5339_v19  ;;  %v512_v3 = vld [vmem:[%s8412_s2 + $0xb0] sm:$0xff]  ;;  %v503_v4 = vld [vmem:[%s8412_s2 + $0x68] sm:$0xff]  ;;  %v505_v5 = vld [vmem:[%s8412_s2 + $0x78] sm:$0xff] }
 0x1ef   :  { %870 = vmatprep.mubr.f32.mxu0 %v5426_v58  ;;  %983 = vmatprep.mubr.f32.mxu1 %v5426_v58  ;;  %v463_v22 = vpop.f32.mrf.mxu1  ;;  %v502_v7 = vld [vmem:[%s8412_s2 + $0x60] sm:$0xff]  ;;  %v497_v10 = vld [vmem:[%s8412_s2 + $0x38] sm:$0xff] }
 0x1f0   :  { %1026 = vmatprep.subr.mxu0 %v567_v8  ;;  %1139 = vmatprep.subr.mxu1 %v569_v9  ;;  %3813 = vst [vmem:[#allocation6 + $0x50] sm:$0xff] %v5466_v13  ;;  %v5484_v27 = vmax.f32 %v460_v17, 0.0  ;;  %v464_v28 = vadd.f32 %v463_v22, %v5336_v18  ;;  %v504_v8 = vld [vmem:[%s8412_s2 + $0x70] sm:$0xff]  ;;  %v495_v9 = vld [vmem:[%s8412_s2 + $0x28] sm:$0xff]  ;;  %v494_v17 = vld [vmem:[%s8412_s2 + $0x20] sm:$0xff] }
 0x1f1   :  { %871 = vmatmul.mubr.f32.gmra.mxu0 %v5416_v53  ;;  %984 = vmatmul.mubr.f32.gmra.mxu1 %v5416_v53  ;;  %v465_v31 = vpop.f32.mrf.mxu1  ;;  %v745_v22 = vld [vmem:[%s8412_s2 + $0x7f8] sm:$0xff] }
 0x1f2   :  { %1027 = vmatpush1.msra.mxu0 %v566_v20  ;;  %1140 = vmatpush1.msra.mxu1 %v568_v21  ;;  %3814 = vst [vmem:[#allocation6 + $0x58] sm:$0xff] %v5484_v27  ;;  %v5496_v32 = vmax.f32 %v464_v28, 0.0  ;;  %v466_v16 = vadd.f32 %v465_v31, %v5339_v19  ;;  %v496_v20 = vld [vmem:[%s8412_s2 + $0x30] sm:$0xff]  ;;  %v743_v21 = vld [vmem:[%s8412_s2 + $0x7e8] sm:$0xff] }
 0x1f3   :  { %1028 = vmatprep.subr.mxu0 %v559_v24  ;;  %1141 = vmatprep.subr.mxu1 %v561_v25  ;;  %v469_v35 = vpop.f32.mrf.mxu1  ;;  %v742_v24 = vld [vmem:[%s8412_s2 + $0x7e0] sm:$0xff]  ;;  %v744_v25 = vld [vmem:[%s8412_s2 + $0x7f0] sm:$0xff]  ;;  %v735_v28 = vld [vmem:[%s8412_s2 + $0x7a8] sm:$0xff] }
 0x1f4   :  { %1029 = vmatpush1.msra.mxu0 %v558_v29  ;;  %1142 = vmatpush1.msra.mxu1 %v560_v15  ;;  %3815 = vst [vmem:[#allocation6 + $0x60] sm:$0xff] %v5496_v32  ;;  %v5506_v37 = vmax.f32 %v466_v16, 0.0  ;;  %v470_v38 = vadd.f32 %v469_v35, %v5336_v18  ;;  %v545_v18 = vld [vmem:[%s8412_s2 + $0x1b8] sm:$0xff]  ;;  %v736_v15 = vld [vmem:[%s8412_s2 + $0x7b0] sm:$0xff]  ;;  %v727_v31 = vld [vmem:[%s8412_s2 + $0x768] sm:$0xff] }
 0x1f5   :  { %876 = vmatprep.mubr.f32.mxu0 %v5456_v6  ;;  %989 = vmatprep.mubr.f32.mxu1 %v5456_v6  ;;  %v471_v42 = vpop.f32.mrf.mxu1  ;;  %v737_v29 = vld [vmem:[%s8412_s2 + $0x7b8] sm:$0xff]  ;;  %v719_v35 = vld [vmem:[%s8412_s2 + $0x728] sm:$0xff] }
 0x1f6   :  { %1030 = vmatprep.subr.mxu0 %v551_v33  ;;  %1143 = vmatprep.subr.mxu1 %v553_v34  ;;  %3816 = vst [vmem:[#allocation6 + $0x68] sm:$0xff] %v5506_v37  ;;  %v5524_v44 = vmax.f32 %v470_v38, 0.0  ;;  %v472_v45 = vadd.f32 %v471_v42, %v5339_v19  ;;  %v535_v19 = vld [vmem:[%s8412_s2 + $0x168] sm:$0xff]  ;;  %v729_v16 = vld [vmem:[%s8412_s2 + $0x778] sm:$0xff]  ;;  %v726_v33 = vld [vmem:[%s8412_s2 + $0x760] sm:$0xff] }
 0x1f7   :  { %877 = vmatmul.mubr.f32.gmra.mxu0 %v5438_v63  ;;  %990 = vmatmul.mubr.f32.gmra.mxu1 %v5438_v63  ;;  %v728_v34 = vld [vmem:[%s8412_s2 + $0x770] sm:$0xff]  ;;  %v721_v38 = vld [vmem:[%s8412_s2 + $0x738] sm:$0xff]  ;;  %v711_v42 = vld [vmem:[%s8412_s2 + $0x6e8] sm:$0xff] }
 0x1f8   :  { %1031 = vmatpush1.msra.mxu0 %v550_v39  ;;  %1144 = vmatpush1.msra.mxu1 %v552_v40  ;;  %3817 = vst [vmem:[#allocation6 + $0x70] sm:$0xff] %v5524_v44  ;;  %v5536_v49 = vmax.f32 %v472_v45, 0.0  ;;  %v718_v39 = vld [vmem:[%s8412_s2 + $0x720] sm:$0xff]  ;;  %v720_v40 = vld [vmem:[%s8412_s2 + $0x730] sm:$0xff] }
 0x1f9   :  { %1032 = vmatprep.subr.mxu0 %v543_v43  ;;  %1145 = vmatprep.subr.mxu1 %v545_v18  ;;  %v713_v43 = vld [vmem:[%s8412_s2 + $0x6f8] sm:$0xff]  ;;  %v710_v18 = vld [vmem:[%s8412_s2 + $0x6e0] sm:$0xff]  ;;  %v712_v45 = vld [vmem:[%s8412_s2 + $0x6f0] sm:$0xff] }
 0x1fa   :  { %1033 = vmatpush1.msra.mxu0 %v542_v47  ;;  %1146 = vmatpush1.msra.mxu1 %v544_v48  ;;  %3818 = vst [vmem:[#allocation6 + $0x78] sm:$0xff] %v5536_v49  ;;  %v703_v47 = vld [vmem:[%s8412_s2 + $0x6a8] sm:$0xff]  ;;  %v705_v48 = vld [vmem:[%s8412_s2 + $0x6b8] sm:$0xff] }
 0x1fb   :  { %882 = vmatprep.mubr.f32.mxu0 %v5484_v27  ;;  %995 = vmatprep.mubr.f32.mxu1 %v5484_v27 }
 0x1fc   :  { %1034 = vmatprep.subr.mxu0 %v535_v19  ;;  %1147 = vmatprep.subr.mxu1 %v537_v50  ;;  %v702_v19 = vld [vmem:[%s8412_s2 + $0x6a0] sm:$0xff]  ;;  %v704_v50 = vld [vmem:[%s8412_s2 + $0x6b0] sm:$0xff] }
 0x1fd   :  { %883 = vmatmul.mubr.f32.gmra.mxu0 %v5466_v13  ;;  %996 = vmatmul.mubr.f32.gmra.mxu1 %v5466_v13 }
 0x1fe   :  { %1035 = vmatpush1.msra.mxu0 %v534_v51  ;;  %1148 = vmatpush1.msra.mxu1 %v536_v52  ;;  %v695_v51 = vld [vmem:[%s8412_s2 + $0x668] sm:$0xff]  ;;  %v697_v52 = vld [vmem:[%s8412_s2 + $0x678] sm:$0xff] }
 0x1ff   :  { %1036 = vmatprep.subr.mxu0 %v527_v54  ;;  %1149 = vmatprep.subr.mxu1 %v529_v55  ;;  %v694_v54 = vld [vmem:[%s8412_s2 + $0x660] sm:$0xff]  ;;  %v696_v55 = vld [vmem:[%s8412_s2 + $0x670] sm:$0xff] }
 0x200   :  { %1037 = vmatpush1.msra.mxu0 %v526_v56  ;;  %1150 = vmatpush1.msra.mxu1 %v528_v57  ;;  %v687_v56 = vld [vmem:[%s8412_s2 + $0x628] sm:$0xff]  ;;  %v689_v57 = vld [vmem:[%s8412_s2 + $0x638] sm:$0xff] }
 0x201   :  { %888 = vmatprep.mubr.f32.mxu0 %v5506_v37  ;;  %1001 = vmatprep.mubr.f32.mxu1 %v5506_v37 }
 0x202   :  { %1038 = vmatprep.subr.mxu0 %v519_v59  ;;  %1151 = vmatprep.subr.mxu1 %v521_v60  ;;  %v686_v59 = vld [vmem:[%s8412_s2 + $0x620] sm:$0xff]  ;;  %v688_v60 = vld [vmem:[%s8412_s2 + $0x630] sm:$0xff] }
 0x203   :  { %889 = vmatmul.mubr.f32.gmra.mxu0 %v5496_v32  ;;  %1002 = vmatmul.mubr.f32.gmra.mxu1 %v5496_v32 }
 0x204   :  { %1039 = vmatpush1.msra.mxu0 %v518_v61  ;;  %1152 = vmatpush1.msra.mxu1 %v520_v62  ;;  %v679_v61 = vld [vmem:[%s8412_s2 + $0x5e8] sm:$0xff]  ;;  %v681_v62 = vld [vmem:[%s8412_s2 + $0x5f8] sm:$0xff] }
 0x205   :  { %1040 = vmatprep.subr.mxu0 %v511_v0  ;;  %1153 = vmatprep.subr.mxu1 %v513_v1  ;;  %v678_v0 = vld [vmem:[%s8412_s2 + $0x5e0] sm:$0xff]  ;;  %v680_v1 = vld [vmem:[%s8412_s2 + $0x5f0] sm:$0xff] }
 0x206   :  { %1041 = vmatpush1.msra.mxu0 %v510_v2  ;;  %1154 = vmatpush1.msra.mxu1 %v512_v3  ;;  %v671_v2 = vld [vmem:[%s8412_s2 + $0x5a8] sm:$0xff]  ;;  %v673_v3 = vld [vmem:[%s8412_s2 + $0x5b8] sm:$0xff] }
 0x207   :  { %894 = vmatprep.mubr.f32.mxu0 %v5536_v49  ;;  %1007 = vmatprep.mubr.f32.mxu1 %v5536_v49 }
 0x208   :  { %1042 = vmatprep.subr.mxu0 %v503_v4  ;;  %1155 = vmatprep.subr.mxu1 %v505_v5  ;;  %v670_v4 = vld [vmem:[%s8412_s2 + $0x5a0] sm:$0xff]  ;;  %v672_v5 = vld [vmem:[%s8412_s2 + $0x5b0] sm:$0xff] }
 0x209   :  { %895 = vmatmul.mubr.f32.gmra.mxu0 %v5524_v44  ;;  %1008 = vmatmul.mubr.f32.gmra.mxu1 %v5524_v44 }
 0x20a   :  { %1043 = vmatpush1.msra.mxu0 %v502_v7  ;;  %1156 = vmatpush1.msra.mxu1 %v504_v8  ;;  %v663_v7 = vld [vmem:[%s8412_s2 + $0x568] sm:$0xff]  ;;  %v665_v8 = vld [vmem:[%s8412_s2 + $0x578] sm:$0xff] }
 0x20b   :  { %1044 = vmatprep.subr.mxu0 %v495_v9  ;;  %1078 = vmatprep.mubr.f32.mxu0 %v5346_v26  ;;  %v662_v9 = vld [vmem:[%s8412_s2 + $0x560] sm:$0xff] }
 0x20c   :  { %1157 = vmatprep.subr.mxu1 %v497_v10  ;;  %1191 = vmatprep.mubr.f32.mxu1 %v5346_v26  ;;  %v734_v26 = vld [vmem:[%s8412_s2 + $0x7a0] sm:$0xff]  ;;  %v664_v10 = vld [vmem:[%s8412_s2 + $0x570] sm:$0xff] }
 0x20d   :  { %1045 = vmatpush1.msra.mxu0 %v494_v17  ;;  %1158 = vmatpush1.msra.mxu1 %v496_v20  ;;  %v655_v17 = vld [vmem:[%s8412_s2 + $0x528] sm:$0xff]  ;;  %v657_v20 = vld [vmem:[%s8412_s2 + $0x538] sm:$0xff] }
 0x20e   :  { %1046 = vmatprep.subr.mxu0 %v743_v21  ;;  %1159 = vmatprep.subr.mxu1 %v745_v22  ;;  %v654_v21 = vld [vmem:[%s8412_s2 + $0x520] sm:$0xff]  ;;  %v656_v22 = vld [vmem:[%s8412_s2 + $0x530] sm:$0xff] }
 0x20f   :  { %1047 = vmatpush2.msra.mxu0 %v742_v24  ;;  %1160 = vmatpush2.msra.mxu1 %v744_v25  ;;  %v647_v24 = vld [vmem:[%s8412_s2 + $0x4e8] sm:$0xff]  ;;  %v649_v25 = vld [vmem:[%s8412_s2 + $0x4f8] sm:$0xff] }
 0x210   :  { %1048 = vmatprep.subr.mxu0 %v735_v28  ;;  %1161 = vmatprep.subr.mxu1 %v737_v29  ;;  %v646_v28 = vld [vmem:[%s8412_s2 + $0x4e0] sm:$0xff]  ;;  %v648_v29 = vld [vmem:[%s8412_s2 + $0x4f0] sm:$0xff] }
 0x211   :  { %1049 = vmatpush2.msra.mxu0 %v734_v26  ;;  %1162 = vmatpush2.msra.mxu1 %v736_v15  ;;  %v639_v26 = vld [vmem:[%s8412_s2 + $0x4a8] sm:$0xff]  ;;  %v641_v15 = vld [vmem:[%s8412_s2 + $0x4b8] sm:$0xff] }
 0x212   :  { %1050 = vmatprep.subr.mxu0 %v727_v31  ;;  %1163 = vmatprep.subr.mxu1 %v729_v16  ;;  %v638_v31 = vld [vmem:[%s8412_s2 + $0x4a0] sm:$0xff]  ;;  %v640_v16 = vld [vmem:[%s8412_s2 + $0x4b0] sm:$0xff] }
 0x213   :  { %1051 = vmatpush2.msra.mxu0 %v726_v33  ;;  %1164 = vmatpush2.msra.mxu1 %v728_v34  ;;  %v631_v33 = vld [vmem:[%s8412_s2 + $0x468] sm:$0xff]  ;;  %v633_v34 = vld [vmem:[%s8412_s2 + $0x478] sm:$0xff] }
 0x214   :  { %1052 = vmatprep.subr.mxu0 %v719_v35  ;;  %1165 = vmatprep.subr.mxu1 %v721_v38  ;;  %v630_v35 = vld [vmem:[%s8412_s2 + $0x460] sm:$0xff]  ;;  %v632_v38 = vld [vmem:[%s8412_s2 + $0x470] sm:$0xff] }
 0x215   :  { %1053 = vmatpush2.msra.mxu0 %v718_v39  ;;  %1166 = vmatpush2.msra.mxu1 %v720_v40  ;;  %v623_v39 = vld [vmem:[%s8412_s2 + $0x428] sm:$0xff]  ;;  %v625_v40 = vld [vmem:[%s8412_s2 + $0x438] sm:$0xff] }
 0x216   :  { %1054 = vmatprep.subr.mxu0 %v711_v42  ;;  %1167 = vmatprep.subr.mxu1 %v713_v43  ;;  %v622_v42 = vld [vmem:[%s8412_s2 + $0x420] sm:$0xff]  ;;  %v624_v43 = vld [vmem:[%s8412_s2 + $0x430] sm:$0xff] }
 0x217   :  { %1055 = vmatpush2.msra.mxu0 %v710_v18  ;;  %1168 = vmatpush2.msra.mxu1 %v712_v45  ;;  %v1335_v18 = vld [vmem:[%s8384_s7 + $0xf8] sm:$0xff] }
 0x218   :  { %1056 = vmatprep.subr.mxu0 %v703_v47  ;;  %1169 = vmatprep.subr.mxu1 %v705_v48  ;;  %v1367_v45 = vld [vmem:[%s8384_s7 + $0x1f8] sm:$0xff] }
 0x219   :  { %1057 = vmatpush2.msra.mxu0 %v702_v19  ;;  %1170 = vmatpush2.msra.mxu1 %v704_v50  ;;  %v1319_v47 = vld [vmem:[%s8384_s7 + $0x78] sm:$0xff]  ;;  %v1366_v19 = vld [vmem:[%s8384_s7 + $0x1f0] sm:$0xff] }
 0x21a   :  { %1058 = vmatprep.subr.mxu0 %v695_v51  ;;  %1171 = vmatprep.subr.mxu1 %v697_v52  ;;  %v1351_v48 = vld [vmem:[%s8384_s7 + $0x178] sm:$0xff]  ;;  %v1350_v50 = vld [vmem:[%s8384_s7 + $0x170] sm:$0xff]  ;;  %v1365_v51 = vld [vmem:[%s8384_s7 + $0x1e8] sm:$0xff] }
 0x21b   :  { %1059 = vmatpush2.msra.mxu0 %v694_v54  ;;  %1172 = vmatpush2.msra.mxu1 %v696_v55  ;;  %v1349_v52 = vld [vmem:[%s8384_s7 + $0x168] sm:$0xff]  ;;  %v1364_v54 = vld [vmem:[%s8384_s7 + $0x1e0] sm:$0xff] }
 0x21c   :  { %1060 = vmatprep.subr.mxu0 %v687_v56  ;;  %1173 = vmatprep.subr.mxu1 %v689_v57  ;;  %v1348_v55 = vld [vmem:[%s8384_s7 + $0x160] sm:$0xff]  ;;  %v1363_v56 = vld [vmem:[%s8384_s7 + $0x1d8] sm:$0xff] }
 0x21d   :  { %1061 = vmatpush2.msra.mxu0 %v686_v59  ;;  %1174 = vmatpush2.msra.mxu1 %v688_v60  ;;  %v1347_v57 = vld [vmem:[%s8384_s7 + $0x158] sm:$0xff]  ;;  %v1362_v59 = vld [vmem:[%s8384_s7 + $0x1d0] sm:$0xff] }
 0x21e   :  { %1062 = vmatprep.subr.mxu0 %v679_v61  ;;  %1175 = vmatprep.subr.mxu1 %v681_v62  ;;  %v1346_v60 = vld [vmem:[%s8384_s7 + $0x150] sm:$0xff]  ;;  %v1361_v61 = vld [vmem:[%s8384_s7 + $0x1c8] sm:$0xff] }
 0x21f   :  { %1063 = vmatpush2.msra.mxu0 %v678_v0  ;;  %1176 = vmatpush2.msra.mxu1 %v680_v1  ;;  %v1345_v62 = vld [vmem:[%s8384_s7 + $0x148] sm:$0xff]  ;;  %v1328_v0 = vld [vmem:[%s8384_s7 + $0xc0] sm:$0xff] }
 0x220   :  { %1064 = vmatprep.subr.mxu0 %v671_v2  ;;  %1177 = vmatprep.subr.mxu1 %v673_v3  ;;  %v1312_v1 = vld [vmem:[%s8384_s7 + $0x40] sm:$0xff]  ;;  %v1327_v2 = vld [vmem:[%s8384_s7 + $0xb8] sm:$0xff] }
 0x221   :  { %1065 = vmatpush2.msra.mxu0 %v670_v4  ;;  %1178 = vmatpush2.msra.mxu1 %v672_v5  ;;  %v1359_v3 = vld [vmem:[%s8384_s7 + $0x1b8] sm:$0xff] }
 0x222   :  { %1066 = vmatprep.subr.mxu0 %v663_v7  ;;  %1179 = vmatprep.subr.mxu1 %v665_v8  ;;  %v1311_v4 = vld [vmem:[%s8384_s7 + $0x38] sm:$0xff]  ;;  %v1358_v7 = vld [vmem:[%s8384_s7 + $0x1b0] sm:$0xff] }
 0x223   :  { %1067 = vmatpush2.msra.mxu0 %v662_v9  ;;  %1180 = vmatpush2.msra.mxu1 %v664_v10  ;;  %v1343_v5 = vld [vmem:[%s8384_s7 + $0x138] sm:$0xff]  ;;  %v1310_v8 = vld [vmem:[%s8384_s7 + $0x30] sm:$0xff]  ;;  %v1325_v10 = vld [vmem:[%s8384_s7 + $0xa8] sm:$0xff] }
 0x224   :  { %1068 = vmatprep.subr.mxu0 %v655_v17  ;;  %1181 = vmatprep.subr.mxu1 %v657_v20  ;;  %v1342_v9 = vld [vmem:[%s8384_s7 + $0x130] sm:$0xff]  ;;  %v1357_v17 = vld [vmem:[%s8384_s7 + $0x1a8] sm:$0xff] }
 0x225   :  { %1069 = vmatpush2.msra.mxu0 %v654_v21  ;;  %1182 = vmatpush2.msra.mxu1 %v656_v22  ;;  %v1309_v20 = vld [vmem:[%s8384_s7 + $0x28] sm:$0xff]  ;;  %v1324_v22 = vld [vmem:[%s8384_s7 + $0xa0] sm:$0xff] }
 0x226   :  { %1070 = vmatprep.subr.mxu0 %v647_v24  ;;  %1183 = vmatprep.subr.mxu1 %v649_v25  ;;  %v1341_v21 = vld [vmem:[%s8384_s7 + $0x128] sm:$0xff]  ;;  %v1356_v24 = vld [vmem:[%s8384_s7 + $0x1a0] sm:$0xff] }
 0x227   :  { %1071 = vmatpush2.msra.mxu0 %v646_v28  ;;  %1184 = vmatpush2.msra.mxu1 %v648_v29  ;;  %v1308_v25 = vld [vmem:[%s8384_s7 + $0x20] sm:$0xff]  ;;  %v1323_v29 = vld [vmem:[%s8384_s7 + $0x98] sm:$0xff] }
 0x228   :  { %1072 = vmatprep.subr.mxu0 %v639_v26  ;;  %1185 = vmatprep.subr.mxu1 %v641_v15  ;;  %v1340_v28 = vld [vmem:[%s8384_s7 + $0x120] sm:$0xff]  ;;  %v1355_v26 = vld [vmem:[%s8384_s7 + $0x198] sm:$0xff] }
 0x229   :  { %1073 = vmatpush2.msra.mxu0 %v638_v31  ;;  %1186 = vmatpush2.msra.mxu1 %v640_v16  ;;  %v1307_v15 = vld [vmem:[%s8384_s7 + $0x18] sm:$0xff]  ;;  %v1322_v16 = vld [vmem:[%s8384_s7 + $0x90] sm:$0xff] }
 0x22a   :  { %1074 = vmatprep.subr.mxu0 %v631_v33  ;;  %1187 = vmatprep.subr.mxu1 %v633_v34  ;;  %v1339_v31 = vld [vmem:[%s8384_s7 + $0x118] sm:$0xff]  ;;  %v1354_v33 = vld [vmem:[%s8384_s7 + $0x190] sm:$0xff] }
 0x22b   :  { %1075 = vmatpush2.msra.mxu0 %v630_v35  ;;  %1188 = vmatpush2.msra.mxu1 %v632_v38  ;;  %v1306_v34 = vld [vmem:[%s8384_s7 + $0x10] sm:$0xff]  ;;  %v1321_v38 = vld [vmem:[%s8384_s7 + $0x88] sm:$0xff] }
 0x22c   :  { %1076 = vmatprep.subr.mxu0 %v623_v39  ;;  %1189 = vmatprep.subr.mxu1 %v625_v40  ;;  %v1338_v35 = vld [vmem:[%s8384_s7 + $0x110] sm:$0xff]  ;;  %v1353_v39 = vld [vmem:[%s8384_s7 + $0x188] sm:$0xff] }
 0x22d   :  { %1077 = vmatpush2.msra.mxu0 %v622_v42  ;;  %1190 = vmatpush2.msra.mxu1 %v624_v43  ;;  %v1305_v40 = vld [vmem:[%s8384_s7 + $0x8] sm:$0xff]  ;;  %v1320_v43 = vld [vmem:[%s8384_s7 + $0x80] sm:$0xff] }
 0x22e   :  { %1079 = vmatmul.mubr.f32.vlgmr.msra.gmra.mxu0 %v5342_v23  ;;  %1192 = vmatmul.mubr.f32.vlgmr.msra.gmra.mxu1 %v5342_v23  ;;  %v1334_v23 = vld [vmem:[%s8384_s7 + $0xf0] sm:$0xff]  ;;  %v1337_v42 = vld [vmem:[%s8384_s7 + $0x108] sm:$0xff] }
 0x22f   :  { %1084 = vmatprep.mubr.f32.mxu0 %v5376_v36  ;;  %1197 = vmatprep.mubr.f32.mxu1 %v5376_v36  ;;  %v1318_v36 = vld [vmem:[%s8384_s7 + $0x70] sm:$0xff] }
 0x230   :  { %3975 = vmatprep.subr.mxu0 %v1335_v18  ;;  %4031 = vmatprep.subr.mxu1 %v1367_v45  ;;  %v1352_v18 = vld [vmem:[%s8384_s7 + $0x180] sm:$0xff] }
 0x231   :  { %3976 = vmatpush3.msra.mxu0 %v1319_v47  ;;  %4032 = vmatpush3.msra.mxu1 %v1351_v48  ;;  %v1304_v45 = vld [vmem:[%s8384_s7] sm:$0xff]  ;;  %v1399_v48 = vld [vmem:[%s8384_s7 + $0x2f8] sm:$0xff] }
 0x232   :  { %1085 = vmatmul.mubr.f32.gmra.mxu0 %v5356_v30  ;;  %1198 = vmatmul.mubr.f32.gmra.mxu1 %v5356_v30  ;;  %v1333_v30 = vld [vmem:[%s8384_s7 + $0xe8] sm:$0xff]  ;;  %v1336_v47 = vld [vmem:[%s8384_s7 + $0x100] sm:$0xff] }
 0x233   :  { %1090 = vmatprep.mubr.f32.mxu0 %v5398_v46  ;;  %1203 = vmatprep.mubr.f32.mxu1 %v5398_v46  ;;  %v1317_v46 = vld [vmem:[%s8384_s7 + $0x68] sm:$0xff] }
 0x234   :  { %3977 = vmatprep.subr.mxu0 %v1334_v23  ;;  %4033 = vmatprep.subr.mxu1 %v1366_v19  ;;  %v1431_v23 = vld [vmem:[%s8384_s7 + $0x3f8] sm:$0xff]  ;;  %v758_v19 = vsub.s32 2, %v5083_v11 }
 0x235   :  { %3978 = vmatpush3.msra.mxu0 %v1318_v36  ;;  %4034 = vmatpush3.msra.mxu1 %v1350_v50  ;;  %v6049_v36 = vld [vmem:[%s8383_s6] sm:$0xff]  ;;  %v762_v50 = vsub.s32 3, %v5083_v11 }
 0x236   :  { %1091 = vmatmul.mubr.f32.gmra.mxu0 %v5386_v41  ;;  %1204 = vmatmul.mubr.f32.gmra.mxu1 %v5386_v41  ;;  %v1332_v41 = vld [vmem:[%s8384_s7 + $0xe0] sm:$0xff] }
 0x237   :  { %1096 = vmatprep.mubr.f32.mxu0 %v5426_v58  ;;  %1209 = vmatprep.mubr.f32.mxu1 %v5426_v58  ;;  %v1316_v58 = vld [vmem:[%s8384_s7 + $0x60] sm:$0xff] }
 0x238   :  { %3979 = vmatprep.subr.mxu0 %v1333_v30  ;;  %4035 = vmatprep.subr.mxu1 %v1365_v51  ;;  %v6054_v30 = vrot.slane %v6049_v36, %v5086_v12  ;;  %v6059_v51 = vrot.slane %v6049_v36, %v758_v19 }
 0x239   :  { %3980 = vmatpush3.msra.mxu0 %v1317_v46  ;;  %4036 = vmatpush3.msra.mxu1 %v1349_v52  ;;  %v6063_v46 = vrot.slane %v6049_v36, %v5092_v14  ;;  %v6068_v52 = vrot.slane %v6049_v36, %v762_v50 }
 0x23a   :  { %1097 = vmatmul.mubr.f32.gmra.mxu0 %v5416_v53  ;;  %1210 = vmatmul.mubr.f32.gmra.mxu1 %v5416_v53  ;;  %v1331_v53 = vld [vmem:[%s8384_s7 + $0xd8] sm:$0xff] }
 0x23b   :  { %1102 = vmatprep.mubr.f32.mxu0 %v5456_v6  ;;  %1215 = vmatprep.mubr.f32.mxu1 %v5456_v6  ;;  %v1315_v6 = vld [vmem:[%s8384_s7 + $0x58] sm:$0xff] }
 0x23c   :  { %3981 = vmatprep.subr.mxu0 %v1332_v41  ;;  %4037 = vmatprep.subr.mxu1 %v1364_v54 }
 0x23d   :  { %3982 = vmatpush3.msra.mxu0 %v1316_v58  ;;  %4038 = vmatpush3.msra.mxu1 %v1348_v55 }
 0x23e   :  { %1103 = vmatmul.mubr.f32.gmra.mxu0 %v5438_v63  ;;  %1216 = vmatmul.mubr.f32.gmra.mxu1 %v5438_v63  ;;  %v1330_v63 = vld [vmem:[%s8384_s7 + $0xd0] sm:$0xff] }
 0x23f   :  { %1108 = vmatprep.mubr.f32.mxu0 %v5484_v27  ;;  %1221 = vmatprep.mubr.f32.mxu1 %v5484_v27  ;;  %v1314_v27 = vld [vmem:[%s8384_s7 + $0x50] sm:$0xff] }
 0x240   :  { %3983 = vmatprep.subr.mxu0 %v1331_v53  ;;  %4039 = vmatprep.subr.mxu1 %v1363_v56 }
 0x241   :  { %3984 = vmatpush3.msra.mxu0 %v1315_v6  ;;  %4040 = vmatpush3.msra.mxu1 %v1347_v57 }
 0x242   :  { %1109 = vmatmul.mubr.f32.gmra.mxu0 %v5466_v13  ;;  %1222 = vmatmul.mubr.f32.gmra.mxu1 %v5466_v13  ;;  %v1329_v13 = vld [vmem:[%s8384_s7 + $0xc8] sm:$0xff] }
 0x243   :  { %1114 = vmatprep.mubr.f32.mxu0 %v5506_v37  ;;  %1227 = vmatprep.mubr.f32.mxu1 %v5506_v37  ;;  %v1313_v37 = vld [vmem:[%s8384_s7 + $0x48] sm:$0xff] }
 0x244   :  { %3985 = vmatprep.subr.mxu0 %v1330_v63  ;;  %4041 = vmatprep.subr.mxu1 %v1362_v59 }
 0x245   :  { %3986 = vmatpush3.msra.mxu0 %v1314_v27  ;;  %4042 = vmatpush3.msra.mxu1 %v1346_v60 }
 0x246   :  { %1115 = vmatmul.mubr.f32.gmra.mxu0 %v5496_v32  ;;  %1228 = vmatmul.mubr.f32.gmra.mxu1 %v5496_v32  ;;  %v1360_v32 = vld [vmem:[%s8384_s7 + $0x1c0] sm:$0xff] }
 0x247   :  { %1120 = vmatprep.mubr.f32.mxu0 %v5536_v49  ;;  %1233 = vmatprep.mubr.f32.mxu1 %v5536_v49  ;;  %v1344_v49 = vld [vmem:[%s8384_s7 + $0x140] sm:$0xff] }
 0x248   :  { %3987 = vmatprep.subr.mxu0 %v1329_v13  ;;  %4043 = vmatprep.subr.mxu1 %v1361_v61 }
 0x249   :  { %3988 = vmatpush3.msra.mxu0 %v1313_v37  ;;  %4044 = vmatpush3.msra.mxu1 %v1345_v62  ;;  %v1383_v37 = vld [vmem:[%s8384_s7 + $0x278] sm:$0xff] }
 0x24a   :  { %1121 = vmatmul.mubr.f32.gmra.mxu0 %v5524_v44  ;;  %1234 = vmatmul.mubr.f32.gmra.mxu1 %v5524_v44  ;;  %v1326_v44 = vld [vmem:[%s8384_s7 + $0xb0] sm:$0xff]  ;;  %v1415_v62 = vld [vmem:[%s8384_s7 + $0x378] sm:$0xff] }
 0x24b   :  { %3989 = vmatprep.subr.mxu0 %v1328_v0  ;;  %4045 = vmatprep.subr.mxu1 %v1360_v32 }
 0x24c   :  { %3990 = vmatpush3.msra.mxu0 %v1312_v1  ;;  %4046 = vmatpush3.msra.mxu1 %v1344_v49  ;;  %v1398_v1 = vld [vmem:[%s8384_s7 + $0x2f0] sm:$0xff] }
 0x24d   :  { %3991 = vmatprep.subr.mxu0 %v1327_v2  ;;  %4047 = vmatprep.subr.mxu1 %v1359_v3  ;;  %v1430_v49 = vld [vmem:[%s8384_s7 + $0x3f0] sm:$0xff] }
 0x24e   :  { %3992 = vmatpush3.msra.mxu0 %v1311_v4  ;;  %4048 = vmatpush3.msra.mxu1 %v1343_v5  ;;  %v1382_v4 = vld [vmem:[%s8384_s7 + $0x270] sm:$0xff] }
 0x24f   :  { %3993 = vmatprep.subr.mxu0 %v1326_v44  ;;  %4049 = vmatprep.subr.mxu1 %v1358_v7  ;;  %v1414_v5 = vld [vmem:[%s8384_s7 + $0x370] sm:$0xff] }
 0x250   :  { %3994 = vmatpush3.msra.mxu0 %v1310_v8  ;;  %4050 = vmatpush3.msra.mxu1 %v1342_v9 }
 0x251   :  { %3995 = vmatprep.subr.mxu0 %v1325_v10  ;;  %4051 = vmatprep.subr.mxu1 %v1357_v17  ;;  %v1397_v10 = vld [vmem:[%s8384_s7 + $0x2e8] sm:$0xff] }
 0x252   :  { %3996 = vmatpush3.msra.mxu0 %v1309_v20  ;;  %4052 = vmatpush3.msra.mxu1 %v1341_v21  ;;  %v1429_v17 = vld [vmem:[%s8384_s7 + $0x3e8] sm:$0xff] }
 0x253   :  { %3997 = vmatprep.subr.mxu0 %v1324_v22  ;;  %4053 = vmatprep.subr.mxu1 %v1356_v24 }
 0x254   :  { %3998 = vmatpush3.msra.mxu0 %v1308_v25  ;;  %4054 = vmatpush3.msra.mxu1 %v1340_v28  ;;  %v1381_v25 = vld [vmem:[%s8384_s7 + $0x268] sm:$0xff] }
 0x255   :  { %3999 = vmatprep.subr.mxu0 %v1323_v29  ;;  %4055 = vmatprep.subr.mxu1 %v1355_v26  ;;  %v1413_v28 = vld [vmem:[%s8384_s7 + $0x368] sm:$0xff] }
 0x256   :  { %4000 = vmatpush3.msra.mxu0 %v1307_v15  ;;  %4056 = vmatpush3.msra.mxu1 %v1339_v31  ;;  %v1396_v15 = vld [vmem:[%s8384_s7 + $0x2e0] sm:$0xff] }
 0x257   :  { %4001 = vmatprep.subr.mxu0 %v1322_v16  ;;  %4057 = vmatprep.subr.mxu1 %v1354_v33  ;;  %v1428_v31 = vld [vmem:[%s8384_s7 + $0x3e0] sm:$0xff] }
 0x258   :  { %4002 = vmatpush3.msra.mxu0 %v1306_v34  ;;  %4058 = vmatpush3.msra.mxu1 %v1338_v35  ;;  %v1380_v34 = vld [vmem:[%s8384_s7 + $0x260] sm:$0xff] }
 0x259   :  { %4003 = vmatprep.subr.mxu0 %v1321_v38  ;;  %4059 = vmatprep.subr.mxu1 %v1353_v39  ;;  %v1412_v35 = vld [vmem:[%s8384_s7 + $0x360] sm:$0xff] }
 0x25a   :  { %4004 = vmatpush3.msra.mxu0 %v1305_v40  ;;  %4060 = vmatpush3.msra.mxu1 %v1337_v42 }
 0x25b   :  { %4005 = vmatprep.subr.mxu0 %v1320_v43  ;;  %4061 = vmatprep.subr.mxu1 %v1352_v18  ;;  %v1395_v43 = vld [vmem:[%s8384_s7 + $0x2d8] sm:$0xff] }
 0x25c   :  { %4006 = vmatpush3.msra.mxu0 %v1304_v45  ;;  %4062 = vmatpush3.msra.mxu1 %v1336_v47  ;;  %v1427_v18 = vld [vmem:[%s8384_s7 + $0x3d8] sm:$0xff] }
 0x25d   :  { %4087 = vmatprep.subr.mxu0 %v1399_v48  ;;  %4143 = vmatprep.subr.mxu1 %v1431_v23 }
 0x29f   :  { %v854_v41 = vpop.f32.mrf.mxu0  ;;  %v967_v54 = vpop.f32.mrf.mxu1 }
 0x2a0   :  { %v855_v58 = vadd.f32 %v854_v41, %v6054_v30  ;;  %v968_v55 = vadd.f32 %v967_v54, %v6059_v51  ;;  %v1379_v41 = vld [vmem:[%s8384_s7 + $0x258] sm:$0xff] }
 0x2a1   :  { %v856_v53 = vpop.f32.mrf.mxu0  ;;  %v969_v56 = vpop.f32.mrf.mxu1  ;;  %v1411_v54 = vld [vmem:[%s8384_s7 + $0x358] sm:$0xff] }
 0x2a2   :  { %v1240_v6 = vmax.f32 %v855_v58, 0.0  ;;  %v1242_v57 = vmax.f32 %v968_v55, 0.0  ;;  %v857_v63 = vadd.f32 %v856_v53, %v6063_v46  ;;  %v970_v59 = vadd.f32 %v969_v56, %v6068_v52  ;;  %v1394_v53 = vld [vmem:[%s8384_s7 + $0x2d0] sm:$0xff] }
 0x2a3   :  { %v1426_v56 = vld [vmem:[%s8384_s7 + $0x3d0] sm:$0xff] }
 0x2a4   :  { %3819 = vst [vmem:[#allocation7] sm:$0xff] %v1240_v6  ;;  %3821 = vst [vmem:[#allocation7 + $0x10] sm:$0xff] %v1242_v57  ;;  %v1241_v27 = vmax.f32 %v857_v63, 0.0  ;;  %v1243_v60 = vmax.f32 %v970_v59, 0.0  ;;  %v1378_v63 = vld [vmem:[%s8384_s7 + $0x250] sm:$0xff] }
 0x2a5   :  { %v860_v13 = vpop.f32.mrf.mxu0  ;;  %v973_v61 = vpop.f32.mrf.mxu1  ;;  %v1410_v59 = vld [vmem:[%s8384_s7 + $0x350] sm:$0xff] }
 0x2a6   :  { %3820 = vst [vmem:[#allocation7 + $0x8] sm:$0xff] %v1241_v27  ;;  %3822 = vst [vmem:[#allocation7 + $0x18] sm:$0xff] %v1243_v60  ;;  %1503 = vmatprep.mubr.f32.mxu0 %v1241_v27  ;;  %1608 = vmatprep.mubr.f32.mxu1 %v1243_v60  ;;  %v861_v0 = vadd.f32 %v860_v13, %v6054_v30  ;;  %v974_v32 = vadd.f32 %v973_v61, %v6059_v51 }
 0x2a7   :  { %1504 = vmatmul.mubr.f32.vlgmr.msra.gmra.mxu0 %v1240_v6  ;;  %1609 = vmatmul.mubr.f32.vlgmr.msra.gmra.mxu1 %v1242_v57  ;;  %v862_v2 = vpop.f32.mrf.mxu0  ;;  %v975_v3 = vpop.f32.mrf.mxu1 }
 0x2a8   :  { %v1248_v44 = vmax.f32 %v861_v0, 0.0  ;;  %v863_v7 = vadd.f32 %v862_v2, %v6063_v46  ;;  %v1250_v8 = vmax.f32 %v974_v32, 0.0  ;;  %v976_v9 = vadd.f32 %v975_v3, %v6068_v52  ;;  %4088 = vmatpush3.msra.mxu0 %v1383_v37  ;;  %4144 = vmatpush3.msra.mxu1 %v1415_v62  ;;  %v1393_v37 = vld [vmem:[%s8384_s7 + $0x2c8] sm:$0xff] }
 0x2a9   :  { %4089 = vmatprep.subr.mxu0 %v1398_v1  ;;  %4145 = vmatprep.subr.mxu1 %v1430_v49  ;;  %v1425_v62 = vld [vmem:[%s8384_s7 + $0x3c8] sm:$0xff] }
 0x2aa   :  { %3827 = vst [vmem:[#allocation7 + $0x40] sm:$0xff] %v1248_v44  ;;  %v1249_v20 = vmax.f32 %v863_v7, 0.0  ;;  %3829 = vst [vmem:[#allocation7 + $0x50] sm:$0xff] %v1250_v8  ;;  %v1251_v21 = vmax.f32 %v976_v9, 0.0  ;;  %4090 = vmatpush3.msra.mxu0 %v1382_v4  ;;  %4146 = vmatpush3.msra.mxu1 %v1414_v5  ;;  %v1377_v2 = vld [vmem:[%s8384_s7 + $0x248] sm:$0xff]  ;;  %v1424_v7 = vld [vmem:[%s8384_s7 + $0x3c0] sm:$0xff] }
 0x2ab   :  { %v866_v22 = vpop.f32.mrf.mxu0  ;;  %v979_v24 = vpop.f32.mrf.mxu1  ;;  %4091 = vmatprep.subr.mxu0 %v1397_v10  ;;  %4147 = vmatprep.subr.mxu1 %v1429_v17  ;;  %v1409_v3 = vld [vmem:[%s8384_s7 + $0x348] sm:$0xff]  ;;  %v1376_v10 = vld [vmem:[%s8384_s7 + $0x240] sm:$0xff] }
 0x2ac   :  { %3828 = vst [vmem:[#allocation7 + $0x48] sm:$0xff] %v1249_v20  ;;  %v867_v29 = vadd.f32 %v866_v22, %v6054_v30  ;;  %3830 = vst [vmem:[#allocation7 + $0x58] sm:$0xff] %v1251_v21  ;;  %v980_v26 = vadd.f32 %v979_v24, %v6059_v51  ;;  %1508 = vmatprep.mubr.f32.mxu0 %v1249_v20  ;;  %1613 = vmatprep.mubr.f32.mxu1 %v1251_v21  ;;  %v1408_v17 = vld [vmem:[%s8384_s7 + $0x340] sm:$0xff] }
 0x2ad   :  { %v868_v16 = vpop.f32.mrf.mxu0  ;;  %v981_v33 = vpop.f32.mrf.mxu1  ;;  %1509 = vmatmul.mubr.f32.gmra.mxu0 %v1248_v44  ;;  %1614 = vmatmul.mubr.f32.gmra.mxu1 %v1250_v8  ;;  %v1392_v44 = vld [vmem:[%s8384_s7 + $0x2c0] sm:$0xff] }
 0x2ae   :  { %v1256_v38 = vmax.f32 %v867_v29, 0.0  ;;  %v869_v39 = vadd.f32 %v868_v16, %v6063_v46  ;;  %v1258_v40 = vmax.f32 %v980_v26, 0.0  ;;  %v982_v42 = vadd.f32 %v981_v33, %v6068_v52  ;;  %4092 = vmatpush3.msra.mxu0 %v1381_v25  ;;  %4148 = vmatpush3.msra.mxu1 %v1413_v28  ;;  %v1391_v25 = vld [vmem:[%s8384_s7 + $0x2b8] sm:$0xff] }
 0x2af   :  { %4093 = vmatprep.subr.mxu0 %v1396_v15  ;;  %4149 = vmatprep.subr.mxu1 %v1428_v31  ;;  %v1423_v28 = vld [vmem:[%s8384_s7 + $0x3b8] sm:$0xff] }
 0x2b0   :  { %3835 = vst [vmem:[#allocation7 + $0x80] sm:$0xff] %v1256_v38  ;;  %v1257_v45 = vmax.f32 %v869_v39, 0.0  ;;  %3837 = vst [vmem:[#allocation7 + $0x90] sm:$0xff] %v1258_v40  ;;  %v1259_v47 = vmax.f32 %v982_v42, 0.0  ;;  %4094 = vmatpush3.msra.mxu0 %v1380_v34  ;;  %4150 = vmatpush3.msra.mxu1 %v1412_v35  ;;  %v1375_v16 = vld [vmem:[%s8384_s7 + $0x238] sm:$0xff]  ;;  %v1422_v39 = vld [vmem:[%s8384_s7 + $0x3b0] sm:$0xff] }
 0x2b1   :  { %v872_v48 = vpop.f32.mrf.mxu0  ;;  %v985_v23 = vpop.f32.mrf.mxu1  ;;  %4095 = vmatprep.subr.mxu0 %v1395_v43  ;;  %4151 = vmatprep.subr.mxu1 %v1427_v18  ;;  %v1407_v33 = vld [vmem:[%s8384_s7 + $0x338] sm:$0xff]  ;;  %v1374_v43 = vld [vmem:[%s8384_s7 + $0x230] sm:$0xff] }
 0x2b2   :  { %3836 = vst [vmem:[#allocation7 + $0x88] sm:$0xff] %v1257_v45  ;;  %v873_v58 = vadd.f32 %v872_v48, %v6054_v30  ;;  %3838 = vst [vmem:[#allocation7 + $0x98] sm:$0xff] %v1259_v47  ;;  %v986_v55 = vadd.f32 %v985_v23, %v6059_v51  ;;  %1513 = vmatprep.mubr.f32.mxu0 %v1257_v45  ;;  %1618 = vmatprep.mubr.f32.mxu1 %v1259_v47  ;;  %v1406_v18 = vld [vmem:[%s8384_s7 + $0x330] sm:$0xff] }
 0x2b3   :  { %v874_v6 = vpop.f32.mrf.mxu0  ;;  %v987_v57 = vpop.f32.mrf.mxu1  ;;  %1514 = vmatmul.mubr.f32.gmra.mxu0 %v1256_v38  ;;  %1619 = vmatmul.mubr.f32.gmra.mxu1 %v1258_v40  ;;  %v1390_v38 = vld [vmem:[%s8384_s7 + $0x2b0] sm:$0xff] }
 0x2b4   :  { %v1264_v27 = vmax.f32 %v873_v58, 0.0  ;;  %v875_v60 = vadd.f32 %v874_v6, %v6063_v46  ;;  %v1266_v13 = vmax.f32 %v986_v55, 0.0  ;;  %v988_v61 = vadd.f32 %v987_v57, %v6068_v52  ;;  %4096 = vmatpush3.msra.mxu0 %v1379_v41  ;;  %4152 = vmatpush3.msra.mxu1 %v1411_v54  ;;  %v1389_v41 = vld [vmem:[%s8384_s7 + $0x2a8] sm:$0xff] }
 0x2b5   :  { %4097 = vmatprep.subr.mxu0 %v1394_v53  ;;  %4153 = vmatprep.subr.mxu1 %v1426_v56  ;;  %v1421_v54 = vld [vmem:[%s8384_s7 + $0x3a8] sm:$0xff] }
 0x2b6   :  { %3843 = vst [vmem:[#allocation7 + $0xc0] sm:$0xff] %v1264_v27  ;;  %v1265_v0 = vmax.f32 %v875_v60, 0.0  ;;  %3845 = vst [vmem:[#allocation7 + $0xd0] sm:$0xff] %v1266_v13  ;;  %v1267_v32 = vmax.f32 %v988_v61, 0.0  ;;  %4098 = vmatpush3.msra.mxu0 %v1378_v63  ;;  %4154 = vmatpush3.msra.mxu1 %v1410_v59  ;;  %v1373_v6 = vld [vmem:[%s8384_s7 + $0x228] sm:$0xff]  ;;  %v1420_v60 = vld [vmem:[%s8384_s7 + $0x3a0] sm:$0xff] }
 0x2b7   :  { %v878_v1 = vpop.f32.mrf.mxu0  ;;  %v991_v49 = vpop.f32.mrf.mxu1  ;;  %4099 = vmatprep.subr.mxu0 %v1393_v37  ;;  %4155 = vmatprep.subr.mxu1 %v1425_v62  ;;  %v1405_v57 = vld [vmem:[%s8384_s7 + $0x328] sm:$0xff]  ;;  %v1372_v37 = vld [vmem:[%s8384_s7 + $0x220] sm:$0xff] }
 0x2b8   :  { %3844 = vst [vmem:[#allocation7 + $0xc8] sm:$0xff] %v1265_v0  ;;  %v879_v4 = vadd.f32 %v878_v1, %v6054_v30  ;;  %3846 = vst [vmem:[#allocation7 + $0xd8] sm:$0xff] %v1267_v32  ;;  %v992_v5 = vadd.f32 %v991_v49, %v6059_v51  ;;  %1518 = vmatprep.mubr.f32.mxu0 %v1265_v0  ;;  %1623 = vmatprep.mubr.f32.mxu1 %v1267_v32  ;;  %v1404_v62 = vld [vmem:[%s8384_s7 + $0x320] sm:$0xff] }
 0x2b9   :  { %v880_v8 = vpop.f32.mrf.mxu0  ;;  %v993_v9 = vpop.f32.mrf.mxu1  ;;  %1519 = vmatmul.mubr.f32.gmra.mxu0 %v1264_v27  ;;  %1624 = vmatmul.mubr.f32.gmra.mxu1 %v1266_v13  ;;  %v1388_v27 = vld [vmem:[%s8384_s7 + $0x2a0] sm:$0xff] }
 0x2ba   :  { %v1272_v20 = vmax.f32 %v879_v4, 0.0  ;;  %v881_v21 = vadd.f32 %v880_v8, %v6063_v46  ;;  %v1274_v22 = vmax.f32 %v992_v5, 0.0  ;;  %v994_v24 = vadd.f32 %v993_v9, %v6068_v52  ;;  %4100 = vmatpush3.msra.mxu0 %v1377_v2  ;;  %4156 = vmatpush3.msra.mxu1 %v1409_v3  ;;  %v1387_v2 = vld [vmem:[%s8384_s7 + $0x298] sm:$0xff] }
 0x2bb   :  { %4101 = vmatprep.subr.mxu0 %v1392_v44  ;;  %4157 = vmatprep.subr.mxu1 %v1424_v7  ;;  %v1419_v3 = vld [vmem:[%s8384_s7 + $0x398] sm:$0xff] }
 0x2bc   :  { %3851 = vst [vmem:[#allocation7 + $0x100] sm:$0xff] %v1272_v20  ;;  %v1273_v29 = vmax.f32 %v881_v21, 0.0  ;;  %3853 = vst [vmem:[#allocation7 + $0x110] sm:$0xff] %v1274_v22  ;;  %v1275_v26 = vmax.f32 %v994_v24, 0.0  ;;  %4102 = vmatpush3.msra.mxu0 %v1376_v10  ;;  %4158 = vmatpush3.msra.mxu1 %v1408_v17  ;;  %v1371_v8 = vld [vmem:[%s8384_s7 + $0x218] sm:$0xff]  ;;  %v1418_v21 = vld [vmem:[%s8384_s7 + $0x390] sm:$0xff] }
 0x2bd   :  { %v884_v15 = vpop.f32.mrf.mxu0  ;;  %v997_v31 = vpop.f32.mrf.mxu1  ;;  %4103 = vmatprep.subr.mxu0 %v1391_v25  ;;  %4159 = vmatprep.subr.mxu1 %v1423_v28  ;;  %v1403_v9 = vld [vmem:[%s8384_s7 + $0x318] sm:$0xff] }
 0x2be   :  { %3852 = vst [vmem:[#allocation7 + $0x108] sm:$0xff] %v1273_v29  ;;  %v885_v34 = vadd.f32 %v884_v15, %v6054_v30  ;;  %3854 = vst [vmem:[#allocation7 + $0x118] sm:$0xff] %v1275_v26  ;;  %v998_v35 = vadd.f32 %v997_v31, %v6059_v51  ;;  %1523 = vmatprep.mubr.f32.mxu0 %v1273_v29  ;;  %1628 = vmatprep.mubr.f32.mxu1 %v1275_v26  ;;  %v1385_v15 = vld [vmem:[%s8384_s7 + $0x288] sm:$0xff] }
 0x2bf   :  { %v886_v40 = vpop.f32.mrf.mxu0  ;;  %v999_v42 = vpop.f32.mrf.mxu1  ;;  %1524 = vmatmul.mubr.f32.gmra.mxu0 %v1272_v20  ;;  %1629 = vmatmul.mubr.f32.gmra.mxu1 %v1274_v22  ;;  %v1386_v20 = vld [vmem:[%s8384_s7 + $0x290] sm:$0xff]  ;;  %v1417_v31 = vld [vmem:[%s8384_s7 + $0x388] sm:$0xff] }
 0x2c0   :  { %v1280_v45 = vmax.f32 %v885_v34, 0.0  ;;  %v887_v47 = vadd.f32 %v886_v40, %v6063_v46  ;;  %v1282_v48 = vmax.f32 %v998_v35, 0.0  ;;  %v1000_v23 = vadd.f32 %v999_v42, %v6068_v52  ;;  %4104 = vmatpush3.msra.mxu0 %v1375_v16  ;;  %4160 = vmatpush3.msra.mxu1 %v1407_v33  ;;  %v1384_v34 = vld [vmem:[%s8384_s7 + $0x280] sm:$0xff] }
 0x2c1   :  { %4105 = vmatprep.subr.mxu0 %v1390_v38  ;;  %4161 = vmatprep.subr.mxu1 %v1422_v39  ;;  %v1416_v35 = vld [vmem:[%s8384_s7 + $0x380] sm:$0xff]  ;;  %v766_v40 = vsub.s32 4, %v5083_v11  ;;  %v774_v42 = vsub.s32 6, %v5083_v11 }
 0x2c2   :  { %3859 = vst [vmem:[#allocation7 + $0x140] sm:$0xff] %v1280_v45  ;;  %v1281_v58 = vmax.f32 %v887_v47, 0.0  ;;  %3861 = vst [vmem:[#allocation7 + $0x150] sm:$0xff] %v1282_v48  ;;  %v1283_v55 = vmax.f32 %v1000_v23, 0.0  ;;  %4106 = vmatpush3.msra.mxu0 %v1374_v43  ;;  %4162 = vmatpush3.msra.mxu1 %v1406_v18  ;;  %v1368_v38 = vld [vmem:[%s8384_s7 + $0x200] sm:$0xff]  ;;  %v770_v43 = vsub.s32 5, %v5083_v11 }
 0x2c3   :  { %v890_v53 = vpop.f32.mrf.mxu0  ;;  %v1003_v56 = vpop.f32.mrf.mxu1  ;;  %4107 = vmatprep.subr.mxu0 %v1389_v41  ;;  %4163 = vmatprep.subr.mxu1 %v1421_v54  ;;  %v1400_v39 = vld [vmem:[%s8384_s7 + $0x300] sm:$0xff]  ;;  %v778_v18 = vsub.s32 7, %v5083_v11  ;;  %v6300_v47 = vrot.slane %v6049_v36, %v774_v42  ;;  %v2774_v11 = vld [vmem:[%s8388_s11 + $0x728] sm:$0xff] }
 0x2c4   :  { %3860 = vst [vmem:[#allocation7 + $0x148] sm:$0xff] %v1281_v58  ;;  %v891_v63 = vadd.f32 %v890_v53, %v6054_v30  ;;  %3862 = vst [vmem:[#allocation7 + $0x158] sm:$0xff] %v1283_v55  ;;  %v1004_v59 = vadd.f32 %v1003_v56, %v6059_v51  ;;  %1528 = vmatprep.mubr.f32.mxu0 %v1281_v58  ;;  %1633 = vmatprep.mubr.f32.mxu1 %v1283_v55 }
 0x2c5   :  { %v892_v13 = vpop.f32.mrf.mxu0  ;;  %v1005_v61 = vpop.f32.mrf.mxu1  ;;  %1529 = vmatmul.mubr.f32.gmra.mxu0 %v1280_v45  ;;  %1634 = vmatmul.mubr.f32.gmra.mxu1 %v1282_v48  ;;  %v6295_v45 = vrot.slane %v6049_v36, %v766_v40  ;;  %v6305_v48 = vrot.slane %v6049_v36, %v770_v43  ;;  %v6310_v23 = vrot.slane %v6049_v36, %v778_v18 }
 0x2c6   :  { %v1288_v0 = vmax.f32 %v891_v63, 0.0  ;;  %v893_v32 = vadd.f32 %v892_v13, %v6063_v46  ;;  %v1290_v1 = vmax.f32 %v1004_v59, 0.0  ;;  %v1006_v49 = vadd.f32 %v1005_v61, %v6068_v52  ;;  %4108 = vmatpush3.msra.mxu0 %v1373_v6  ;;  %4164 = vmatpush3.msra.mxu1 %v1405_v57 }
 0x2c7   :  { %4109 = vmatprep.subr.mxu0 %v1388_v27  ;;  %4165 = vmatprep.subr.mxu1 %v1420_v60 }
 0x2c8   :  { %3867 = vst [vmem:[#allocation7 + $0x180] sm:$0xff] %v1288_v0  ;;  %v1289_v4 = vmax.f32 %v893_v32, 0.0  ;;  %3869 = vst [vmem:[#allocation7 + $0x190] sm:$0xff] %v1290_v1  ;;  %v1291_v5 = vmax.f32 %v1006_v49, 0.0  ;;  %4110 = vmatpush3.msra.mxu0 %v1372_v37  ;;  %4166 = vmatpush3.msra.mxu1 %v1404_v62 }
 0x2c9   :  { %v896_v44 = vpop.f32.mrf.mxu0  ;;  %v1009_v7 = vpop.f32.mrf.mxu1  ;;  %4111 = vmatprep.subr.mxu0 %v1387_v2  ;;  %4167 = vmatprep.subr.mxu1 %v1419_v3 }
 0x2ca   :  { %3868 = vst [vmem:[#allocation7 + $0x188] sm:$0xff] %v1289_v4  ;;  %v897_v10 = vadd.f32 %v896_v44, %v6054_v30  ;;  %3870 = vst [vmem:[#allocation7 + $0x198] sm:$0xff] %v1291_v5  ;;  %v1010_v17 = vadd.f32 %v1009_v7, %v6059_v51  ;;  %1533 = vmatprep.mubr.f32.mxu0 %v1289_v4  ;;  %1638 = vmatprep.mubr.f32.mxu1 %v1291_v5  ;;  %v1370_v30 = vld [vmem:[%s8384_s7 + $0x210] sm:$0xff] }
 0x2cb   :  { %v898_v22 = vpop.f32.mrf.mxu0  ;;  %v1011_v24 = vpop.f32.mrf.mxu1  ;;  %1534 = vmatmul.mubr.f32.gmra.mxu0 %v1288_v0  ;;  %1639 = vmatmul.mubr.f32.gmra.mxu1 %v1290_v1  ;;  %v1402_v51 = vld [vmem:[%s8384_s7 + $0x310] sm:$0xff] }
 0x2cc   :  { %v1296_v25 = vmax.f32 %v897_v10, 0.0  ;;  %v899_v28 = vadd.f32 %v898_v22, %v6063_v46  ;;  %v1298_v29 = vmax.f32 %v1010_v17, 0.0  ;;  %v1012_v26 = vadd.f32 %v1011_v24, %v6068_v52  ;;  %4112 = vmatpush3.msra.mxu0 %v1371_v8  ;;  %4168 = vmatpush3.msra.mxu1 %v1403_v9  ;;  %v1369_v46 = vld [vmem:[%s8384_s7 + $0x208] sm:$0xff] }
 0x2cd   :  { %4113 = vmatprep.subr.mxu0 %v1386_v20  ;;  %4169 = vmatprep.subr.mxu1 %v1418_v21  ;;  %v1401_v52 = vld [vmem:[%s8384_s7 + $0x308] sm:$0xff] }
 0x2ce   :  { %3875 = vst [vmem:[#allocation7 + $0x1c0] sm:$0xff] %v1296_v25  ;;  %v1297_v16 = vmax.f32 %v899_v28, 0.0  ;;  %3877 = vst [vmem:[#allocation7 + $0x1d0] sm:$0xff] %v1298_v29  ;;  %v1299_v33 = vmax.f32 %v1012_v26, 0.0  ;;  %4114 = vmatpush3.msra.mxu0 %v1370_v30  ;;  %4170 = vmatpush3.msra.mxu1 %v1402_v51 }
 0x2cf   :  { %4115 = vmatprep.subr.mxu0 %v1385_v15  ;;  %4171 = vmatprep.subr.mxu1 %v1417_v31 }
 0x2d0   :  { %3876 = vst [vmem:[#allocation7 + $0x1c8] sm:$0xff] %v1297_v16  ;;  %3878 = vst [vmem:[#allocation7 + $0x1d8] sm:$0xff] %v1299_v33  ;;  %1538 = vmatprep.mubr.f32.mxu0 %v1297_v16  ;;  %1643 = vmatprep.mubr.f32.mxu1 %v1299_v33 }
 0x2d1   :  { %1539 = vmatmul.mubr.f32.gmra.mxu0 %v1296_v25  ;;  %1644 = vmatmul.mubr.f32.gmra.mxu1 %v1298_v29 }
 0x2d2   :  { %4116 = vmatpush3.msra.mxu0 %v1369_v46  ;;  %4172 = vmatpush3.msra.mxu1 %v1401_v52 }
 0x2d3   :  { %4117 = vmatprep.subr.mxu0 %v1384_v34  ;;  %4173 = vmatprep.subr.mxu1 %v1416_v35 }
 0x2d4   :  { %4118 = vmatpush3.msra.mxu0 %v1368_v38  ;;  %4174 = vmatpush3.msra.mxu1 %v1400_v39 }
 0x2ee   :  { %v1080_v41 = vpop.f32.mrf.mxu0  ;;  %v1193_v54 = vpop.f32.mrf.mxu1 }
 0x2ef   :  { %v1081_v58 = vadd.f32 %v1080_v41, %v6295_v45  ;;  %v1194_v55 = vadd.f32 %v1193_v54, %v6300_v47 }
 0x2f0   :  { %v1082_v53 = vpop.f32.mrf.mxu0  ;;  %v1195_v56 = vpop.f32.mrf.mxu1 }
 0x2f1   :  { %v1244_v6 = vmax.f32 %v1081_v58, 0.0  ;;  %v1246_v57 = vmax.f32 %v1194_v55, 0.0  ;;  %v1083_v63 = vadd.f32 %v1082_v53, %v6305_v48  ;;  %v1196_v59 = vadd.f32 %v1195_v56, %v6310_v23 }
 0x2f2   :  { %v1086_v27 = vpop.f32.mrf.mxu0  ;;  %v1199_v60 = vpop.f32.mrf.mxu1 }
 0x2f3   :  { %3823 = vst [vmem:[#allocation7 + $0x20] sm:$0xff] %v1244_v6  ;;  %3825 = vst [vmem:[#allocation7 + $0x30] sm:$0xff] %v1246_v57  ;;  %v1245_v36 = vmax.f32 %v1083_v63, 0.0  ;;  %v1247_v13 = vmax.f32 %v1196_v59, 0.0  ;;  %v1087_v61 = vadd.f32 %v1086_v27, %v6295_v45  ;;  %v1200_v37 = vadd.f32 %v1199_v60, %v6300_v47 }
 0x2f4   :  { %v1088_v62 = vpop.f32.mrf.mxu0  ;;  %v1201_v0 = vpop.f32.mrf.mxu1 }
 0x2f5   :  { %3824 = vst [vmem:[#allocation7 + $0x28] sm:$0xff] %v1245_v36  ;;  %3826 = vst [vmem:[#allocation7 + $0x38] sm:$0xff] %v1247_v13  ;;  %v1252_v32 = vmax.f32 %v1087_v61, 0.0  ;;  %v1254_v1 = vmax.f32 %v1200_v37, 0.0  ;;  %v1089_v49 = vadd.f32 %v1088_v62, %v6305_v48  ;;  %v1202_v2 = vadd.f32 %v1201_v0, %v6310_v23  ;;  %1713 = vmatprep.mubr.f32.mxu0 %v1245_v36 }
 0x2f6   :  { %1818 = vmatprep.mubr.f32.mxu1 %v1247_v13  ;;  %v1092_v3 = vpop.f32.mrf.mxu0  ;;  %v1205_v4 = vpop.f32.mrf.mxu1  ;;  %1714 = vmatmul.mubr.f32.vlgmr.msra.gmra.mxu0 %v1244_v6 }
 0x2f7   :  { %1819 = vmatmul.mubr.f32.vlgmr.msra.gmra.mxu1 %v1246_v57  ;;  %3831 = vst [vmem:[#allocation7 + $0x60] sm:$0xff] %v1252_v32  ;;  %3833 = vst [vmem:[#allocation7 + $0x70] sm:$0xff] %v1254_v1  ;;  %v1253_v5 = vmax.f32 %v1089_v49, 0.0  ;;  %v1255_v44 = vmax.f32 %v1202_v2, 0.0  ;;  %v1093_v7 = vadd.f32 %v1092_v3, %v6295_v45  ;;  %v1206_v8 = vadd.f32 %v1205_v4, %v6300_v47  ;;  %v1980_v2 = vld [vmem:[%s8386_s9 + $0x3c8] sm:$0xff] }
 0x2f8   :  { %v1094_v9 = vpop.f32.mrf.mxu0  ;;  %v1207_v10 = vpop.f32.mrf.mxu1  ;;  %2029 = vmatprep.subr.mxu0 %v1980_v2  ;;  %v1916_v2 = vld [vmem:[%s8386_s9 + $0x1c8] sm:$0xff] }
 0x2f9   :  { %3832 = vst [vmem:[#allocation7 + $0x68] sm:$0xff] %v1253_v5  ;;  %3834 = vst [vmem:[#allocation7 + $0x78] sm:$0xff] %v1255_v44  ;;  %v1260_v17 = vmax.f32 %v1093_v7, 0.0  ;;  %v1262_v20 = vmax.f32 %v1206_v8, 0.0  ;;  %v1095_v21 = vadd.f32 %v1094_v9, %v6305_v48  ;;  %v1208_v22 = vadd.f32 %v1207_v10, %v6310_v23  ;;  %1718 = vmatprep.mubr.f32.mxu0 %v1253_v5 }
 0x2fa   :  { %1823 = vmatprep.mubr.f32.mxu1 %v1255_v44  ;;  %v1098_v24 = vpop.f32.mrf.mxu0  ;;  %v1211_v30 = vpop.f32.mrf.mxu1  ;;  %1719 = vmatmul.mubr.f32.gmra.mxu0 %v1252_v32 }
 0x2fb   :  { %1824 = vmatmul.mubr.f32.gmra.mxu1 %v1254_v1  ;;  %3839 = vst [vmem:[#allocation7 + $0xa0] sm:$0xff] %v1260_v17  ;;  %3841 = vst [vmem:[#allocation7 + $0xb0] sm:$0xff] %v1262_v20  ;;  %v1261_v51 = vmax.f32 %v1095_v21, 0.0  ;;  %v1263_v25 = vmax.f32 %v1208_v22, 0.0  ;;  %v1099_v28 = vadd.f32 %v1098_v24, %v6295_v45  ;;  %v1212_v29 = vadd.f32 %v1211_v30, %v6300_v47  ;;  %v1979_v24 = vld [vmem:[%s8386_s9 + $0x3c0] sm:$0xff]  ;;  %v1982_v30 = vld [vmem:[%s8386_s9 + $0x3d8] sm:$0xff] }
 0x2fc   :  { %v1100_v26 = vpop.f32.mrf.mxu0  ;;  %v1213_v15 = vpop.f32.mrf.mxu1  ;;  %2030 = vmatpush1.msra.mxu0 %v1979_v24  ;;  %2142 = vmatprep.subr.mxu1 %v1982_v30  ;;  %v1901_v24 = vld [vmem:[%s8386_s9 + $0x150] sm:$0xff]  ;;  %v1891_v30 = vld [vmem:[%s8386_s9 + $0x100] sm:$0xff] }
 0x2fd   :  { %3840 = vst [vmem:[#allocation7 + $0xa8] sm:$0xff] %v1261_v51  ;;  %3842 = vst [vmem:[#allocation7 + $0xb8] sm:$0xff] %v1263_v25  ;;  %v1268_v31 = vmax.f32 %v1099_v28, 0.0  ;;  %v1270_v16 = vmax.f32 %v1212_v29, 0.0  ;;  %v1101_v33 = vadd.f32 %v1100_v26, %v6305_v48  ;;  %v1214_v46 = vadd.f32 %v1213_v15, %v6310_v23  ;;  %1723 = vmatprep.mubr.f32.mxu0 %v1261_v51  ;;  %v1972_v51 = vld [vmem:[%s8386_s9 + $0x388] sm:$0xff]  ;;  %v1981_v15 = vld [vmem:[%s8386_s9 + $0x3d0] sm:$0xff] }
 0x2fe   :  { %1828 = vmatprep.mubr.f32.mxu1 %v1263_v25  ;;  %v1104_v52 = vpop.f32.mrf.mxu0  ;;  %v1217_v34 = vpop.f32.mrf.mxu1  ;;  %1724 = vmatmul.mubr.f32.gmra.mxu0 %v1260_v17 }
 0x2ff   :  { %1829 = vmatmul.mubr.f32.gmra.mxu1 %v1262_v20  ;;  %3847 = vst [vmem:[#allocation7 + $0xe0] sm:$0xff] %v1268_v31  ;;  %3849 = vst [vmem:[#allocation7 + $0xf0] sm:$0xff] %v1270_v16  ;;  %v1269_v35 = vmax.f32 %v1101_v33, 0.0  ;;  %v1271_v38 = vmax.f32 %v1214_v46, 0.0  ;;  %v1105_v39 = vadd.f32 %v1104_v52, %v6295_v45  ;;  %v1218_v41 = vadd.f32 %v1217_v34, %v6300_v47  ;;  %v1971_v33 = vld [vmem:[%s8386_s9 + $0x380] sm:$0xff] }
 0x300   :  { %v1106_v54 = vpop.f32.mrf.mxu0  ;;  %v1219_v58 = vpop.f32.mrf.mxu1  ;;  %2031 = vmatprep.subr.mxu0 %v1972_v51  ;;  %2143 = vmatpush1.msra.mxu1 %v1981_v15  ;;  %v1894_v51 = vld [vmem:[%s8386_s9 + $0x118] sm:$0xff]  ;;  %v1885_v15 = vld [vmem:[%s8386_s9 + $0xd0] sm:$0xff] }
 0x301   :  { %3848 = vst [vmem:[#allocation7 + $0xe8] sm:$0xff] %v1269_v35  ;;  %3850 = vst [vmem:[#allocation7 + $0xf8] sm:$0xff] %v1271_v38  ;;  %v1276_v55 = vmax.f32 %v1105_v39, 0.0  ;;  %v1278_v53 = vmax.f32 %v1218_v41, 0.0  ;;  %v1107_v56 = vadd.f32 %v1106_v54, %v6305_v48  ;;  %v1220_v6 = vadd.f32 %v1219_v58, %v6310_v23  ;;  %1728 = vmatprep.mubr.f32.mxu0 %v1269_v35  ;;  %v1964_v35 = vld [vmem:[%s8386_s9 + $0x348] sm:$0xff]  ;;  %v1965_v58 = vld [vmem:[%s8386_s9 + $0x350] sm:$0xff] }
 0x302   :  { %1833 = vmatprep.mubr.f32.mxu1 %v1271_v38  ;;  %v1110_v57 = vpop.f32.mrf.mxu0  ;;  %v1223_v63 = vpop.f32.mrf.mxu1  ;;  %1729 = vmatmul.mubr.f32.gmra.mxu0 %v1268_v31  ;;  %v1973_v38 = vld [vmem:[%s8386_s9 + $0x390] sm:$0xff]  ;;  %v1956_v54 = vld [vmem:[%s8386_s9 + $0x308] sm:$0xff] }
 0x303   :  { %1834 = vmatmul.mubr.f32.gmra.mxu1 %v1270_v16  ;;  %3855 = vst [vmem:[#allocation7 + $0x120] sm:$0xff] %v1276_v55  ;;  %3857 = vst [vmem:[#allocation7 + $0x130] sm:$0xff] %v1278_v53  ;;  %v1277_v59 = vmax.f32 %v1107_v56, 0.0  ;;  %v1279_v27 = vmax.f32 %v1220_v6, 0.0  ;;  %v1111_v60 = vadd.f32 %v1110_v57, %v6295_v45  ;;  %v1224_v36 = vadd.f32 %v1223_v63, %v6300_v47  ;;  %v1948_v56 = vld [vmem:[%s8386_s9 + $0x2c8] sm:$0xff]  ;;  %v1957_v6 = vld [vmem:[%s8386_s9 + $0x310] sm:$0xff] }
 0x304   :  { %v1112_v13 = vpop.f32.mrf.mxu0  ;;  %v1225_v61 = vpop.f32.mrf.mxu1  ;;  %2032 = vmatpush1.msra.mxu0 %v1971_v33  ;;  %v1947_v57 = vld [vmem:[%s8386_s9 + $0x2c0] sm:$0xff]  ;;  %v1950_v63 = vld [vmem:[%s8386_s9 + $0x2d8] sm:$0xff] }
 0x305   :  { %3856 = vst [vmem:[#allocation7 + $0x128] sm:$0xff] %v1277_v59  ;;  %3858 = vst [vmem:[#allocation7 + $0x138] sm:$0xff] %v1279_v27  ;;  %v1284_v37 = vmax.f32 %v1111_v60, 0.0  ;;  %v1286_v62 = vmax.f32 %v1224_v36, 0.0  ;;  %v1113_v0 = vadd.f32 %v1112_v13, %v6305_v48  ;;  %v1226_v32 = vadd.f32 %v1225_v61, %v6310_v23  ;;  %1733 = vmatprep.mubr.f32.mxu0 %v1277_v59  ;;  %v1940_v59 = vld [vmem:[%s8386_s9 + $0x288] sm:$0xff]  ;;  %v1939_v60 = vld [vmem:[%s8386_s9 + $0x280] sm:$0xff] }
 0x306   :  { %1838 = vmatprep.mubr.f32.mxu1 %v1279_v27  ;;  %v1116_v1 = vpop.f32.mrf.mxu0  ;;  %v1229_v49 = vpop.f32.mrf.mxu1  ;;  %1734 = vmatmul.mubr.f32.gmra.mxu0 %v1276_v55  ;;  %v1955_v55 = vld [vmem:[%s8386_s9 + $0x300] sm:$0xff]  ;;  %v1949_v27 = vld [vmem:[%s8386_s9 + $0x2d0] sm:$0xff]  ;;  %v1942_v36 = vld [vmem:[%s8386_s9 + $0x298] sm:$0xff] }
 0x307   :  { %1839 = vmatmul.mubr.f32.gmra.mxu1 %v1278_v53  ;;  %3863 = vst [vmem:[#allocation7 + $0x160] sm:$0xff] %v1284_v37  ;;  %3865 = vst [vmem:[#allocation7 + $0x170] sm:$0xff] %v1286_v62  ;;  %v1285_v3 = vmax.f32 %v1113_v0, 0.0  ;;  %v1287_v4 = vmax.f32 %v1226_v32, 0.0  ;;  %v1117_v5 = vadd.f32 %v1116_v1, %v6295_v45  ;;  %v1230_v44 = vadd.f32 %v1229_v49, %v6300_v47  ;;  %v1958_v53 = vld [vmem:[%s8386_s9 + $0x318] sm:$0xff]  ;;  %v1932_v13 = vld [vmem:[%s8386_s9 + $0x248] sm:$0xff] }
 0x308   :  { %v1118_v7 = vpop.f32.mrf.mxu0  ;;  %v1231_v8 = vpop.f32.mrf.mxu1  ;;  %2033 = vmatprep.subr.mxu0 %v1964_v35  ;;  %v1941_v61 = vld [vmem:[%s8386_s9 + $0x290] sm:$0xff]  ;;  %v1924_v0 = vld [vmem:[%s8386_s9 + $0x208] sm:$0xff]  ;;  %v1923_v1 = vld [vmem:[%s8386_s9 + $0x200] sm:$0xff] }
 0x309   :  { %3864 = vst [vmem:[#allocation7 + $0x168] sm:$0xff] %v1285_v3  ;;  %3866 = vst [vmem:[#allocation7 + $0x178] sm:$0xff] %v1287_v4  ;;  %v1292_v9 = vmax.f32 %v1117_v5, 0.0  ;;  %v1294_v10 = vmax.f32 %v1230_v44, 0.0  ;;  %v1119_v17 = vadd.f32 %v1118_v7, %v6305_v48  ;;  %v1232_v20 = vadd.f32 %v1231_v8, %v6310_v23  ;;  %1738 = vmatprep.mubr.f32.mxu0 %v1285_v3  ;;  %v1933_v32 = vld [vmem:[%s8386_s9 + $0x250] sm:$0xff]  ;;  %v1926_v49 = vld [vmem:[%s8386_s9 + $0x218] sm:$0xff] }
 0x30a   :  { %1843 = vmatprep.mubr.f32.mxu1 %v1287_v4  ;;  %v1122_v21 = vpop.f32.mrf.mxu0  ;;  %v1235_v22 = vpop.f32.mrf.mxu1  ;;  %1739 = vmatmul.mubr.f32.gmra.mxu0 %v1284_v37  ;;  %v1931_v37 = vld [vmem:[%s8386_s9 + $0x240] sm:$0xff]  ;;  %v1925_v3 = vld [vmem:[%s8386_s9 + $0x210] sm:$0xff]  ;;  %v1918_v5 = vld [vmem:[%s8386_s9 + $0x1d8] sm:$0xff] }
 0x30b   :  { %1844 = vmatmul.mubr.f32.gmra.mxu1 %v1286_v62  ;;  %3871 = vst [vmem:[#allocation7 + $0x1a0] sm:$0xff] %v1292_v9  ;;  %3873 = vst [vmem:[#allocation7 + $0x1b0] sm:$0xff] %v1294_v10  ;;  %v1293_v25 = vmax.f32 %v1119_v17, 0.0  ;;  %v1295_v28 = vmax.f32 %v1232_v20, 0.0  ;;  %v1123_v29 = vadd.f32 %v1122_v21, %v6295_v45  ;;  %v1236_v26 = vadd.f32 %v1235_v22, %v6300_v47  ;;  %v1974_v45 = vld [vmem:[%s8386_s9 + $0x398] sm:$0xff]  ;;  %v1915_v4 = vld [vmem:[%s8386_s9 + $0x1c0] sm:$0xff] }
 0x30c   :  { %v1124_v31 = vpop.f32.mrf.mxu0  ;;  %v1237_v16 = vpop.f32.mrf.mxu1  ;;  %2144 = vmatprep.subr.mxu1 %v1974_v45  ;;  %v1934_v62 = vld [vmem:[%s8386_s9 + $0x258] sm:$0xff]  ;;  %v1908_v44 = vld [vmem:[%s8386_s9 + $0x188] sm:$0xff]  ;;  %v1917_v7 = vld [vmem:[%s8386_s9 + $0x1d0] sm:$0xff] }
 0x30d   :  { %3872 = vst [vmem:[#allocation7 + $0x1a8] sm:$0xff] %v1293_v25  ;;  %3874 = vst [vmem:[#allocation7 + $0x1b8] sm:$0xff] %v1295_v28  ;;  %v1300_v47 = vmax.f32 %v1123_v29, 0.0  ;;  %v1302_v46 = vmax.f32 %v1236_v26, 0.0  ;;  %v1125_v52 = vadd.f32 %v1124_v31, %v6305_v48  ;;  %v1238_v34 = vadd.f32 %v1237_v16, %v6310_v23  ;;  %1743 = vmatprep.mubr.f32.mxu0 %v1293_v25  ;;  %v1963_v48 = vld [vmem:[%s8386_s9 + $0x340] sm:$0xff]  ;;  %v1966_v23 = vld [vmem:[%s8386_s9 + $0x358] sm:$0xff] }
 0x30e   :  { %1848 = vmatprep.mubr.f32.mxu1 %v1295_v28  ;;  %1744 = vmatmul.mubr.f32.gmra.mxu0 %v1292_v9  ;;  %v1907_v8 = vld [vmem:[%s8386_s9 + $0x180] sm:$0xff]  ;;  %v1910_v9 = vld [vmem:[%s8386_s9 + $0x198] sm:$0xff]  ;;  %v1909_v17 = vld [vmem:[%s8386_s9 + $0x190] sm:$0xff] }
 0x30f   :  { %1849 = vmatmul.mubr.f32.gmra.mxu1 %v1294_v10  ;;  %3879 = vst [vmem:[#allocation7 + $0x1e0] sm:$0xff] %v1300_v47  ;;  %3881 = vst [vmem:[#allocation7 + $0x1f0] sm:$0xff] %v1302_v46  ;;  %v1301_v39 = vmax.f32 %v1125_v52, 0.0  ;;  %v1303_v41 = vmax.f32 %v1238_v34, 0.0  ;;  %2034 = vmatpush1.msra.mxu0 %v1963_v48  ;;  %v1900_v10 = vld [vmem:[%s8386_s9 + $0x148] sm:$0xff]  ;;  %v1899_v20 = vld [vmem:[%s8386_s9 + $0x140] sm:$0xff] }
 0x310   :  { %2145 = vmatpush1.msra.mxu1 %v1973_v38  ;;  %2035 = vmatprep.subr.mxu0 %v1956_v54  ;;  %v1902_v21 = vld [vmem:[%s8386_s9 + $0x158] sm:$0xff]  ;;  %v1892_v22 = vld [vmem:[%s8386_s9 + $0x108] sm:$0xff]  ;;  %v1893_v25 = vld [vmem:[%s8386_s9 + $0x110] sm:$0xff]  ;;  %v4358_v48 = vmov 0.0  }
 0x311   :  { %3880 = vst [vmem:[#allocation7 + $0x1e8] sm:$0xff] %v1301_v39  ;;  %3882 = vst [vmem:[#allocation7 + $0x1f8] sm:$0xff] %v1303_v41  ;;  %1748 = vmatprep.mubr.f32.mxu0 %v1301_v39  ;;  %1853 = vmatprep.mubr.f32.mxu1 %v1303_v41  ;;  %v1884_v28 = vld [vmem:[%s8386_s9 + $0xc8] sm:$0xff]  ;;  %v1883_v29 = vld [vmem:[%s8386_s9 + $0xc0] sm:$0xff] }
 0x312   :  { %1749 = vmatmul.mubr.f32.gmra.mxu0 %v1300_v47  ;;  %2146 = vmatprep.subr.mxu1 %v1966_v23  ;;  %v1886_v26 = vld [vmem:[%s8386_s9 + $0xd8] sm:$0xff]  ;;  %v1876_v31 = vld [vmem:[%s8386_s9 + $0x88] sm:$0xff]  ;;  %v1875_v33 = vld [vmem:[%s8386_s9 + $0x80] sm:$0xff] }
 0x313   :  { %1854 = vmatmul.mubr.f32.gmra.mxu1 %v1302_v46  ;;  %2036 = vmatpush1.msra.mxu0 %v1955_v55  ;;  %v1878_v16 = vld [vmem:[%s8386_s9 + $0x98] sm:$0xff]  ;;  %v1877_v45 = vld [vmem:[%s8386_s9 + $0x90] sm:$0xff]  ;;  %v1868_v47 = vld [vmem:[%s8386_s9 + $0x48] sm:$0xff] }
 0x314   :  { %2147 = vmatpush1.msra.mxu1 %v1965_v58  ;;  %2037 = vmatprep.subr.mxu0 %v1948_v56  ;;  %v1870_v46 = vld [vmem:[%s8386_s9 + $0x58] sm:$0xff]  ;;  %v1867_v52 = vld [vmem:[%s8386_s9 + $0x40] sm:$0xff]  ;;  %v1869_v34 = vld [vmem:[%s8386_s9 + $0x50] sm:$0xff] }
 0x315   :  { %2148 = vmatprep.subr.mxu1 %v1958_v53  ;;  %2038 = vmatpush1.msra.mxu0 %v1947_v57  ;;  %v1860_v35 = vld [vmem:[%s8386_s9 + $0x8] sm:$0xff]  ;;  %v1862_v38 = vld [vmem:[%s8386_s9 + $0x18] sm:$0xff]  ;;  %v1859_v39 = vld [vmem:[%s8386_s9] sm:$0xff] }
 0x316   :  { %2149 = vmatpush1.msra.mxu1 %v1957_v6  ;;  %2039 = vmatprep.subr.mxu0 %v1940_v59  ;;  %v1861_v41 = vld [vmem:[%s8386_s9 + $0x10] sm:$0xff]  ;;  %v1984_v23 = vld [vmem:[%s8386_s9 + $0x3e8] sm:$0xff]  ;;  %v1986_v54 = vld [vmem:[%s8386_s9 + $0x3f8] sm:$0xff] }
 0x317   :  { %2150 = vmatprep.subr.mxu1 %v1950_v63  ;;  %2040 = vmatpush1.msra.mxu0 %v1939_v60 }
 0x318   :  { %2151 = vmatpush1.msra.mxu1 %v1949_v27  ;;  %2041 = vmatprep.subr.mxu0 %v1932_v13 }
 0x319   :  { %2152 = vmatprep.subr.mxu1 %v1942_v36  ;;  %2042 = vmatpush1.msra.mxu0 %v1931_v37 }
 0x31a   :  { %2153 = vmatpush1.msra.mxu1 %v1941_v61  ;;  %2043 = vmatprep.subr.mxu0 %v1924_v0 }
 0x31b   :  { %2154 = vmatprep.subr.mxu1 %v1934_v62  ;;  %2044 = vmatpush1.msra.mxu0 %v1923_v1 }
 0x31c   :  { %2155 = vmatpush1.msra.mxu1 %v1933_v32  ;;  %2045 = vmatprep.subr.mxu0 %v1916_v2 }
 0x31d   :  { %2156 = vmatprep.subr.mxu1 %v1926_v49  ;;  %2046 = vmatpush1.msra.mxu0 %v1915_v4 }
 0x31e   :  { %2157 = vmatpush1.msra.mxu1 %v1925_v3  ;;  %2047 = vmatprep.subr.mxu0 %v1908_v44 }
 0x31f   :  { %2158 = vmatprep.subr.mxu1 %v1918_v5  ;;  %2048 = vmatpush1.msra.mxu0 %v1907_v8 }
 0x320   :  { %2159 = vmatpush1.msra.mxu1 %v1917_v7  ;;  %2049 = vmatprep.subr.mxu0 %v1900_v10 }
 0x321   :  { %2160 = vmatprep.subr.mxu1 %v1910_v9  ;;  %2050 = vmatpush1.msra.mxu0 %v1899_v20 }
 0x322   :  { %2161 = vmatpush1.msra.mxu1 %v1909_v17  ;;  %2051 = vmatprep.subr.mxu0 %v1892_v22  ;;  %v6571_v22 = vld [vmem:[%s8385_s8] ss:$0 sm:$0xff] }
 0x323   :  { %2162 = vmatprep.subr.mxu1 %v1902_v21  ;;  %2052 = vmatpush1.msra.mxu0 %v1891_v30 }
 0x324   :  { %2163 = vmatpush1.msra.mxu1 %v1901_v24  ;;  %2053 = vmatprep.subr.mxu0 %v1884_v28 }
 0x325   :  { %2164 = vmatprep.subr.mxu1 %v1894_v51  ;;  %2054 = vmatpush1.msra.mxu0 %v1883_v29 }
 0x326   :  { %2165 = vmatpush1.msra.mxu1 %v1893_v25  ;;  %2055 = vmatprep.subr.mxu0 %v1876_v31 }
 0x327   :  { %2166 = vmatprep.subr.mxu1 %v1886_v26  ;;  %2056 = vmatpush1.msra.mxu0 %v1875_v33 }
 0x328   :  { %2167 = vmatpush1.msra.mxu1 %v1885_v15  ;;  %2057 = vmatprep.subr.mxu0 %v1868_v47 }
 0x329   :  { %2168 = vmatprep.subr.mxu1 %v1878_v16  ;;  %2058 = vmatpush1.msra.mxu0 %v1867_v52 }
 0x32a   :  { %2169 = vmatpush1.msra.mxu1 %v1877_v45  ;;  %2059 = vmatprep.subr.mxu0 %v1860_v35 }
 0x32b   :  { %2170 = vmatprep.subr.mxu1 %v1870_v46  ;;  %2060 = vmatpush1.msra.mxu0 %v1859_v39 }
 0x32c   :  { %2171 = vmatpush1.msra.mxu1 %v1869_v34  ;;  %2093 = vmatprep.mubr.f32.mxu0 %v4358_v48 }
 0x32d   :  { %2172 = vmatprep.subr.mxu1 %v1862_v38  ;;  %2206 = vmatprep.mubr.f32.mxu1 %v4358_v48 }
 0x32e   :  { %2173 = vmatpush1.msra.mxu1 %v1861_v41  ;;  %2255 = vmatprep.subr.mxu0 %v1984_v23 }
 0x32f   :  { %2368 = vmatprep.subr.mxu1 %v1986_v54 }
 0x367   :  { %v4007_v58 = vpop.f32.mrf.mxu0  ;;  %v4063_v55 = vpop.f32.mrf.mxu1 }
 0x369   :  { %v4008_v53 = vpop.f32.mrf.mxu0  ;;  %v4064_v56 = vpop.f32.mrf.mxu1 }
 0x36a   :  { %v4009_v21 = vadd.f32 %v4008_v53, %v4007_v58  ;;  %v4065_v26 = vadd.f32 %v4064_v56, %v4063_v55 }
 0x36c   :  { %v1506_v51 = vadd.f32 %v4009_v21, %v6571_v22 }
 0x36d   :  { %v4010_v6 = vpop.f32.mrf.mxu0  ;;  %v4066_v57 = vpop.f32.mrf.mxu1 }
 0x36e   :  { %v1611_v33 = vadd.f32 %v4065_v26, %v1506_v51 }
 0x36f   :  { %v4011_v63 = vpop.f32.mrf.mxu0  ;;  %v4067_v59 = vpop.f32.mrf.mxu1 }
 0x370   :  { %v4012_v25 = vadd.f32 %v4011_v63, %v4010_v6  ;;  %v4068_v47 = vadd.f32 %v4067_v59, %v4066_v57  ;;  %v1983_v6 = vld [vmem:[%s8386_s9 + $0x3e0] sm:$0xff]  ;;  %v1985_v57 = vld [vmem:[%s8386_s9 + $0x3f0] sm:$0xff] }
 0x372   :  { %v1511_v45 = vadd.f32 %v4012_v25, %v6571_v22 }
 0x373   :  { %v4013_v27 = vpop.f32.mrf.mxu0  ;;  %v4069_v60 = vpop.f32.mrf.mxu1 }
 0x374   :  { %v1616_v53 = vadd.f32 %v4068_v47, %v1511_v45  ;;  %v1967_v45 = vld [vmem:[%s8386_s9 + $0x360] sm:$0xff]  ;;  %v1969_v47 = vld [vmem:[%s8386_s9 + $0x370] sm:$0xff] }
 0x375   :  { %v4014_v36 = vpop.f32.mrf.mxu0  ;;  %v4070_v13 = vpop.f32.mrf.mxu1 }
 0x376   :  { %v4015_v15 = vadd.f32 %v4014_v36, %v4013_v27  ;;  %v4071_v41 = vadd.f32 %v4070_v13, %v4069_v60  ;;  %v1976_v27 = vld [vmem:[%s8386_s9 + $0x3a8] sm:$0xff]  ;;  %v1978_v60 = vld [vmem:[%s8386_s9 + $0x3b8] sm:$0xff] }
 0x378   :  { %v1516_v39 = vadd.f32 %v4015_v15, %v6571_v22 }
 0x379   :  { %v4016_v61 = vpop.f32.mrf.mxu0  ;;  %v4072_v37 = vpop.f32.mrf.mxu1 }
 0x37b   :  { %v4017_v62 = vpop.f32.mrf.mxu0  ;;  %v4073_v0 = vpop.f32.mrf.mxu1 }
 0x37c   :  { %v4018_v23 = vadd.f32 %v4017_v62, %v4016_v61  ;;  %v1621_v61 = vadd.f32 %v4071_v41, %v1516_v39  ;;  %v4074_v21 = vadd.f32 %v4073_v0, %v4072_v37  ;;  %v1968_v0 = vld [vmem:[%s8386_s9 + $0x368] sm:$0xff]  ;;  %v1962_v41 = vld [vmem:[%s8386_s9 + $0x338] sm:$0xff] }
 0x37d   :  { %v1960_v39 = vld [vmem:[%s8386_s9 + $0x328] sm:$0xff] }
 0x37e   :  { %v1521_v62 = vadd.f32 %v4018_v23, %v6571_v22 }
 0x37f   :  { %v4019_v32 = vpop.f32.mrf.mxu0  ;;  %v6544_v1 = vpop.f32.mrf.mxu1 }
 0x381   :  { %v4020_v49 = vpop.f32.mrf.mxu0  ;;  %v6546_v2 = vpop.f32.mrf.mxu1 }
 0x382   :  { %v4021_v26 = vadd.f32 %v4020_v49, %v4019_v32 }
 0x384   :  { %v1526_v23 = vadd.f32 %v4021_v26, %v6571_v22 }
 0x385   :  { %v6548_v3 = vpop.f32.mrf.mxu0  ;;  %v6550_v4 = vpop.f32.mrf.mxu1 }
 0x387   :  { %v6552_v5 = vpop.f32.mrf.mxu0  ;;  %v6554_v44 = vpop.f32.mrf.mxu1 }
 0x38b   :  { %v6556_v7 = vpop.f32.mrf.mxu0  ;;  %v6558_v8 = vpop.f32.mrf.mxu1 }
 0x38d   :  { %v6560_v9 = vpop.f32.mrf.mxu0  ;;  %v6562_v10 = vpop.f32.mrf.mxu1 }
 0x391   :  { %v6564_v17 = vpop.f32.mrf.mxu0  ;;  %v6566_v20 = vpop.f32.mrf.mxu1 }
 0x393   :  { %v6573_v24 = vpop.f32.mrf.mxu0  ;;  %v6575_v30 = vpop.f32.mrf.mxu1 }
 0x3b6   :  { %v4119_v28 = vpop.f32.mrf.mxu0 }
 0x3b7   :  { %v4175_v29 = vpop.f32.mrf.mxu1 }
 0x3b8   :  { %v4120_v31 = vpop.f32.mrf.mxu0 }
 0x3b9   :  { %v4176_v16 = vpop.f32.mrf.mxu1  ;;  %v4121_v46 = vadd.f32 %v4120_v31, %v4119_v28  ;;  %v1975_v28 = vld [vmem:[%s8386_s9 + $0x3a0] sm:$0xff] }
 0x3ba   :  { %v4122_v52 = vpop.f32.mrf.mxu0  ;;  %v4177_v38 = vadd.f32 %v4176_v16, %v4175_v29  ;;  %v1977_v29 = vld [vmem:[%s8386_s9 + $0x3b0] sm:$0xff] }
 0x3bb   :  { %v4178_v34 = vpop.f32.mrf.mxu1  ;;  %v1716_v35 = vadd.f32 %v4121_v46, %v1611_v33  ;;  %v1970_v33 = vld [vmem:[%s8386_s9 + $0x378] sm:$0xff]  ;;  %v1626_v46 = vadd.f32 %v4074_v21, %v1521_v62 }
 0x3bc   :  { %v4123_v54 = vpop.f32.mrf.mxu0  ;;  %v1946_v62 = vld [vmem:[%s8386_s9 + $0x2b8] sm:$0xff] }
 0x3bd   :  { %v4179_v58 = vpop.f32.mrf.mxu1  ;;  %v6580_v55 = vadd.f32 %v4177_v38, %v1716_v35  ;;  %v4124_v56 = vadd.f32 %v4123_v54, %v4122_v52  ;;  %v4077_v52 = vadd.f32 %v6546_v2, %v6544_v1  ;;  %v1959_v54 = vld [vmem:[%s8386_s9 + $0x320] sm:$0xff] }
 0x3be   :  { %v4125_v63 = vpop.f32.mrf.mxu0  ;;  %v4180_v13 = vadd.f32 %v4179_v58, %v4178_v34  ;;  %v4024_v34 = vadd.f32 %v6552_v5, %v6548_v3  ;;  %v1961_v58 = vld [vmem:[%s8386_s9 + $0x330] sm:$0xff] }
 0x3bf   :  { %v4181_v59 = vpop.f32.mrf.mxu1  ;;  %3883 = vst [vmem:[%s8398_s21] sm:$0xff] %v6580_v55  ;;  %v1721_v36 = vadd.f32 %v4124_v56, %v1616_v53  ;;  %2094 = vmatmul.mubr.f32.vlgmr.msra.gmra.mxu0 %v6580_v55  ;;  %2207 = vmatmul.mubr.f32.vlgmr.msra.gmra.mxu1 %v6580_v55 }
 0x3c0   :  { %v4126_v51 = vpop.f32.mrf.mxu0  ;;  %2256 = vmatpush1.msra.mxu0 %v1983_v6  ;;  %2369 = vmatpush1.msra.mxu1 %v1985_v57  ;;  %v1531_v6 = vadd.f32 %v4024_v34, %v6571_v22  ;;  %v4080_v57 = vadd.f32 %v6554_v44, %v6550_v4  ;;  %v1951_v44 = vld [vmem:[%s8386_s9 + $0x2e0] sm:$0xff]  ;;  %v1937_v34 = vld [vmem:[%s8386_s9 + $0x270] sm:$0xff] }
 0x3c1   :  { %v4182_v25 = vpop.f32.mrf.mxu1  ;;  %v6607_v15 = vadd.f32 %v4180_v13, %v1721_v36  ;;  %v4127_v31 = vadd.f32 %v4126_v51, %v4125_v63  ;;  %2257 = vmatprep.subr.mxu0 %v1976_v27  ;;  %2370 = vmatprep.subr.mxu1 %v1978_v60  ;;  %v4027_v63 = vadd.f32 %v6560_v9, %v6556_v7  ;;  %v1954_v27 = vld [vmem:[%s8386_s9 + $0x2f8] sm:$0xff]  ;;  %v1953_v7 = vld [vmem:[%s8386_s9 + $0x2f0] sm:$0xff]  ;;  %v1944_v9 = vld [vmem:[%s8386_s9 + $0x2a8] sm:$0xff] }
 0x3c2   :  { %v4128_v16 = vpop.f32.mrf.mxu0  ;;  %2099 = vmatprep.mubr.f32.mxu0 %v4358_v48  ;;  %2212 = vmatprep.mubr.f32.mxu1 %v4358_v48  ;;  %v4183_v49 = vadd.f32 %v4182_v25, %v4181_v59  ;;  %v1952_v59 = vld [vmem:[%s8386_s9 + $0x2e8] sm:$0xff]  ;;  %v1631_v13 = vadd.f32 %v4077_v52, %v1526_v23  ;;  %v1935_v52 = vld [vmem:[%s8386_s9 + $0x260] sm:$0xff] }
 0x3c3   :  { %v4184_v37 = vpop.f32.mrf.mxu1  ;;  %3884 = vst [vmem:[%s8398_s21 + $0x8] sm:$0xff] %v6607_v15  ;;  %v1726_v32 = vadd.f32 %v4127_v31, %v1621_v61  ;;  %2258 = vmatpush1.msra.mxu0 %v1975_v28  ;;  %2371 = vmatpush1.msra.mxu1 %v1977_v29  ;;  %v1636_v29 = vadd.f32 %v4080_v57, %v1531_v6  ;;  %v1920_v6 = vld [vmem:[%s8386_s9 + $0x1e8] sm:$0xff]  ;;  %v1922_v57 = vld [vmem:[%s8386_s9 + $0x1f8] sm:$0xff] }
 0x3c4   :  { %2100 = vmatmul.mubr.f32.gmra.mxu0 %v6607_v15  ;;  %2213 = vmatmul.mubr.f32.gmra.mxu1 %v6607_v15  ;;  %v4129_v35 = vpop.f32.mrf.mxu0  ;;  %v1536_v26 = vadd.f32 %v4027_v63, %v6571_v22  ;;  %v4083_v31 = vadd.f32 %v6562_v10, %v6558_v8  ;;  %v1936_v10 = vld [vmem:[%s8386_s9 + $0x268] sm:$0xff] }
 0x3c5   :  { %v4185_v38 = vpop.f32.mrf.mxu1  ;;  %v6640_v1 = vadd.f32 %v4183_v49, %v1726_v32  ;;  %2259 = vmatprep.subr.mxu0 %v1968_v0  ;;  %2372 = vmatprep.subr.mxu1 %v1970_v33  ;;  %v4130_v2 = vadd.f32 %v4129_v35, %v4128_v16  ;;  %v1943_v16 = vld [vmem:[%s8386_s9 + $0x2a0] sm:$0xff]  ;;  %v4030_v32 = vadd.f32 %v6573_v24, %v6564_v17 }
 0x3c6   :  { %2260 = vmatpush1.msra.mxu0 %v1967_v45  ;;  %2373 = vmatpush1.msra.mxu1 %v1969_v47  ;;  %v4131_v3 = vpop.f32.mrf.mxu0  ;;  %v4186_v56 = vadd.f32 %v4185_v38, %v4184_v37  ;;  %v1945_v37 = vld [vmem:[%s8386_s9 + $0x2b0] sm:$0xff]  ;;  %v1938_v45 = vld [vmem:[%s8386_s9 + $0x278] sm:$0xff]  ;;  %v1641_v35 = vadd.f32 %v4083_v31, %v1536_v26  ;;  %v4086_v38 = vadd.f32 %v6575_v30, %v6566_v20  ;;  %v1927_v30 = vld [vmem:[%s8386_s9 + $0x220] sm:$0xff] }
 0x3c7   :  { %v4187_v5 = vpop.f32.mrf.mxu1  ;;  %3885 = vst [vmem:[%s8398_s21 + $0x10] sm:$0xff] %v6640_v1  ;;  %v1731_v53 = vadd.f32 %v4130_v2, %v1626_v46  ;;  %2261 = vmatprep.subr.mxu0 %v1960_v39  ;;  %2374 = vmatprep.subr.mxu1 %v1962_v41  ;;  %v1928_v39 = vld [vmem:[%s8386_s9 + $0x228] sm:$0xff]  ;;  %v1930_v41 = vld [vmem:[%s8386_s9 + $0x238] sm:$0xff]  ;;  %v1903_v26 = vld [vmem:[%s8386_s9 + $0x160] sm:$0xff] }
 0x3c8   :  { %2105 = vmatprep.mubr.f32.mxu0 %v4358_v48  ;;  %2218 = vmatprep.mubr.f32.mxu1 %v4358_v48  ;;  %v4132_v60 = vpop.f32.mrf.mxu0  ;;  %v1905_v31 = vld [vmem:[%s8386_s9 + $0x170] sm:$0xff] }
 0x3c9   :  { %v4188_v36 = vpop.f32.mrf.mxu1  ;;  %v6665_v61 = vadd.f32 %v4186_v56, %v1731_v53  ;;  %2262 = vmatpush1.msra.mxu0 %v1959_v54  ;;  %2375 = vmatpush1.msra.mxu1 %v1961_v58  ;;  %v4133_v4 = vadd.f32 %v4132_v60, %v4131_v3  ;;  %v1541_v3 = vadd.f32 %v4030_v32, %v6571_v22  ;;  %v1929_v54 = vld [vmem:[%s8386_s9 + $0x230] sm:$0xff]  ;;  %v1888_v32 = vld [vmem:[%s8386_s9 + $0xe8] sm:$0xff] }
 0x3ca   :  { %2106 = vmatmul.mubr.f32.gmra.mxu0 %v6640_v1  ;;  %2219 = vmatmul.mubr.f32.gmra.mxu1 %v6640_v1  ;;  %v4134_v21 = vpop.f32.mrf.mxu0  ;;  %v4189_v28 = vadd.f32 %v4188_v36, %v4187_v5  ;;  %v1919_v36 = vld [vmem:[%s8386_s9 + $0x1e0] sm:$0xff] }
 0x3cb   :  { %v4190_v51 = vpop.f32.mrf.mxu1  ;;  %3886 = vst [vmem:[%s8398_s21 + $0x18] sm:$0xff] %v6665_v61  ;;  %2263 = vmatprep.subr.mxu0 %v1952_v59  ;;  %2376 = vmatprep.subr.mxu1 %v1954_v27  ;;  %v1736_v25 = vadd.f32 %v4133_v4, %v1631_v13  ;;  %v1646_v27 = vadd.f32 %v4086_v38, %v1541_v3  ;;  %v1921_v13 = vld [vmem:[%s8386_s9 + $0x1f0] sm:$0xff]  ;;  %v2576_v3 = vld [vmem:[%s8388_s11 + $0xf8] sm:$0xff] }
 0x3cc   :  { %2264 = vmatpush1.msra.mxu0 %v1951_v44  ;;  %2377 = vmatpush1.msra.mxu1 %v1953_v7  ;;  %v4135_v0 = vpop.f32.mrf.mxu0  ;;  %v1912_v44 = vld [vmem:[%s8386_s9 + $0x1a8] sm:$0xff]  ;;  %v1914_v7 = vld [vmem:[%s8386_s9 + $0x1b8] sm:$0xff]  ;;  %v1873_v38 = vld [vmem:[%s8386_s9 + $0x70] sm:$0xff] }
 0x3cd   :  { %v4191_v33 = vpop.f32.mrf.mxu1  ;;  %v6696_v49 = vadd.f32 %v4189_v28, %v1736_v25  ;;  %2265 = vmatprep.subr.mxu0 %v1944_v9  ;;  %2378 = vmatprep.subr.mxu1 %v1946_v62  ;;  %v4136_v8 = vadd.f32 %v4135_v0, %v4134_v21  ;;  %v1911_v21 = vld [vmem:[%s8386_s9 + $0x1a0] sm:$0xff]  ;;  %v1904_v28 = vld [vmem:[%s8386_s9 + $0x168] sm:$0xff] }
 0x3ce   :  { %2111 = vmatprep.mubr.f32.mxu0 %v4358_v48  ;;  %2224 = vmatprep.mubr.f32.mxu1 %v4358_v48  ;;  %v4137_v47 = vpop.f32.mrf.mxu0  ;;  %v4192_v24 = vadd.f32 %v4191_v33, %v4190_v51  ;;  %v1913_v51 = vld [vmem:[%s8386_s9 + $0x1b0] sm:$0xff]  ;;  %v1895_v0 = vld [vmem:[%s8386_s9 + $0x120] sm:$0xff] }
 0x3cf   :  { %v4193_v46 = vpop.f32.mrf.mxu1  ;;  %3887 = vst [vmem:[%s8398_s21 + $0x20] sm:$0xff] %v6696_v49  ;;  %2266 = vmatpush1.msra.mxu0 %v1943_v16  ;;  %2379 = vmatpush1.msra.mxu1 %v1945_v37  ;;  %v1741_v17 = vadd.f32 %v4136_v8, %v1636_v29  ;;  %v1906_v29 = vld [vmem:[%s8386_s9 + $0x178] sm:$0xff]  ;;  %v1896_v16 = vld [vmem:[%s8386_s9 + $0x128] sm:$0xff]  ;;  %v1897_v33 = vld [vmem:[%s8386_s9 + $0x130] sm:$0xff] }
 0x3d0   :  { %2112 = vmatmul.mubr.f32.gmra.mxu0 %v6665_v61  ;;  %2225 = vmatmul.mubr.f32.gmra.mxu1 %v6665_v61  ;;  %v4138_v23 = vpop.f32.mrf.mxu0  ;;  %v1898_v37 = vld [vmem:[%s8386_s9 + $0x138] sm:$0xff] }
 0x3d1   :  { %v4194_v2 = vpop.f32.mrf.mxu1  ;;  %2267 = vmatprep.subr.mxu0 %v1936_v10  ;;  %2380 = vmatprep.subr.mxu1 %v1938_v45  ;;  %v6727_v5 = vadd.f32 %v4192_v24, %v1741_v17  ;;  %v4139_v20 = vadd.f32 %v4138_v23, %v4137_v47  ;;  %v1890_v8 = vld [vmem:[%s8386_s9 + $0xf8] sm:$0xff]  ;;  %v1887_v10 = vld [vmem:[%s8386_s9 + $0xe0] sm:$0xff]  ;;  %v1889_v45 = vld [vmem:[%s8386_s9 + $0xf0] sm:$0xff] }
 0x3d2   :  { %2268 = vmatpush1.msra.mxu0 %v1935_v52  ;;  %2381 = vmatpush1.msra.mxu1 %v1937_v34  ;;  %v4140_v58 = vpop.f32.mrf.mxu0  ;;  %v4195_v56 = vadd.f32 %v4194_v2, %v4193_v46  ;;  %v1880_v47 = vld [vmem:[%s8386_s9 + $0xa8] sm:$0xff]  ;;  %v1882_v46 = vld [vmem:[%s8386_s9 + $0xb8] sm:$0xff]  ;;  %v1879_v17 = vld [vmem:[%s8386_s9 + $0xa0] sm:$0xff] }
 0x3d3   :  { %v4196_v53 = vpop.f32.mrf.mxu1  ;;  %3888 = vst [vmem:[%s8398_s21 + $0x28] sm:$0xff] %v6727_v5  ;;  %2269 = vmatprep.subr.mxu0 %v1928_v39  ;;  %2382 = vmatprep.subr.mxu1 %v1930_v41  ;;  %v1746_v22 = vadd.f32 %v4139_v20, %v1641_v35  ;;  %v1881_v24 = vld [vmem:[%s8386_s9 + $0xb0] sm:$0xff]  ;;  %v1872_v52 = vld [vmem:[%s8386_s9 + $0x68] sm:$0xff]  ;;  %v1874_v34 = vld [vmem:[%s8386_s9 + $0x78] sm:$0xff] }
 0x3d4   :  { %2117 = vmatprep.mubr.f32.mxu0 %v4358_v48  ;;  %2230 = vmatprep.mubr.f32.mxu1 %v4358_v48  ;;  %v4141_v63 = vpop.f32.mrf.mxu0  ;;  %v1871_v35 = vld [vmem:[%s8386_s9 + $0x60] sm:$0xff]  ;;  %v1864_v39 = vld [vmem:[%s8386_s9 + $0x28] sm:$0xff]  ;;  %v1866_v41 = vld [vmem:[%s8386_s9 + $0x38] sm:$0xff] }
 0x3d5   :  { %v4197_v59 = vpop.f32.mrf.mxu1  ;;  %2270 = vmatpush1.msra.mxu0 %v1927_v30  ;;  %2383 = vmatpush1.msra.mxu1 %v1929_v54  ;;  %v6747_v60 = vadd.f32 %v4195_v56, %v1746_v22  ;;  %v4142_v4 = vadd.f32 %v4141_v63, %v4140_v58  ;;  %v1863_v23 = vld [vmem:[%s8386_s9 + $0x20] sm:$0xff]  ;;  %v1865_v2 = vld [vmem:[%s8386_s9 + $0x30] sm:$0xff]  ;;  %v2640_v20 = vld [vmem:[%s8388_s11 + $0x2f8] sm:$0xff] }
 0x3d6   :  { %2118 = vmatmul.mubr.f32.gmra.mxu0 %v6696_v49  ;;  %2231 = vmatmul.mubr.f32.gmra.mxu1 %v6696_v49  ;;  %v4198_v62 = vadd.f32 %v4197_v59, %v4196_v53  ;;  %v2575_v30 = vld [vmem:[%s8388_s11 + $0xf0] sm:$0xff]  ;;  %v2638_v58 = vld [vmem:[%s8388_s11 + $0x2e8] sm:$0xff]  ;;  %v2573_v53 = vld [vmem:[%s8388_s11 + $0xe0] sm:$0xff] }
 0x3d7   :  { %2271 = vmatprep.subr.mxu0 %v1920_v6  ;;  %2384 = vmatprep.subr.mxu1 %v1922_v57  ;;  %3889 = vst [vmem:[%s8398_s21 + $0x30] sm:$0xff] %v6747_v60  ;;  %v1751_v9 = vadd.f32 %v4142_v4, %v1646_v27  ;;  %v2639_v54 = vld [vmem:[%s8388_s11 + $0x2f0] sm:$0xff]  ;;  %v2637_v22 = vld [vmem:[%s8388_s11 + $0x2e0] sm:$0xff]  ;;  %v2636_v56 = vld [vmem:[%s8388_s11 + $0x2d8] sm:$0xff] }
 0x3d8   :  { %2272 = vmatpush1.msra.mxu0 %v1919_v36  ;;  %2385 = vmatpush1.msra.mxu1 %v1921_v13  ;;  %v2571_v6 = vld [vmem:[%s8388_s11 + $0xd0] sm:$0xff]  ;;  %v2634_v63 = vld [vmem:[%s8388_s11 + $0x2c8] sm:$0xff]  ;;  %v2569_v59 = vld [vmem:[%s8388_s11 + $0xc0] sm:$0xff] }
 0x3d9   :  { %2273 = vmatprep.subr.mxu0 %v1912_v44  ;;  %2386 = vmatprep.subr.mxu1 %v1914_v7  ;;  %v6773_v25 = vadd.f32 %v4198_v62, %v1751_v9  ;;  %v2635_v57 = vld [vmem:[%s8388_s11 + $0x2d0] sm:$0xff]  ;;  %v2633_v27 = vld [vmem:[%s8388_s11 + $0x2c0] sm:$0xff]  ;;  %v2632_v36 = vld [vmem:[%s8388_s11 + $0x2b8] sm:$0xff] }
 0x3da   :  { %2123 = vmatprep.mubr.f32.mxu0 %v4358_v48  ;;  %2236 = vmatprep.mubr.f32.mxu1 %v4358_v48  ;;  %v2567_v13 = vld [vmem:[%s8388_s11 + $0xb0] sm:$0xff]  ;;  %v2630_v44 = vld [vmem:[%s8388_s11 + $0x2a8] sm:$0xff]  ;;  %v2565_v7 = vld [vmem:[%s8388_s11 + $0xa0] sm:$0xff] }
 0x3db   :  { %2274 = vmatpush1.msra.mxu0 %v1911_v21  ;;  %2387 = vmatpush1.msra.mxu1 %v1913_v51  ;;  %3890 = vst [vmem:[%s8398_s21 + $0x38] sm:$0xff] %v6773_v25  ;;  %v2631_v4 = vld [vmem:[%s8388_s11 + $0x2b0] sm:$0xff]  ;;  %v2629_v9 = vld [vmem:[%s8388_s11 + $0x2a0] sm:$0xff]  ;;  %v2628_v62 = vld [vmem:[%s8388_s11 + $0x298] sm:$0xff] }
 0x3dc   :  { %2124 = vmatmul.mubr.f32.gmra.mxu0 %v6727_v5  ;;  %2237 = vmatmul.mubr.f32.gmra.mxu1 %v6727_v5  ;;  %v2563_v21 = vld [vmem:[%s8388_s11 + $0x90] sm:$0xff] }
 0x3dd   :  { %2275 = vmatprep.subr.mxu0 %v1904_v28  ;;  %2388 = vmatprep.subr.mxu1 %v1906_v29  ;;  %v2627_v51 = vld [vmem:[%s8388_s11 + $0x290] sm:$0xff]  ;;  %v2562_v28 = vld [vmem:[%s8388_s11 + $0x88] sm:$0xff]  ;;  %v2561_v29 = vld [vmem:[%s8388_s11 + $0x80] sm:$0xff] }
 0x3de   :  { %2276 = vmatpush1.msra.mxu0 %v1903_v26  ;;  %2389 = vmatpush1.msra.mxu1 %v1905_v31  ;;  %v2560_v26 = vld [vmem:[%s8388_s11 + $0x78] sm:$0xff] }
 0x3df   :  { %2277 = vmatprep.subr.mxu0 %v1896_v16  ;;  %2390 = vmatprep.subr.mxu1 %v1898_v37  ;;  %v2624_v31 = vld [vmem:[%s8388_s11 + $0x278] sm:$0xff]  ;;  %v2559_v16 = vld [vmem:[%s8388_s11 + $0x70] sm:$0xff] }
 0x3e0   :  { %2129 = vmatprep.mubr.f32.mxu0 %v4358_v48  ;;  %2242 = vmatprep.mubr.f32.mxu1 %v4358_v48  ;;  %v2623_v37 = vld [vmem:[%s8388_s11 + $0x270] sm:$0xff] }
 0x3e1   :  { %2278 = vmatpush1.msra.mxu0 %v1895_v0  ;;  %2391 = vmatpush1.msra.mxu1 %v1897_v33  ;;  %v2622_v0 = vld [vmem:[%s8388_s11 + $0x268] sm:$0xff]  ;;  %v2557_v33 = vld [vmem:[%s8388_s11 + $0x60] sm:$0xff] }
 0x3e2   :  { %2130 = vmatmul.mubr.f32.gmra.mxu0 %v6747_v60  ;;  %2243 = vmatmul.mubr.f32.gmra.mxu1 %v6747_v60 }
 0x3e3   :  { %2279 = vmatprep.subr.mxu0 %v1888_v32  ;;  %2392 = vmatprep.subr.mxu1 %v1890_v8  ;;  %v2621_v32 = vld [vmem:[%s8388_s11 + $0x260] sm:$0xff]  ;;  %v2556_v8 = vld [vmem:[%s8388_s11 + $0x58] sm:$0xff] }
 0x3e4   :  { %2280 = vmatpush1.msra.mxu0 %v1887_v10  ;;  %2393 = vmatpush1.msra.mxu1 %v1889_v45  ;;  %v2620_v10 = vld [vmem:[%s8388_s11 + $0x258] sm:$0xff]  ;;  %v2555_v45 = vld [vmem:[%s8388_s11 + $0x50] sm:$0xff] }
 0x3e5   :  { %2281 = vmatprep.subr.mxu0 %v1880_v47  ;;  %2394 = vmatprep.subr.mxu1 %v1882_v46  ;;  %v2619_v47 = vld [vmem:[%s8388_s11 + $0x250] sm:$0xff]  ;;  %v2554_v46 = vld [vmem:[%s8388_s11 + $0x48] sm:$0xff] }
 0x3e6   :  { %2135 = vmatprep.mubr.f32.mxu0 %v4358_v48  ;;  %2248 = vmatprep.mubr.f32.mxu1 %v4358_v48 }
 0x3e7   :  { %2282 = vmatpush1.msra.mxu0 %v1879_v17  ;;  %2395 = vmatpush1.msra.mxu1 %v1881_v24  ;;  %v2618_v17 = vld [vmem:[%s8388_s11 + $0x248] sm:$0xff]  ;;  %v2553_v24 = vld [vmem:[%s8388_s11 + $0x40] sm:$0xff] }
 0x3e8   :  { %2136 = vmatmul.mubr.f32.gmra.mxu0 %v6773_v25  ;;  %2249 = vmatmul.mubr.f32.gmra.mxu1 %v6773_v25 }
 0x3e9   :  { %2283 = vmatprep.subr.mxu0 %v1872_v52  ;;  %2396 = vmatprep.subr.mxu1 %v1874_v34  ;;  %v2617_v52 = vld [vmem:[%s8388_s11 + $0x240] sm:$0xff]  ;;  %v2552_v34 = vld [vmem:[%s8388_s11 + $0x38] sm:$0xff] }
 0x3ea   :  { %2284 = vmatpush1.msra.mxu0 %v1871_v35  ;;  %2397 = vmatpush1.msra.mxu1 %v1873_v38  ;;  %v2616_v35 = vld [vmem:[%s8388_s11 + $0x238] sm:$0xff]  ;;  %v2551_v38 = vld [vmem:[%s8388_s11 + $0x30] sm:$0xff] }
 0x3eb   :  { %2285 = vmatprep.subr.mxu0 %v1864_v39  ;;  %2398 = vmatprep.subr.mxu1 %v1866_v41  ;;  %v2615_v39 = vld [vmem:[%s8388_s11 + $0x230] sm:$0xff]  ;;  %v2550_v41 = vld [vmem:[%s8388_s11 + $0x28] sm:$0xff] }
 0x3ec   :  { %2286 = vmatpush1.msra.mxu0 %v1863_v23  ;;  %2319 = vmatprep.mubr.f32.mxu0 %v4358_v48  ;;  %v2614_v23 = vld [vmem:[%s8388_s11 + $0x228] sm:$0xff] }
 0x3ed   :  { %2399 = vmatpush1.msra.mxu1 %v1865_v2  ;;  %2432 = vmatprep.mubr.f32.mxu1 %v4358_v48  ;;  %v2549_v2 = vld [vmem:[%s8388_s11 + $0x20] sm:$0xff] }
 0x3ee   :  { %2320 = vmatmul.mubr.f32.vlgmr.msra.gmra.mxu0 %v6580_v55  ;;  %2433 = vmatmul.mubr.f32.vlgmr.msra.gmra.mxu1 %v6580_v55  ;;  %v2574_v55 = vld [vmem:[%s8388_s11 + $0xe8] sm:$0xff] }
 0x3ef   :  { %2325 = vmatprep.mubr.f32.mxu0 %v4358_v48  ;;  %2438 = vmatprep.mubr.f32.mxu1 %v4358_v48 }
 0x3f0   :  { %2813 = vmatprep.subr.mxu0 %v2576_v3  ;;  %2926 = vmatprep.subr.mxu1 %v2640_v20  ;;  %v2613_v3 = vld [vmem:[%s8388_s11 + $0x220] sm:$0xff]  ;;  %v2548_v20 = vld [vmem:[%s8388_s11 + $0x18] sm:$0xff] }
 0x3f1   :  { %2814 = vmatpush1.msra.mxu0 %v2575_v30  ;;  %2927 = vmatpush1.msra.mxu1 %v2639_v54  ;;  %v2612_v30 = vld [vmem:[%s8388_s11 + $0x218] sm:$0xff]  ;;  %v2547_v54 = vld [vmem:[%s8388_s11 + $0x10] sm:$0xff] }
 0x3f2   :  { %2326 = vmatmul.mubr.f32.gmra.mxu0 %v6607_v15  ;;  %2439 = vmatmul.mubr.f32.gmra.mxu1 %v6607_v15  ;;  %v2572_v15 = vld [vmem:[%s8388_s11 + $0xd8] sm:$0xff] }
 0x3f3   :  { %2331 = vmatprep.mubr.f32.mxu0 %v4358_v48  ;;  %2444 = vmatprep.mubr.f32.mxu1 %v4358_v48 }
 0x3f4   :  { %2815 = vmatprep.subr.mxu0 %v2574_v55  ;;  %2928 = vmatprep.subr.mxu1 %v2638_v58  ;;  %v2611_v55 = vld [vmem:[%s8388_s11 + $0x210] sm:$0xff]  ;;  %v2546_v58 = vld [vmem:[%s8388_s11 + $0x8] sm:$0xff] }
 0x3f5   :  { %2816 = vmatpush1.msra.mxu0 %v2573_v53  ;;  %2929 = vmatpush1.msra.mxu1 %v2637_v22  ;;  %v2610_v53 = vld [vmem:[%s8388_s11 + $0x208] sm:$0xff]  ;;  %v2545_v22 = vld [vmem:[%s8388_s11] sm:$0xff] }
 0x3f6   :  { %2332 = vmatmul.mubr.f32.gmra.mxu0 %v6640_v1  ;;  %2445 = vmatmul.mubr.f32.gmra.mxu1 %v6640_v1  ;;  %v2570_v1 = vld [vmem:[%s8388_s11 + $0xc8] sm:$0xff] }
 0x3f7   :  { %2337 = vmatprep.mubr.f32.mxu0 %v4358_v48  ;;  %2450 = vmatprep.mubr.f32.mxu1 %v4358_v48 }
 0x3f8   :  { %2817 = vmatprep.subr.mxu0 %v2572_v15  ;;  %2930 = vmatprep.subr.mxu1 %v2636_v56  ;;  %v2609_v15 = vld [vmem:[%s8388_s11 + $0x200] sm:$0xff]  ;;  %v2608_v56 = vld [vmem:[%s8388_s11 + $0x1f8] sm:$0xff] }
 0x3f9   :  { %2818 = vmatpush1.msra.mxu0 %v2571_v6  ;;  %2931 = vmatpush1.msra.mxu1 %v2635_v57  ;;  %v2672_v6 = vld [vmem:[%s8388_s11 + $0x3f8] sm:$0xff]  ;;  %v2607_v57 = vld [vmem:[%s8388_s11 + $0x1f0] sm:$0xff] }
 0x3fa   :  { %2338 = vmatmul.mubr.f32.gmra.mxu0 %v6665_v61  ;;  %2451 = vmatmul.mubr.f32.gmra.mxu1 %v6665_v61  ;;  %v2568_v61 = vld [vmem:[%s8388_s11 + $0xb8] sm:$0xff] }
 0x3fb   :  { %2343 = vmatprep.mubr.f32.mxu0 %v4358_v48  ;;  %2456 = vmatprep.mubr.f32.mxu1 %v4358_v48 }
 0x3fc   :  { %2819 = vmatprep.subr.mxu0 %v2570_v1  ;;  %2932 = vmatprep.subr.mxu1 %v2634_v63  ;;  %v2671_v1 = vld [vmem:[%s8388_s11 + $0x3f0] sm:$0xff]  ;;  %v2606_v63 = vld [vmem:[%s8388_s11 + $0x1e8] sm:$0xff] }
 0x3fd   :  { %2820 = vmatpush1.msra.mxu0 %v2569_v59  ;;  %2933 = vmatpush1.msra.mxu1 %v2633_v27  ;;  %v2670_v59 = vld [vmem:[%s8388_s11 + $0x3e8] sm:$0xff]  ;;  %v2605_v27 = vld [vmem:[%s8388_s11 + $0x1e0] sm:$0xff] }
 0x3fe   :  { %2344 = vmatmul.mubr.f32.gmra.mxu0 %v6696_v49  ;;  %2457 = vmatmul.mubr.f32.gmra.mxu1 %v6696_v49  ;;  %v2566_v49 = vld [vmem:[%s8388_s11 + $0xa8] sm:$0xff] }
 0x3ff   :  { %2349 = vmatprep.mubr.f32.mxu0 %v4358_v48  ;;  %2462 = vmatprep.mubr.f32.mxu1 %v4358_v48 }
 0x400   :  { %2821 = vmatprep.subr.mxu0 %v2568_v61  ;;  %2934 = vmatprep.subr.mxu1 %v2632_v36  ;;  %v2669_v61 = vld [vmem:[%s8388_s11 + $0x3e0] sm:$0xff]  ;;  %v2604_v36 = vld [vmem:[%s8388_s11 + $0x1d8] sm:$0xff] }
 0x401   :  { %2822 = vmatpush1.msra.mxu0 %v2567_v13  ;;  %2935 = vmatpush1.msra.mxu1 %v2631_v4  ;;  %v2668_v13 = vld [vmem:[%s8388_s11 + $0x3d8] sm:$0xff]  ;;  %v2603_v4 = vld [vmem:[%s8388_s11 + $0x1d0] sm:$0xff] }
 0x402   :  { %2350 = vmatmul.mubr.f32.gmra.mxu0 %v6727_v5  ;;  %2463 = vmatmul.mubr.f32.gmra.mxu1 %v6727_v5  ;;  %v2564_v5 = vld [vmem:[%s8388_s11 + $0x98] sm:$0xff] }
 0x403   :  { %2355 = vmatprep.mubr.f32.mxu0 %v4358_v48  ;;  %2468 = vmatprep.mubr.f32.mxu1 %v4358_v48 }
 0x404   :  { %2823 = vmatprep.subr.mxu0 %v2566_v49  ;;  %2936 = vmatprep.subr.mxu1 %v2630_v44  ;;  %v2667_v49 = vld [vmem:[%s8388_s11 + $0x3d0] sm:$0xff]  ;;  %v2602_v44 = vld [vmem:[%s8388_s11 + $0x1c8] sm:$0xff] }
 0x405   :  { %2824 = vmatpush1.msra.mxu0 %v2565_v7  ;;  %2937 = vmatpush1.msra.mxu1 %v2629_v9  ;;  %v2666_v7 = vld [vmem:[%s8388_s11 + $0x3c8] sm:$0xff]  ;;  %v2601_v9 = vld [vmem:[%s8388_s11 + $0x1c0] sm:$0xff] }
 0x406   :  { %2356 = vmatmul.mubr.f32.gmra.mxu0 %v6747_v60  ;;  %2469 = vmatmul.mubr.f32.gmra.mxu1 %v6747_v60  ;;  %v2626_v60 = vld [vmem:[%s8388_s11 + $0x288] sm:$0xff] }
 0x407   :  { %2361 = vmatprep.mubr.f32.mxu0 %v4358_v48  ;;  %2474 = vmatprep.mubr.f32.mxu1 %v4358_v48  ;;  %v2625_v48 = vld [vmem:[%s8388_s11 + $0x280] sm:$0xff] }
 0x408   :  { %2825 = vmatprep.subr.mxu0 %v2564_v5  ;;  %2938 = vmatprep.subr.mxu1 %v2628_v62  ;;  %v2665_v5 = vld [vmem:[%s8388_s11 + $0x3c0] sm:$0xff]  ;;  %v2600_v62 = vld [vmem:[%s8388_s11 + $0x1b8] sm:$0xff] }
 0x409   :  { %2826 = vmatpush1.msra.mxu0 %v2563_v21  ;;  %2939 = vmatpush1.msra.mxu1 %v2627_v51  ;;  %v2664_v21 = vld [vmem:[%s8388_s11 + $0x3b8] sm:$0xff]  ;;  %v2599_v51 = vld [vmem:[%s8388_s11 + $0x1b0] sm:$0xff] }
 0x40a   :  { %2362 = vmatmul.mubr.f32.gmra.mxu0 %v6773_v25  ;;  %2475 = vmatmul.mubr.f32.gmra.mxu1 %v6773_v25  ;;  %v2558_v25 = vld [vmem:[%s8388_s11 + $0x68] sm:$0xff] }
 0x40b   :  { %2827 = vmatprep.subr.mxu0 %v2562_v28  ;;  %2940 = vmatprep.subr.mxu1 %v2626_v60  ;;  %v2663_v28 = vld [vmem:[%s8388_s11 + $0x3b0] sm:$0xff]  ;;  %v2598_v60 = vld [vmem:[%s8388_s11 + $0x1a8] sm:$0xff] }
 0x40c   :  { %2828 = vmatpush1.msra.mxu0 %v2561_v29  ;;  %2941 = vmatpush1.msra.mxu1 %v2625_v48  ;;  %v2662_v29 = vld [vmem:[%s8388_s11 + $0x3a8] sm:$0xff]  ;;  %v2597_v48 = vld [vmem:[%s8388_s11 + $0x1a0] sm:$0xff] }
 0x40d   :  { %2829 = vmatprep.subr.mxu0 %v2560_v26  ;;  %2942 = vmatprep.subr.mxu1 %v2624_v31  ;;  %v2661_v26 = vld [vmem:[%s8388_s11 + $0x3a0] sm:$0xff]  ;;  %v2596_v31 = vld [vmem:[%s8388_s11 + $0x198] sm:$0xff] }
 0x40e   :  { %2830 = vmatpush1.msra.mxu0 %v2559_v16  ;;  %2943 = vmatpush1.msra.mxu1 %v2623_v37  ;;  %v2660_v16 = vld [vmem:[%s8388_s11 + $0x398] sm:$0xff]  ;;  %v2595_v37 = vld [vmem:[%s8388_s11 + $0x190] sm:$0xff] }
 0x40f   :  { %2831 = vmatprep.subr.mxu0 %v2558_v25  ;;  %2944 = vmatprep.subr.mxu1 %v2622_v0  ;;  %v2659_v25 = vld [vmem:[%s8388_s11 + $0x390] sm:$0xff]  ;;  %v2594_v0 = vld [vmem:[%s8388_s11 + $0x188] sm:$0xff] }
 0x410   :  { %2832 = vmatpush1.msra.mxu0 %v2557_v33  ;;  %2945 = vmatpush1.msra.mxu1 %v2621_v32  ;;  %v2658_v33 = vld [vmem:[%s8388_s11 + $0x388] sm:$0xff]  ;;  %v2593_v32 = vld [vmem:[%s8388_s11 + $0x180] sm:$0xff] }
 0x411   :  { %2833 = vmatprep.subr.mxu0 %v2556_v8  ;;  %2946 = vmatprep.subr.mxu1 %v2620_v10  ;;  %v2657_v8 = vld [vmem:[%s8388_s11 + $0x380] sm:$0xff]  ;;  %v2592_v10 = vld [vmem:[%s8388_s11 + $0x178] sm:$0xff] }
 0x412   :  { %2834 = vmatpush1.msra.mxu0 %v2555_v45  ;;  %2947 = vmatpush1.msra.mxu1 %v2619_v47  ;;  %v2656_v45 = vld [vmem:[%s8388_s11 + $0x378] sm:$0xff]  ;;  %v2591_v47 = vld [vmem:[%s8388_s11 + $0x170] sm:$0xff] }
 0x413   :  { %2835 = vmatprep.subr.mxu0 %v2554_v46  ;;  %2948 = vmatprep.subr.mxu1 %v2618_v17  ;;  %v2655_v46 = vld [vmem:[%s8388_s11 + $0x370] sm:$0xff]  ;;  %v2590_v17 = vld [vmem:[%s8388_s11 + $0x168] sm:$0xff] }
 0x414   :  { %2836 = vmatpush1.msra.mxu0 %v2553_v24  ;;  %2949 = vmatpush1.msra.mxu1 %v2617_v52  ;;  %v2654_v24 = vld [vmem:[%s8388_s11 + $0x368] sm:$0xff]  ;;  %v2589_v52 = vld [vmem:[%s8388_s11 + $0x160] sm:$0xff] }
 0x415   :  { %2837 = vmatprep.subr.mxu0 %v2552_v34  ;;  %2950 = vmatprep.subr.mxu1 %v2616_v35  ;;  %v2653_v34 = vld [vmem:[%s8388_s11 + $0x360] sm:$0xff]  ;;  %v2588_v35 = vld [vmem:[%s8388_s11 + $0x158] sm:$0xff] }
 0x416   :  { %2838 = vmatpush1.msra.mxu0 %v2551_v38  ;;  %2951 = vmatpush1.msra.mxu1 %v2615_v39  ;;  %v2652_v38 = vld [vmem:[%s8388_s11 + $0x358] sm:$0xff]  ;;  %v2587_v39 = vld [vmem:[%s8388_s11 + $0x150] sm:$0xff] }
 0x417   :  { %2839 = vmatprep.subr.mxu0 %v2550_v41  ;;  %2952 = vmatprep.subr.mxu1 %v2614_v23  ;;  %v2651_v41 = vld [vmem:[%s8388_s11 + $0x350] sm:$0xff]  ;;  %v2586_v23 = vld [vmem:[%s8388_s11 + $0x148] sm:$0xff] }
 0x418   :  { %2840 = vmatpush1.msra.mxu0 %v2549_v2  ;;  %2953 = vmatpush1.msra.mxu1 %v2613_v3  ;;  %v2650_v2 = vld [vmem:[%s8388_s11 + $0x348] sm:$0xff]  ;;  %v2585_v3 = vld [vmem:[%s8388_s11 + $0x140] sm:$0xff] }
 0x419   :  { %2841 = vmatprep.subr.mxu0 %v2548_v20  ;;  %2954 = vmatprep.subr.mxu1 %v2612_v30  ;;  %v2649_v20 = vld [vmem:[%s8388_s11 + $0x340] sm:$0xff]  ;;  %v2584_v30 = vld [vmem:[%s8388_s11 + $0x138] sm:$0xff] }
 0x41a   :  { %2842 = vmatpush1.msra.mxu0 %v2547_v54  ;;  %2955 = vmatpush1.msra.mxu1 %v2611_v55  ;;  %v2648_v54 = vld [vmem:[%s8388_s11 + $0x338] sm:$0xff]  ;;  %v2583_v55 = vld [vmem:[%s8388_s11 + $0x130] sm:$0xff] }
 0x41b   :  { %2843 = vmatprep.subr.mxu0 %v2546_v58  ;;  %2956 = vmatprep.subr.mxu1 %v2610_v53  ;;  %v2647_v58 = vld [vmem:[%s8388_s11 + $0x330] sm:$0xff]  ;;  %v2582_v53 = vld [vmem:[%s8388_s11 + $0x128] sm:$0xff] }
 0x41c   :  { %2844 = vmatpush1.msra.mxu0 %v2545_v22  ;;  %2957 = vmatpush1.msra.mxu1 %v2609_v15  ;;  %v2646_v22 = vld [vmem:[%s8388_s11 + $0x328] sm:$0xff]  ;;  %v2581_v15 = vld [vmem:[%s8388_s11 + $0x120] sm:$0xff] }
 0x41d   :  { %2845 = vmatprep.subr.mxu0 %v2608_v56  ;;  %2958 = vmatprep.subr.mxu1 %v2672_v6  ;;  %v2645_v56 = vld [vmem:[%s8388_s11 + $0x320] sm:$0xff]  ;;  %v2580_v6 = vld [vmem:[%s8388_s11 + $0x118] sm:$0xff] }
 0x41e   :  { %2846 = vmatpush2.msra.mxu0 %v2607_v57  ;;  %2959 = vmatpush2.msra.mxu1 %v2671_v1  ;;  %v2644_v57 = vld [vmem:[%s8388_s11 + $0x318] sm:$0xff]  ;;  %v2579_v1 = vld [vmem:[%s8388_s11 + $0x110] sm:$0xff] }
 0x41f   :  { %2847 = vmatprep.subr.mxu0 %v2606_v63  ;;  %2960 = vmatprep.subr.mxu1 %v2670_v59  ;;  %v2643_v63 = vld [vmem:[%s8388_s11 + $0x310] sm:$0xff]  ;;  %v2578_v59 = vld [vmem:[%s8388_s11 + $0x108] sm:$0xff] }
 0x420   :  { %2848 = vmatpush2.msra.mxu0 %v2605_v27  ;;  %2961 = vmatpush2.msra.mxu1 %v2669_v61  ;;  %v2642_v27 = vld [vmem:[%s8388_s11 + $0x308] sm:$0xff]  ;;  %v2577_v61 = vld [vmem:[%s8388_s11 + $0x100] sm:$0xff] }
 0x421   :  { %2849 = vmatprep.subr.mxu0 %v2604_v36  ;;  %2962 = vmatprep.subr.mxu1 %v2668_v13  ;;  %v2641_v36 = vld [vmem:[%s8388_s11 + $0x300] sm:$0xff]  ;;  %v2704_v13 = vld [vmem:[%s8388_s11 + $0x4f8] sm:$0xff] }
 0x422   :  { %2850 = vmatpush2.msra.mxu0 %v2603_v4  ;;  %2963 = vmatpush2.msra.mxu1 %v2667_v49  ;;  %v2768_v4 = vld [vmem:[%s8388_s11 + $0x6f8] sm:$0xff]  ;;  %v7288_v49 = vld [vmem:[%s8387_s10] sm:$0xff] }
 0x423   :  { %2851 = vmatprep.subr.mxu0 %v2602_v44  ;;  %2964 = vmatprep.subr.mxu1 %v2666_v7  ;;  %v7292_v44 = vrot.slane %v7288_v49, %v5086_v12  ;;  %v7297_v7 = vrot.slane %v7288_v49, %v758_v19 }
 0x424   :  { %2852 = vmatpush2.msra.mxu0 %v2601_v9  ;;  %2965 = vmatpush2.msra.mxu1 %v2665_v5  ;;  %v7301_v9 = vrot.slane %v7288_v49, %v5092_v14  ;;  %v7306_v5 = vrot.slane %v7288_v49, %v762_v50  ;;  %v2703_v50 = vld [vmem:[%s8388_s11 + $0x4f0] sm:$0xff] }
 0x425   :  { %2853 = vmatprep.subr.mxu0 %v2600_v62  ;;  %2966 = vmatprep.subr.mxu1 %v2664_v21 }
 0x426   :  { %2854 = vmatpush2.msra.mxu0 %v2599_v51  ;;  %2967 = vmatpush2.msra.mxu1 %v2663_v28 }
 0x427   :  { %2855 = vmatprep.subr.mxu0 %v2598_v60  ;;  %2968 = vmatprep.subr.mxu1 %v2662_v29 }
 0x428   :  { %2856 = vmatpush2.msra.mxu0 %v2597_v48  ;;  %2969 = vmatpush2.msra.mxu1 %v2661_v26 }
 0x429   :  { %2857 = vmatprep.subr.mxu0 %v2596_v31  ;;  %2970 = vmatprep.subr.mxu1 %v2660_v16 }
 0x42a   :  { %2858 = vmatpush2.msra.mxu0 %v2595_v37  ;;  %2971 = vmatpush2.msra.mxu1 %v2659_v25 }
 0x42b   :  { %2859 = vmatprep.subr.mxu0 %v2594_v0  ;;  %2972 = vmatprep.subr.mxu1 %v2658_v33  ;;  %v2767_v33 = vld [vmem:[%s8388_s11 + $0x6f0] sm:$0xff] }
 0x42c   :  { %2860 = vmatpush2.msra.mxu0 %v2593_v32  ;;  %2973 = vmatpush2.msra.mxu1 %v2657_v8 }
 0x42d   :  { %2861 = vmatprep.subr.mxu0 %v2592_v10  ;;  %2974 = vmatprep.subr.mxu1 %v2656_v45  ;;  %v2702_v45 = vld [vmem:[%s8388_s11 + $0x4e8] sm:$0xff] }
 0x42e   :  { %2862 = vmatpush2.msra.mxu0 %v2591_v47  ;;  %2975 = vmatpush2.msra.mxu1 %v2655_v46  ;;  %v2766_v47 = vld [vmem:[%s8388_s11 + $0x6e8] sm:$0xff] }
 0x42f   :  { %2863 = vmatprep.subr.mxu0 %v2590_v17  ;;  %2976 = vmatprep.subr.mxu1 %v2654_v24 }
 0x430   :  { %2864 = vmatpush2.msra.mxu0 %v2589_v52  ;;  %2977 = vmatpush2.msra.mxu1 %v2653_v34  ;;  %v2701_v52 = vld [vmem:[%s8388_s11 + $0x4e0] sm:$0xff] }
 0x431   :  { %2865 = vmatprep.subr.mxu0 %v2588_v35  ;;  %2978 = vmatprep.subr.mxu1 %v2652_v38  ;;  %v2765_v34 = vld [vmem:[%s8388_s11 + $0x6e0] sm:$0xff] }
 0x432   :  { %2866 = vmatpush2.msra.mxu0 %v2587_v39  ;;  %2979 = vmatpush2.msra.mxu1 %v2651_v41  ;;  %v2700_v39 = vld [vmem:[%s8388_s11 + $0x4d8] sm:$0xff] }
 0x433   :  { %2867 = vmatprep.subr.mxu0 %v2586_v23  ;;  %2980 = vmatprep.subr.mxu1 %v2650_v2  ;;  %v2764_v41 = vld [vmem:[%s8388_s11 + $0x6d8] sm:$0xff] }
 0x434   :  { %2868 = vmatpush2.msra.mxu0 %v2585_v3  ;;  %2981 = vmatpush2.msra.mxu1 %v2649_v20 }
 0x435   :  { %2869 = vmatprep.subr.mxu0 %v2584_v30  ;;  %2982 = vmatprep.subr.mxu1 %v2648_v54  ;;  %v2699_v30 = vld [vmem:[%s8388_s11 + $0x4d0] sm:$0xff] }
 0x436   :  { %2870 = vmatpush2.msra.mxu0 %v2583_v55  ;;  %2983 = vmatpush2.msra.mxu1 %v2647_v58  ;;  %v2763_v54 = vld [vmem:[%s8388_s11 + $0x6d0] sm:$0xff] }
 0x437   :  { %2871 = vmatprep.subr.mxu0 %v2582_v53  ;;  %2984 = vmatprep.subr.mxu1 %v2646_v22  ;;  %v2698_v22 = vld [vmem:[%s8388_s11 + $0x4c8] sm:$0xff] }
 0x438   :  { %2872 = vmatpush2.msra.mxu0 %v2581_v15  ;;  %2985 = vmatpush2.msra.mxu1 %v2645_v56  ;;  %v2762_v15 = vld [vmem:[%s8388_s11 + $0x6c8] sm:$0xff] }
 0x439   :  { %2873 = vmatprep.subr.mxu0 %v2580_v6  ;;  %2986 = vmatprep.subr.mxu1 %v2644_v57 }
 0x43a   :  { %2874 = vmatpush2.msra.mxu0 %v2579_v1  ;;  %2987 = vmatpush2.msra.mxu1 %v2643_v63  ;;  %v2697_v1 = vld [vmem:[%s8388_s11 + $0x4c0] sm:$0xff] }
 0x43b   :  { %2875 = vmatprep.subr.mxu0 %v2578_v59  ;;  %2988 = vmatprep.subr.mxu1 %v2642_v27  ;;  %v2761_v63 = vld [vmem:[%s8388_s11 + $0x6c0] sm:$0xff] }
 0x43c   :  { %2876 = vmatpush2.msra.mxu0 %v2577_v61  ;;  %2989 = vmatpush2.msra.mxu1 %v2641_v36  ;;  %v2696_v61 = vld [vmem:[%s8388_s11 + $0x4b8] sm:$0xff] }
 0x43d   :  { %3039 = vmatprep.subr.mxu0 %v2704_v13  ;;  %3152 = vmatprep.subr.mxu1 %v2768_v4  ;;  %v2760_v36 = vld [vmem:[%s8388_s11 + $0x6b8] sm:$0xff] }
 0x47f   :  { %v2095_v62 = vpop.f32.mrf.mxu0  ;;  %v2208_v21 = vpop.f32.mrf.mxu1 }
 0x480   :  { %v2096_v51 = vadd.f32 %v2095_v62, %v7292_v44  ;;  %v2209_v28 = vadd.f32 %v2208_v21, %v7297_v7 }
 0x481   :  { %v2097_v60 = vpop.f32.mrf.mxu0  ;;  %v2210_v29 = vpop.f32.mrf.mxu1 }
 0x482   :  { %v2098_v19 = vadd.f32 %v2097_v60, %v7301_v9  ;;  %v2211_v48 = vadd.f32 %v2210_v29, %v7306_v5  ;;  %v2481_v25 = vmax.f32 %v2096_v51, 0.0  ;;  %v2483_v0 = vmax.f32 %v2209_v28, 0.0  ;;  %v2695_v51 = vld [vmem:[%s8388_s11 + $0x4b0] sm:$0xff] }
 0x483   :  { %v2759_v28 = vld [vmem:[%s8388_s11 + $0x6b0] sm:$0xff] }
 0x484   :  { %v2482_v26 = vmax.f32 %v2098_v19, 0.0  ;;  %v2484_v31 = vmax.f32 %v2211_v48, 0.0  ;;  %v2101_v16 = vpop.f32.mrf.mxu0  ;;  %v2214_v37 = vpop.f32.mrf.mxu1  ;;  %v2694_v48 = vld [vmem:[%s8388_s11 + $0x4a8] sm:$0xff] }
 0x485   :  { %v2102_v32 = vadd.f32 %v2101_v16, %v7292_v44  ;;  %v2215_v46 = vadd.f32 %v2214_v37, %v7297_v7 }
 0x486   :  { %v2103_v8 = vpop.f32.mrf.mxu0  ;;  %v2216_v10 = vpop.f32.mrf.mxu1  ;;  %2877 = vmatprep.mubr.f32.mxu0 %v2482_v26  ;;  %2990 = vmatprep.mubr.f32.mxu1 %v2484_v31  ;;  %v2758_v26 = vld [vmem:[%s8388_s11 + $0x6a8] sm:$0xff] }
 0x487   :  { %v2104_v17 = vadd.f32 %v2103_v8, %v7301_v9  ;;  %v2217_v24 = vadd.f32 %v2216_v10, %v7306_v5  ;;  %2878 = vmatmul.mubr.f32.vlgmr.msra.gmra.mxu0 %v2481_v25  ;;  %2991 = vmatmul.mubr.f32.vlgmr.msra.gmra.mxu1 %v2483_v0  ;;  %v2489_v3 = vmax.f32 %v2102_v32, 0.0  ;;  %v2491_v20 = vmax.f32 %v2215_v46, 0.0  ;;  %v2693_v25 = vld [vmem:[%s8388_s11 + $0x4a0] sm:$0xff]  ;;  %v2692_v32 = vld [vmem:[%s8388_s11 + $0x498] sm:$0xff] }
 0x488   :  { %3040 = vmatpush1.msra.mxu0 %v2703_v50  ;;  %3153 = vmatpush1.msra.mxu1 %v2767_v33  ;;  %v2757_v0 = vld [vmem:[%s8388_s11 + $0x6a0] sm:$0xff]  ;;  %v2756_v8 = vld [vmem:[%s8388_s11 + $0x698] sm:$0xff] }
 0x489   :  { %v2490_v35 = vmax.f32 %v2104_v17, 0.0  ;;  %v2492_v38 = vmax.f32 %v2217_v24, 0.0  ;;  %3041 = vmatprep.subr.mxu0 %v2702_v45  ;;  %3154 = vmatprep.subr.mxu1 %v2766_v47  ;;  %v2691_v17 = vld [vmem:[%s8388_s11 + $0x490] sm:$0xff] }
 0x48a   :  { %v2107_v23 = vpop.f32.mrf.mxu0  ;;  %v2220_v2 = vpop.f32.mrf.mxu1  ;;  %3042 = vmatpush1.msra.mxu0 %v2701_v52  ;;  %3155 = vmatpush1.msra.mxu1 %v2765_v34  ;;  %v2755_v24 = vld [vmem:[%s8388_s11 + $0x690] sm:$0xff] }
 0x48b   :  { %2883 = vmatprep.mubr.f32.mxu0 %v2490_v35  ;;  %2996 = vmatprep.mubr.f32.mxu1 %v2492_v38  ;;  %v2108_v55 = vadd.f32 %v2107_v23, %v7292_v44  ;;  %v2221_v56 = vadd.f32 %v2220_v2, %v7297_v7  ;;  %v2690_v38 = vld [vmem:[%s8388_s11 + $0x488] sm:$0xff] }
 0x48c   :  { %v2109_v58 = vpop.f32.mrf.mxu0  ;;  %v2222_v53 = vpop.f32.mrf.mxu1  ;;  %3043 = vmatprep.subr.mxu0 %v2700_v39  ;;  %3156 = vmatprep.subr.mxu1 %v2764_v41  ;;  %v2754_v39 = vld [vmem:[%s8388_s11 + $0x688] sm:$0xff] }
 0x48d   :  { %v2110_v6 = vadd.f32 %v2109_v58, %v7301_v9  ;;  %v2223_v57 = vadd.f32 %v2222_v53, %v7306_v5  ;;  %2884 = vmatmul.mubr.f32.gmra.mxu0 %v2489_v3  ;;  %2997 = vmatmul.mubr.f32.gmra.mxu1 %v2491_v20  ;;  %v2497_v62 = vmax.f32 %v2108_v55, 0.0  ;;  %v2499_v21 = vmax.f32 %v2221_v56, 0.0  ;;  %v2689_v3 = vld [vmem:[%s8388_s11 + $0x480] sm:$0xff]  ;;  %v2688_v55 = vld [vmem:[%s8388_s11 + $0x478] sm:$0xff] }
 0x48e   :  { %3044 = vmatpush1.msra.mxu0 %v2699_v30  ;;  %3157 = vmatpush1.msra.mxu1 %v2763_v54  ;;  %v2753_v20 = vld [vmem:[%s8388_s11 + $0x680] sm:$0xff]  ;;  %v2752_v58 = vld [vmem:[%s8388_s11 + $0x678] sm:$0xff] }
 0x48f   :  { %v2498_v59 = vmax.f32 %v2110_v6, 0.0  ;;  %v2500_v27 = vmax.f32 %v2223_v57, 0.0  ;;  %3045 = vmatprep.subr.mxu0 %v2698_v22  ;;  %3158 = vmatprep.subr.mxu1 %v2762_v15  ;;  %v2687_v6 = vld [vmem:[%s8388_s11 + $0x470] sm:$0xff] }
 0x490   :  { %v2113_v13 = vpop.f32.mrf.mxu0  ;;  %v2226_v4 = vpop.f32.mrf.mxu1  ;;  %3046 = vmatpush1.msra.mxu0 %v2697_v1  ;;  %3159 = vmatpush1.msra.mxu1 %v2761_v63  ;;  %v2751_v57 = vld [vmem:[%s8388_s11 + $0x670] sm:$0xff] }
 0x491   :  { %2889 = vmatprep.mubr.f32.mxu0 %v2498_v59  ;;  %3002 = vmatprep.mubr.f32.mxu1 %v2500_v27  ;;  %v2114_v60 = vadd.f32 %v2113_v13, %v7292_v44  ;;  %v2227_v31 = vadd.f32 %v2226_v4, %v7297_v7  ;;  %v2686_v27 = vld [vmem:[%s8388_s11 + $0x468] sm:$0xff] }
 0x492   :  { %v2115_v29 = vpop.f32.mrf.mxu0  ;;  %v2228_v19 = vpop.f32.mrf.mxu1  ;;  %3047 = vmatprep.subr.mxu0 %v2696_v61  ;;  %3160 = vmatprep.subr.mxu1 %v2760_v36  ;;  %v2750_v61 = vld [vmem:[%s8388_s11 + $0x668] sm:$0xff] }
 0x493   :  { %v2116_v16 = vadd.f32 %v2115_v29, %v7301_v9  ;;  %v2229_v37 = vadd.f32 %v2228_v19, %v7306_v5  ;;  %2890 = vmatmul.mubr.f32.gmra.mxu0 %v2497_v62  ;;  %3003 = vmatmul.mubr.f32.gmra.mxu1 %v2499_v21  ;;  %v2505_v47 = vmax.f32 %v2114_v60, 0.0  ;;  %v2507_v46 = vmax.f32 %v2227_v31, 0.0  ;;  %v2685_v62 = vld [vmem:[%s8388_s11 + $0x460] sm:$0xff]  ;;  %v2684_v60 = vld [vmem:[%s8388_s11 + $0x458] sm:$0xff] }
 0x494   :  { %3048 = vmatpush1.msra.mxu0 %v2695_v51  ;;  %3161 = vmatpush1.msra.mxu1 %v2759_v28  ;;  %v2749_v21 = vld [vmem:[%s8388_s11 + $0x660] sm:$0xff]  ;;  %v2748_v29 = vld [vmem:[%s8388_s11 + $0x658] sm:$0xff] }
 0x495   :  { %v2506_v50 = vmax.f32 %v2116_v16, 0.0  ;;  %v2508_v33 = vmax.f32 %v2229_v37, 0.0  ;;  %3049 = vmatprep.subr.mxu0 %v2694_v48  ;;  %3162 = vmatprep.subr.mxu1 %v2758_v26  ;;  %v2683_v16 = vld [vmem:[%s8388_s11 + $0x450] sm:$0xff] }
 0x496   :  { %v2119_v10 = vpop.f32.mrf.mxu0  ;;  %v2232_v45 = vpop.f32.mrf.mxu1  ;;  %3050 = vmatpush1.msra.mxu0 %v2693_v25  ;;  %3163 = vmatpush1.msra.mxu1 %v2757_v0  ;;  %v2747_v37 = vld [vmem:[%s8388_s11 + $0x650] sm:$0xff] }
 0x497   :  { %2895 = vmatprep.mubr.f32.mxu0 %v2506_v50  ;;  %3008 = vmatprep.mubr.f32.mxu1 %v2508_v33  ;;  %v2120_v52 = vadd.f32 %v2119_v10, %v7292_v44  ;;  %v2233_v41 = vadd.f32 %v2232_v45, %v7297_v7  ;;  %v2682_v33 = vld [vmem:[%s8388_s11 + $0x448] sm:$0xff] }
 0x498   :  { %v2121_v34 = vpop.f32.mrf.mxu0  ;;  %v2234_v35 = vpop.f32.mrf.mxu1  ;;  %3051 = vmatprep.subr.mxu0 %v2692_v32  ;;  %3164 = vmatprep.subr.mxu1 %v2756_v8  ;;  %v2746_v32 = vld [vmem:[%s8388_s11 + $0x648] sm:$0xff] }
 0x499   :  { %v2122_v23 = vadd.f32 %v2121_v34, %v7301_v9  ;;  %v2235_v2 = vadd.f32 %v2234_v35, %v7306_v5  ;;  %2896 = vmatmul.mubr.f32.gmra.mxu0 %v2505_v47  ;;  %3009 = vmatmul.mubr.f32.gmra.mxu1 %v2507_v46  ;;  %v2513_v15 = vmax.f32 %v2120_v52, 0.0  ;;  %v2515_v56 = vmax.f32 %v2233_v41, 0.0  ;;  %v2681_v47 = vld [vmem:[%s8388_s11 + $0x440] sm:$0xff]  ;;  %v2680_v52 = vld [vmem:[%s8388_s11 + $0x438] sm:$0xff] }
 0x49a   :  { %3052 = vmatpush1.msra.mxu0 %v2691_v17  ;;  %3165 = vmatpush1.msra.mxu1 %v2755_v24  ;;  %v2745_v46 = vld [vmem:[%s8388_s11 + $0x640] sm:$0xff]  ;;  %v2744_v34 = vld [vmem:[%s8388_s11 + $0x638] sm:$0xff] }
 0x49b   :  { %v2514_v30 = vmax.f32 %v2122_v23, 0.0  ;;  %v2516_v54 = vmax.f32 %v2235_v2, 0.0  ;;  %3053 = vmatprep.subr.mxu0 %v2690_v38  ;;  %3166 = vmatprep.subr.mxu1 %v2754_v39  ;;  %v2679_v23 = vld [vmem:[%s8388_s11 + $0x430] sm:$0xff] }
 0x49c   :  { %v2125_v53 = vpop.f32.mrf.mxu0  ;;  %v2238_v22 = vpop.f32.mrf.mxu1  ;;  %3054 = vmatpush1.msra.mxu0 %v2689_v3  ;;  %3167 = vmatpush1.msra.mxu1 %v2753_v20  ;;  %v2743_v2 = vld [vmem:[%s8388_s11 + $0x630] sm:$0xff] }
 0x49d   :  { %2901 = vmatprep.mubr.f32.mxu0 %v2514_v30  ;;  %3014 = vmatprep.mubr.f32.mxu1 %v2516_v54  ;;  %v2126_v1 = vadd.f32 %v2125_v53, %v7292_v44  ;;  %v2239_v36 = vadd.f32 %v2238_v22, %v7297_v7  ;;  %v2678_v54 = vld [vmem:[%s8388_s11 + $0x428] sm:$0xff] }
 0x49e   :  { %v2127_v63 = vpop.f32.mrf.mxu0  ;;  %v2240_v59 = vpop.f32.mrf.mxu1  ;;  %3055 = vmatprep.subr.mxu0 %v2688_v55  ;;  %3168 = vmatprep.subr.mxu1 %v2752_v58  ;;  %v2742_v55 = vld [vmem:[%s8388_s11 + $0x628] sm:$0xff] }
 0x49f   :  { %v2128_v13 = vadd.f32 %v2127_v63, %v7301_v9  ;;  %v2241_v4 = vadd.f32 %v2240_v59, %v7306_v5  ;;  %2902 = vmatmul.mubr.f32.gmra.mxu0 %v2513_v15  ;;  %3015 = vmatmul.mubr.f32.gmra.mxu1 %v2515_v56  ;;  %v2521_v26 = vmax.f32 %v2126_v1, 0.0  ;;  %v2523_v31 = vmax.f32 %v2239_v36, 0.0  ;;  %v2741_v15 = vld [vmem:[%s8388_s11 + $0x620] sm:$0xff] }
 0x4a0   :  { %3056 = vmatpush1.msra.mxu0 %v2687_v6  ;;  %3169 = vmatpush1.msra.mxu1 %v2751_v57  ;;  %v2740_v57 = vld [vmem:[%s8388_s11 + $0x618] sm:$0xff] }
 0x4a1   :  { %v2522_v51 = vmax.f32 %v2128_v13, 0.0  ;;  %v2524_v28 = vmax.f32 %v2241_v4, 0.0  ;;  %3057 = vmatprep.subr.mxu0 %v2686_v27  ;;  %3170 = vmatprep.subr.mxu1 %v2750_v61  ;;  %v2739_v27 = vld [vmem:[%s8388_s11 + $0x610] sm:$0xff]  ;;  %v2674_v13 = vld [vmem:[%s8388_s11 + $0x408] sm:$0xff] }
 0x4a2   :  { %v2131_v19 = vpop.f32.mrf.mxu0  ;;  %v2244_v48 = vpop.f32.mrf.mxu1  ;;  %3058 = vmatpush1.msra.mxu0 %v2685_v62  ;;  %3171 = vmatpush1.msra.mxu1 %v2749_v21  ;;  %v2738_v4 = vld [vmem:[%s8388_s11 + $0x608] sm:$0xff] }
 0x4a3   :  { %2907 = vmatprep.mubr.f32.mxu0 %v2522_v51  ;;  %3020 = vmatprep.mubr.f32.mxu1 %v2524_v28  ;;  %v2132_v25 = vadd.f32 %v2131_v19, %v7292_v44  ;;  %v2245_v8 = vadd.f32 %v2244_v48, %v7297_v7  ;;  %v2673_v51 = vld [vmem:[%s8388_s11 + $0x400] sm:$0xff]  ;;  %v2736_v19 = vld [vmem:[%s8388_s11 + $0x5f8] sm:$0xff] }
 0x4a4   :  { %v2133_v0 = vpop.f32.mrf.mxu0  ;;  %v2246_v50 = vpop.f32.mrf.mxu1  ;;  %3059 = vmatprep.subr.mxu0 %v2684_v60  ;;  %3172 = vmatprep.subr.mxu1 %v2748_v29  ;;  %v2737_v28 = vld [vmem:[%s8388_s11 + $0x600] sm:$0xff] }
 0x4a5   :  { %v2134_v10 = vadd.f32 %v2133_v0, %v7301_v9  ;;  %v2247_v45 = vadd.f32 %v2246_v50, %v7306_v5  ;;  %2908 = vmatmul.mubr.f32.gmra.mxu0 %v2521_v26  ;;  %3021 = vmatmul.mubr.f32.gmra.mxu1 %v2523_v31  ;;  %v2529_v39 = vmax.f32 %v2132_v25, 0.0  ;;  %v2531_v41 = vmax.f32 %v2245_v8, 0.0  ;;  %v2800_v31 = vld [vmem:[%s8388_s11 + $0x7f8] sm:$0xff]  ;;  %v2734_v25 = vld [vmem:[%s8388_s11 + $0x5e8] sm:$0xff]  ;;  %v2797_v8 = vld [vmem:[%s8388_s11 + $0x7e0] sm:$0xff] }
 0x4a6   :  { %3060 = vmatpush1.msra.mxu0 %v2683_v16  ;;  %3173 = vmatpush1.msra.mxu1 %v2747_v37  ;;  %v2735_v16 = vld [vmem:[%s8388_s11 + $0x5f0] sm:$0xff]  ;;  %v2798_v0 = vld [vmem:[%s8388_s11 + $0x7e8] sm:$0xff] }
 0x4a7   :  { %v2530_v17 = vmax.f32 %v2134_v10, 0.0  ;;  %v2532_v24 = vmax.f32 %v2247_v45, 0.0  ;;  %3061 = vmatprep.subr.mxu0 %v2682_v33  ;;  %3174 = vmatprep.subr.mxu1 %v2746_v32  ;;  %v2799_v37 = vld [vmem:[%s8388_s11 + $0x7f0] sm:$0xff]  ;;  %v2733_v32 = vld [vmem:[%s8388_s11 + $0x5e0] sm:$0xff]  ;;  %v2732_v10 = vld [vmem:[%s8388_s11 + $0x5d8] sm:$0xff] }
 0x4a8   :  { %v2137_v35 = vpop.f32.mrf.mxu0  ;;  %v2250_v38 = vpop.f32.mrf.mxu1  ;;  %3062 = vmatpush1.msra.mxu0 %v2681_v47  ;;  %3175 = vmatpush1.msra.mxu1 %v2745_v46  ;;  %v2796_v45 = vld [vmem:[%s8388_s11 + $0x7d8] sm:$0xff]  ;;  %v2731_v47 = vld [vmem:[%s8388_s11 + $0x5d0] sm:$0xff] }
 0x4a9   :  { %2913 = vmatprep.mubr.f32.mxu0 %v2530_v17  ;;  %3026 = vmatprep.mubr.f32.mxu1 %v2532_v24  ;;  %v2138_v3 = vadd.f32 %v2137_v35, %v7292_v44  ;;  %v2251_v58 = vadd.f32 %v2250_v38, %v7297_v7  ;;  %v2677_v44 = vld [vmem:[%s8388_s11 + $0x420] sm:$0xff]  ;;  %v7505_v7 = vrot.slane %v7288_v49, %v770_v43  ;;  %v2795_v46 = vld [vmem:[%s8388_s11 + $0x7d0] sm:$0xff]  ;;  %v2730_v17 = vld [vmem:[%s8388_s11 + $0x5c8] sm:$0xff] }
 0x4aa   :  { %v2139_v20 = vpop.f32.mrf.mxu0  ;;  %v2252_v30 = vpop.f32.mrf.mxu1  ;;  %3063 = vmatprep.subr.mxu0 %v2680_v52  ;;  %3176 = vmatprep.subr.mxu1 %v2744_v34  ;;  %v2794_v24 = vld [vmem:[%s8388_s11 + $0x7c8] sm:$0xff]  ;;  %v2729_v35 = vld [vmem:[%s8388_s11 + $0x5c0] sm:$0xff] }
 0x4ab   :  { %v2140_v53 = vadd.f32 %v2139_v20, %v7301_v9  ;;  %v2253_v22 = vadd.f32 %v2252_v30, %v7306_v5  ;;  %2914 = vmatmul.mubr.f32.gmra.mxu0 %v2529_v39  ;;  %3027 = vmatmul.mubr.f32.gmra.mxu1 %v2531_v41  ;;  %v7510_v9 = vrot.slane %v7288_v49, %v778_v18  ;;  %v2676_v5 = vld [vmem:[%s8388_s11 + $0x418] sm:$0xff]  ;;  %v2537_v43 = vmax.f32 %v2138_v3, 0.0  ;;  %v2675_v18 = vld [vmem:[%s8388_s11 + $0x410] sm:$0xff]  ;;  %v2793_v38 = vld [vmem:[%s8388_s11 + $0x7c0] sm:$0xff] }
 0x4ac   :  { %3064 = vmatpush1.msra.mxu0 %v2679_v23  ;;  %3177 = vmatpush1.msra.mxu1 %v2743_v2  ;;  %v2539_v59 = vmax.f32 %v2251_v58, 0.0  ;;  %v2728_v39 = vld [vmem:[%s8388_s11 + $0x5b8] sm:$0xff]  ;;  %v2727_v23 = vld [vmem:[%s8388_s11 + $0x5b0] sm:$0xff]  ;;  %v2726_v3 = vld [vmem:[%s8388_s11 + $0x5a8] sm:$0xff] }
 0x4ad   :  { %v2538_v56 = vmax.f32 %v2140_v53, 0.0  ;;  %v2540_v6 = vmax.f32 %v2253_v22, 0.0  ;;  %3065 = vmatprep.subr.mxu0 %v2678_v54  ;;  %3178 = vmatprep.subr.mxu1 %v2742_v55  ;;  %v2792_v41 = vld [vmem:[%s8388_s11 + $0x7b8] sm:$0xff]  ;;  %v2791_v2 = vld [vmem:[%s8388_s11 + $0x7b0] sm:$0xff]  ;;  %v2790_v20 = vld [vmem:[%s8388_s11 + $0x7a8] sm:$0xff] }
 0x4ae   :  { %v7518_v1 = vpop.f32.mrf.mxu0  ;;  %v7520_v63 = vpop.f32.mrf.mxu1  ;;  %3066 = vmatpush1.msra.mxu0 %v2677_v44  ;;  %3179 = vmatpush1.msra.mxu1 %v2741_v15  ;;  %v2725_v55 = vld [vmem:[%s8388_s11 + $0x5a0] sm:$0xff]  ;;  %v2724_v53 = vld [vmem:[%s8388_s11 + $0x598] sm:$0xff]  ;;  %v2723_v44 = vld [vmem:[%s8388_s11 + $0x590] sm:$0xff] }
 0x4af   :  { %2919 = vmatprep.mubr.f32.mxu0 %v2538_v56  ;;  %3032 = vmatprep.mubr.f32.mxu1 %v2540_v6  ;;  %v2789_v58 = vld [vmem:[%s8388_s11 + $0x7a0] sm:$0xff]  ;;  %v2788_v22 = vld [vmem:[%s8388_s11 + $0x798] sm:$0xff]  ;;  %v2787_v15 = vld [vmem:[%s8388_s11 + $0x790] sm:$0xff] }
 0x4b0   :  { %v2323_v61 = vpop.f32.mrf.mxu0  ;;  %v2436_v36 = vpop.f32.mrf.mxu1  ;;  %3067 = vmatprep.subr.mxu0 %v2676_v5  ;;  %3180 = vmatprep.subr.mxu1 %v2740_v57  ;;  %v2722_v56 = vld [vmem:[%s8388_s11 + $0x588] sm:$0xff] }
 0x4b1   :  { %v2324_v62 = vadd.f32 %v2323_v61, %v7505_v7  ;;  %v2437_v21 = vadd.f32 %v2436_v36, %v7510_v9  ;;  %2920 = vmatmul.mubr.f32.gmra.mxu0 %v2537_v43  ;;  %3033 = vmatmul.mubr.f32.gmra.mxu1 %v2539_v59  ;;  %v2786_v6 = vld [vmem:[%s8388_s11 + $0x788] sm:$0xff]  ;;  %v2721_v43 = vld [vmem:[%s8388_s11 + $0x580] sm:$0xff]  ;;  %v2719_v61 = vld [vmem:[%s8388_s11 + $0x570] sm:$0xff] }
 0x4b2   :  { %v7542_v60 = vpop.f32.mrf.mxu0  ;;  %v7544_v29 = vpop.f32.mrf.mxu1  ;;  %3068 = vmatpush1.msra.mxu0 %v2675_v18  ;;  %3181 = vmatpush1.msra.mxu1 %v2739_v27  ;;  %v2785_v59 = vld [vmem:[%s8388_s11 + $0x780] sm:$0xff]  ;;  %v2720_v18 = vld [vmem:[%s8388_s11 + $0x578] sm:$0xff]  ;;  %v2783_v36 = vld [vmem:[%s8388_s11 + $0x770] sm:$0xff] }
 0x4b3   :  { %v2486_v48 = vmax.f32 %v2324_v62, 0.0  ;;  %v2488_v26 = vmax.f32 %v2437_v21, 0.0  ;;  %3069 = vmatprep.subr.mxu0 %v2674_v13  ;;  %3182 = vmatprep.subr.mxu1 %v2738_v4  ;;  %v2784_v27 = vld [vmem:[%s8388_s11 + $0x778] sm:$0xff]  ;;  %v2718_v13 = vld [vmem:[%s8388_s11 + $0x568] sm:$0xff] }
 0x4b4   :  { %3070 = vmatpush1.msra.mxu0 %v2673_v51  ;;  %3183 = vmatpush1.msra.mxu1 %v2737_v28  ;;  %v7564_v50 = vpop.f32.mrf.mxu0  ;;  %v7566_v33 = vpop.f32.mrf.mxu1  ;;  %v2782_v4 = vld [vmem:[%s8388_s11 + $0x768] sm:$0xff]  ;;  %v2717_v51 = vld [vmem:[%s8388_s11 + $0x560] sm:$0xff] }
 0x4b5   :  { %3071 = vmatprep.subr.mxu0 %v2736_v19  ;;  %3103 = vmatprep.mubr.f32.mxu0 %v2486_v48  ;;  %v2781_v28 = vld [vmem:[%s8388_s11 + $0x760] sm:$0xff]  ;;  %v2716_v19 = vld [vmem:[%s8388_s11 + $0x558] sm:$0xff] }
 0x4b6   :  { %3184 = vmatprep.subr.mxu1 %v2800_v31  ;;  %3216 = vmatprep.mubr.f32.mxu1 %v2488_v26  ;;  %v7592_v52 = vpop.f32.mrf.mxu0  ;;  %v7594_v34 = vpop.f32.mrf.mxu1  ;;  %v2780_v48 = vld [vmem:[%s8388_s11 + $0x758] sm:$0xff]  ;;  %v2715_v26 = vld [vmem:[%s8388_s11 + $0x550] sm:$0xff] }
 0x4b7   :  { %3072 = vmatpush2.msra.mxu0 %v2735_v16  ;;  %3185 = vmatpush2.msra.mxu1 %v2799_v37  ;;  %v2779_v31 = vld [vmem:[%s8388_s11 + $0x750] sm:$0xff]  ;;  %v2714_v16 = vld [vmem:[%s8388_s11 + $0x548] sm:$0xff] }
 0x4b8   :  { %3073 = vmatprep.subr.mxu0 %v2734_v25  ;;  %3186 = vmatprep.subr.mxu1 %v2798_v0  ;;  %v7620_v30 = vpop.f32.mrf.mxu0  ;;  %v7622_v54 = vpop.f32.mrf.mxu1  ;;  %v2778_v37 = vld [vmem:[%s8388_s11 + $0x748] sm:$0xff] }
 0x4b9   :  { %3074 = vmatpush2.msra.mxu0 %v2733_v32  ;;  %3187 = vmatpush2.msra.mxu1 %v2797_v8  ;;  %v2713_v32 = vld [vmem:[%s8388_s11 + $0x540] sm:$0xff] }
 0x4ba   :  { %3075 = vmatprep.subr.mxu0 %v2732_v10  ;;  %3188 = vmatprep.subr.mxu1 %v2796_v45  ;;  %v7648_v5 = vpop.f32.mrf.mxu0  ;;  %v7650_v57 = vpop.f32.mrf.mxu1  ;;  %v2777_v8 = vld [vmem:[%s8388_s11 + $0x740] sm:$0xff]  ;;  %v2712_v10 = vld [vmem:[%s8388_s11 + $0x538] sm:$0xff] }
 0x4bb   :  { %3076 = vmatpush2.msra.mxu0 %v2731_v47  ;;  %3189 = vmatpush2.msra.mxu1 %v2795_v46  ;;  %v2776_v45 = vld [vmem:[%s8388_s11 + $0x738] sm:$0xff]  ;;  %v7723_v47 = vrot.slane %v7288_v49, %v766_v40  ;;  %v7728_v46 = vrot.slane %v7288_v49, %v774_v42  ;;  %v2710_v40 = vld [vmem:[%s8388_s11 + $0x528] sm:$0xff] }
 0x4bc   :  { %3077 = vmatprep.subr.mxu0 %v2730_v17  ;;  %3190 = vmatprep.subr.mxu1 %v2794_v24  ;;  %v7676_v62 = vpop.f32.mrf.mxu0  ;;  %v7678_v21 = vpop.f32.mrf.mxu1  ;;  %v2711_v17 = vld [vmem:[%s8388_s11 + $0x530] sm:$0xff] }
 0x4bd   :  { %3078 = vmatpush2.msra.mxu0 %v2729_v35  ;;  %3191 = vmatpush2.msra.mxu1 %v2793_v38  ;;  %v2775_v24 = vld [vmem:[%s8388_s11 + $0x730] sm:$0xff]  ;;  %v2709_v35 = vld [vmem:[%s8388_s11 + $0x520] sm:$0xff] }
 0x4be   :  { %3079 = vmatprep.subr.mxu0 %v2728_v39  ;;  %3192 = vmatprep.subr.mxu1 %v2792_v41  ;;  %v7704_v25 = vpop.f32.mrf.mxu0  ;;  %v7706_v0 = vpop.f32.mrf.mxu1  ;;  %v2773_v38 = vld [vmem:[%s8388_s11 + $0x720] sm:$0xff]  ;;  %v2708_v39 = vld [vmem:[%s8388_s11 + $0x518] sm:$0xff] }
 0x4bf   :  { %3080 = vmatpush2.msra.mxu0 %v2727_v23  ;;  %3193 = vmatpush2.msra.mxu1 %v2791_v2  ;;  %v2772_v41 = vld [vmem:[%s8388_s11 + $0x718] sm:$0xff]  ;;  %v2322_v23 = vadd.f32 %v7518_v1, %v7723_v47  ;;  %v2435_v2 = vadd.f32 %v7520_v63, %v7728_v46  ;;  %v2706_v1 = vld [vmem:[%s8388_s11 + $0x508] sm:$0xff] }
 0x4c0   :  { %3081 = vmatprep.subr.mxu0 %v2726_v3  ;;  %3194 = vmatprep.subr.mxu1 %v2790_v20  ;;  %v7742_v42 = vpop.f32.mrf.mxu0  ;;  %v7744_v49 = vpop.f32.mrf.mxu1  ;;  %v2707_v3 = vld [vmem:[%s8388_s11 + $0x510] sm:$0xff]  ;;  %v2770_v63 = vld [vmem:[%s8388_s11 + $0x708] sm:$0xff] }
 0x4c1   :  { %3082 = vmatpush2.msra.mxu0 %v2725_v55  ;;  %3195 = vmatpush2.msra.mxu1 %v2789_v58  ;;  %v2771_v20 = vld [vmem:[%s8388_s11 + $0x710] sm:$0xff]  ;;  %v2330_v55 = vadd.f32 %v7564_v50, %v7505_v7  ;;  %v2443_v58 = vadd.f32 %v7566_v33, %v7510_v9  ;;  %v2705_v50 = vld [vmem:[%s8388_s11 + $0x500] sm:$0xff] }
 0x4c2   :  { %3083 = vmatprep.subr.mxu0 %v2724_v53  ;;  %3196 = vmatprep.subr.mxu1 %v2788_v22  ;;  %v7778_v53 = vpop.f32.mrf.mxu0  ;;  %v7780_v22 = vpop.f32.mrf.mxu1  ;;  %v2769_v33 = vld [vmem:[%s8388_s11 + $0x700] sm:$0xff] }
 0x4c3   :  { %3084 = vmatpush2.msra.mxu0 %v2723_v44  ;;  %3197 = vmatpush2.msra.mxu1 %v2787_v15  ;;  %v2485_v44 = vmax.f32 %v2322_v23, 0.0  ;;  %v2487_v15 = vmax.f32 %v2435_v2, 0.0  ;;  %v3306_v23 = vld [vmem:[%s8390_s13 + $0xc8] sm:$0xff] }
 0x4c4   :  { %3085 = vmatprep.subr.mxu0 %v2722_v56  ;;  %3198 = vmatprep.subr.mxu1 %v2786_v6  ;;  %v2328_v56 = vadd.f32 %v7542_v60, %v7723_v47  ;;  %v2441_v6 = vadd.f32 %v7544_v29, %v7728_v46  ;;  %v3312_v60 = vld [vmem:[%s8390_s13 + $0xf8] sm:$0xff] }
 0x4c5   :  { %3086 = vmatpush2.msra.mxu0 %v2721_v43  ;;  %3199 = vmatpush2.msra.mxu1 %v2785_v59  ;;  %v2494_v43 = vmax.f32 %v2330_v55, 0.0  ;;  %v2496_v59 = vmax.f32 %v2443_v58, 0.0  ;;  %v2352_v55 = vadd.f32 %v7778_v53, %v7723_v47  ;;  %v2465_v58 = vadd.f32 %v7780_v22, %v7728_v46  ;;  %v3303_v53 = vld [vmem:[%s8390_s13 + $0xb0] sm:$0xff] }
 0x4c6   :  { %3087 = vmatprep.subr.mxu0 %v2720_v18  ;;  %3200 = vmatprep.subr.mxu1 %v2784_v27  ;;  %v2336_v18 = vadd.f32 %v7620_v30, %v7505_v7  ;;  %v2449_v27 = vadd.f32 %v7622_v54, %v7510_v9  ;;  %v2493_v29 = vmax.f32 %v2328_v56, 0.0  ;;  %v2334_v30 = vadd.f32 %v7592_v52, %v7723_v47  ;;  %v3310_v52 = vld [vmem:[%s8390_s13 + $0xe8] sm:$0xff] }
 0x4c7   :  { %3088 = vmatpush2.msra.mxu0 %v2719_v61  ;;  %3201 = vmatpush2.msra.mxu1 %v2783_v36  ;;  %v2353_v61 = vpop.f32.mrf.mxu0  ;;  %v2466_v36 = vpop.f32.mrf.mxu1  ;;  %v2447_v54 = vadd.f32 %v7594_v34, %v7728_v46  ;;  %v2525_v22 = vmax.f32 %v2352_v55, 0.0  ;;  %v3330_v55 = vld [vmem:[%s8390_s13 + $0x188] sm:$0xff] }
 0x4c8   :  { %3089 = vmatprep.subr.mxu0 %v2718_v13  ;;  %3202 = vmatprep.subr.mxu1 %v2782_v4  ;;  %v2495_v13 = vmax.f32 %v2441_v6, 0.0  ;;  %v3311_v4 = vld [vmem:[%s8390_s13 + $0xf0] sm:$0xff]  ;;  %v2527_v6 = vmax.f32 %v2465_v58, 0.0  ;;  %v3329_v58 = vld [vmem:[%s8390_s13 + $0x180] sm:$0xff] }
 0x4c9   :  { %3090 = vmatpush2.msra.mxu0 %v2717_v51  ;;  %3203 = vmatpush2.msra.mxu1 %v2781_v28  ;;  %v2502_v51 = vmax.f32 %v2336_v18, 0.0  ;;  %v2504_v28 = vmax.f32 %v2449_v27, 0.0  ;;  %v7815_v34 = vpop.f32.mrf.mxu1 }
 0x4ca   :  { %3091 = vmatprep.subr.mxu0 %v2716_v19  ;;  %3204 = vmatprep.subr.mxu1 %v2780_v48  ;;  %v2342_v19 = vadd.f32 %v7676_v62, %v7505_v7  ;;  %v2455_v48 = vadd.f32 %v7678_v21, %v7510_v9  ;;  %v2340_v62 = vadd.f32 %v7648_v5, %v7723_v47  ;;  %v3308_v5 = vld [vmem:[%s8390_s13 + $0xd8] sm:$0xff] }
 0x4cb   :  { %3092 = vmatpush2.msra.mxu0 %v2715_v26  ;;  %3205 = vmatpush2.msra.mxu1 %v2779_v31  ;;  %v7813_v26 = vpop.f32.mrf.mxu0  ;;  %v2501_v31 = vmax.f32 %v2334_v30, 0.0  ;;  %v2453_v21 = vadd.f32 %v7650_v57, %v7728_v46  ;;  %v2472_v57 = vpop.f32.mrf.mxu1 }
 0x4cc   :  { %3093 = vmatprep.subr.mxu0 %v2714_v16  ;;  %3206 = vmatprep.subr.mxu1 %v2778_v37  ;;  %v2503_v16 = vmax.f32 %v2447_v54, 0.0  ;;  %v3309_v37 = vld [vmem:[%s8390_s13 + $0xe0] sm:$0xff] }
 0x4cd   :  { %3094 = vmatpush2.msra.mxu0 %v2713_v32  ;;  %3207 = vmatpush2.msra.mxu1 %v2777_v8  ;;  %v2510_v32 = vmax.f32 %v2342_v19, 0.0  ;;  %v2512_v8 = vmax.f32 %v2455_v48, 0.0  ;;  %v3297_v48 = vld [vmem:[%s8390_s13 + $0x80] sm:$0xff] }
 0x4ce   :  { %3095 = vmatprep.subr.mxu0 %v2712_v10  ;;  %3208 = vmatprep.subr.mxu1 %v2776_v45  ;;  %v2348_v10 = vadd.f32 %v7742_v42, %v7505_v7  ;;  %v2461_v45 = vadd.f32 %v7744_v49, %v7510_v9  ;;  %v2346_v42 = vadd.f32 %v7704_v25, %v7723_v47  ;;  %v3305_v25 = vld [vmem:[%s8390_s13 + $0xc0] sm:$0xff] }
 0x4cf   :  { %3096 = vmatpush2.msra.mxu0 %v2711_v17  ;;  %3209 = vmatpush2.msra.mxu1 %v2775_v24  ;;  %v2359_v17 = vpop.f32.mrf.mxu0  ;;  %v3307_v24 = vld [vmem:[%s8390_s13 + $0xd0] sm:$0xff]  ;;  %v2459_v49 = vadd.f32 %v7706_v0, %v7728_v46 }
 0x4d0   :  { %3097 = vmatprep.subr.mxu0 %v2710_v40  ;;  %3210 = vmatprep.subr.mxu1 %v2774_v11  ;;  %v2509_v40 = vmax.f32 %v2340_v62, 0.0  ;;  %v2511_v11 = vmax.f32 %v2453_v21, 0.0  ;;  %v2517_v0 = vmax.f32 %v2346_v42, 0.0  ;;  %v3291_v62 = vld [vmem:[%s8390_s13 + $0x50] sm:$0xff]  ;;  %v3290_v21 = vld [vmem:[%s8390_s13 + $0x48] sm:$0xff] }
 0x4d1   :  { %3098 = vmatpush2.msra.mxu0 %v2709_v35  ;;  %3211 = vmatpush2.msra.mxu1 %v2773_v38  ;;  %v2518_v35 = vmax.f32 %v2348_v10, 0.0  ;;  %v2520_v38 = vmax.f32 %v2461_v45, 0.0  ;;  %v2363_v2 = vpop.f32.mrf.mxu0  ;;  %v3286_v10 = vld [vmem:[%s8390_s13 + $0x28] sm:$0xff]  ;;  %v3285_v45 = vld [vmem:[%s8390_s13 + $0x20] sm:$0xff] }
 0x4d2   :  { %3099 = vmatprep.subr.mxu0 %v2708_v39  ;;  %3212 = vmatprep.subr.mxu1 %v2772_v41  ;;  %v2354_v39 = vadd.f32 %v2353_v61, %v7505_v7  ;;  %v2467_v41 = vadd.f32 %v2466_v36, %v7510_v9  ;;  %v2364_v54 = vadd.f32 %v2363_v2, %v7723_v47  ;;  %v3342_v42 = vld [vmem:[%s8390_s13 + $0x1e8] sm:$0xff]  ;;  %v3335_v2 = vld [vmem:[%s8390_s13 + $0x1b0] sm:$0xff] }
 0x4d3   :  { %3100 = vmatpush2.msra.mxu0 %v2707_v3  ;;  %3213 = vmatpush2.msra.mxu1 %v2771_v20  ;;  %v2476_v3 = vpop.f32.mrf.mxu1  ;;  %v2519_v20 = vmax.f32 %v2459_v49, 0.0  ;;  %v3341_v49 = vld [vmem:[%s8390_s13 + $0x1e0] sm:$0xff] }
 0x4d4   :  { %3101 = vmatprep.subr.mxu0 %v2706_v1  ;;  %3214 = vmatprep.subr.mxu1 %v2770_v63  ;;  %v2526_v1 = vmax.f32 %v2354_v39, 0.0  ;;  %v2528_v63 = vmax.f32 %v2467_v41, 0.0  ;;  %v2541_v19 = vmax.f32 %v2364_v54, 0.0  ;;  %v3338_v39 = vld [vmem:[%s8390_s13 + $0x1c8] sm:$0xff]  ;;  %v3337_v41 = vld [vmem:[%s8390_s13 + $0x1c0] sm:$0xff]  ;;  %v3513_v54 = vld [vmem:[%s8392_s15 + $0xd8] sm:$0xff] }
 0x4d5   :  { %3102 = vmatpush2.msra.mxu0 %v2705_v50  ;;  %3215 = vmatpush2.msra.mxu1 %v2769_v33  ;;  %v2360_v50 = vadd.f32 %v2359_v17, %v7505_v7  ;;  %v2473_v33 = vadd.f32 %v2472_v57, %v7510_v9  ;;  %v2478_v56 = vpop.f32.mrf.mxu1  ;;  %v3283_v17 = vld [vmem:[%s8390_s13 + $0x10] sm:$0xff]  ;;  %v3282_v57 = vld [vmem:[%s8390_s13 + $0x8] sm:$0xff] }
 0x4d6   :  { %3104 = vmatmul.mubr.f32.vlgmr.msra.gmra.mxu0 %v2485_v44  ;;  %3217 = vmatmul.mubr.f32.vlgmr.msra.gmra.mxu1 %v2487_v15  ;;  %v3304_v44 = vld [vmem:[%s8390_s13 + $0xb8] sm:$0xff]  ;;  %v2365_v15 = vpop.f32.mrf.mxu0  ;;  %v2479_v36 = vadd.f32 %v2478_v56, %v7510_v9  ;;  %v3322_v56 = vld [vmem:[%s8390_s13 + $0x148] sm:$0xff] }
 0x4d7   :  { %3109 = vmatprep.mubr.f32.mxu0 %v2494_v43  ;;  %3222 = vmatprep.mubr.f32.mxu1 %v2496_v59  ;;  %v2358_v43 = vadd.f32 %v7813_v26, %v7723_v47  ;;  %v2471_v59 = vadd.f32 %v7815_v34, %v7728_v46  ;;  %v2534_v18 = vmax.f32 %v2360_v50, 0.0  ;;  %v2536_v27 = vmax.f32 %v2473_v33, 0.0  ;;  %v3295_v26 = vld [vmem:[%s8390_s13 + $0x70] sm:$0xff]  ;;  %v3294_v34 = vld [vmem:[%s8390_s13 + $0x68] sm:$0xff]  ;;  %v3325_v33 = vld [vmem:[%s8390_s13 + $0x160] sm:$0xff] }
 0x4d8   :  { %3357 = vmatprep.subr.mxu0 %v3312_v60  ;;  %v2366_v61 = vadd.f32 %v2365_v15, %v7505_v7  ;;  %v3302_v60 = vld [vmem:[%s8390_s13 + $0xa8] sm:$0xff]  ;;  %v2477_v7 = vadd.f32 %v2476_v3, %v7728_v46  ;;  %v3323_v15 = vld [vmem:[%s8390_s13 + $0x150] sm:$0xff] }
 0x4d9   :  { %3358 = vmatpush1.msra.mxu0 %v3311_v4  ;;  %v2535_v30 = vmax.f32 %v2471_v59, 0.0  ;;  %v2544_v4 = vmax.f32 %v2479_v36, 0.0  ;;  %v3298_v46 = vld [vmem:[%s8390_s13 + $0x88] sm:$0xff]  ;;  %v3317_v59 = vld [vmem:[%s8390_s13 + $0x120] sm:$0xff] }
 0x4da   :  { %3110 = vmatmul.mubr.f32.gmra.mxu0 %v2493_v29  ;;  %3223 = vmatmul.mubr.f32.gmra.mxu1 %v2495_v13  ;;  %v3301_v29 = vld [vmem:[%s8390_s13 + $0xa0] sm:$0xff]  ;;  %v2533_v13 = vmax.f32 %v2358_v43, 0.0  ;;  %v2542_v9 = vmax.f32 %v2366_v61, 0.0  ;;  %v2543_v47 = vmax.f32 %v2477_v7, 0.0  ;;  %v3334_v3 = vld [vmem:[%s8390_s13 + $0x1a8] sm:$0xff]  ;;  %v3512_v7 = vld [vmem:[%s8392_s15 + $0xd0] sm:$0xff] }
 0x4db   :  { %3115 = vmatprep.mubr.f32.mxu0 %v2502_v51  ;;  %3228 = vmatprep.mubr.f32.mxu1 %v2504_v28  ;;  %v3300_v51 = vld [vmem:[%s8390_s13 + $0x98] sm:$0xff]  ;;  %v3299_v28 = vld [vmem:[%s8390_s13 + $0x90] sm:$0xff]  ;;  %v3326_v50 = vld [vmem:[%s8390_s13 + $0x168] sm:$0xff] }
 0x4dc   :  { %3359 = vmatprep.subr.mxu0 %v3310_v52  ;;  %v3296_v52 = vld [vmem:[%s8390_s13 + $0x78] sm:$0xff]  ;;  %v3318_v43 = vld [vmem:[%s8390_s13 + $0x128] sm:$0xff]  ;;  %v3313_v36 = vld [vmem:[%s8390_s13 + $0x100] sm:$0xff] }
 0x4dd   :  { %3360 = vmatpush1.msra.mxu0 %v3309_v37  ;;  %v3289_v37 = vld [vmem:[%s8390_s13 + $0x40] sm:$0xff]  ;;  %v3314_v61 = vld [vmem:[%s8390_s13 + $0x108] sm:$0xff] }
 0x4de   :  { %3116 = vmatmul.mubr.f32.gmra.mxu0 %v2501_v31  ;;  %3229 = vmatmul.mubr.f32.gmra.mxu1 %v2503_v16  ;;  %v3293_v31 = vld [vmem:[%s8390_s13 + $0x60] sm:$0xff]  ;;  %v3292_v16 = vld [vmem:[%s8390_s13 + $0x58] sm:$0xff] }
 0x4df   :  { %3121 = vmatprep.mubr.f32.mxu0 %v2510_v32  ;;  %3234 = vmatprep.mubr.f32.mxu1 %v2512_v8  ;;  %v3288_v32 = vld [vmem:[%s8390_s13 + $0x38] sm:$0xff]  ;;  %v3287_v8 = vld [vmem:[%s8390_s13 + $0x30] sm:$0xff] }
 0x4e0   :  { %3361 = vmatprep.subr.mxu0 %v3308_v5  ;;  %v3284_v5 = vld [vmem:[%s8390_s13 + $0x18] sm:$0xff] }
 0x4e1   :  { %3362 = vmatpush1.msra.mxu0 %v3307_v24  ;;  %v3281_v24 = vld [vmem:[%s8390_s13] sm:$0xff] }
 0x4e2   :  { %3122 = vmatmul.mubr.f32.gmra.mxu0 %v2509_v40  ;;  %3235 = vmatmul.mubr.f32.gmra.mxu1 %v2511_v11  ;;  %v3344_v40 = vld [vmem:[%s8390_s13 + $0x1f8] sm:$0xff]  ;;  %v3343_v11 = vld [vmem:[%s8390_s13 + $0x1f0] sm:$0xff] }
 0x4e3   :  { %3127 = vmatprep.mubr.f32.mxu0 %v2518_v35  ;;  %3240 = vmatprep.mubr.f32.mxu1 %v2520_v38  ;;  %v3340_v35 = vld [vmem:[%s8390_s13 + $0x1d8] sm:$0xff]  ;;  %v3339_v38 = vld [vmem:[%s8390_s13 + $0x1d0] sm:$0xff] }
 0x4e4   :  { %3363 = vmatprep.subr.mxu0 %v3306_v23  ;;  %v3336_v23 = vld [vmem:[%s8390_s13 + $0x1b8] sm:$0xff] }
 0x4e5   :  { %3364 = vmatpush1.msra.mxu0 %v3305_v25  ;;  %v3333_v25 = vld [vmem:[%s8390_s13 + $0x1a0] sm:$0xff] }
 0x4e6   :  { %3128 = vmatmul.mubr.f32.gmra.mxu0 %v2517_v0  ;;  %3241 = vmatmul.mubr.f32.gmra.mxu1 %v2519_v20  ;;  %v3332_v0 = vld [vmem:[%s8390_s13 + $0x198] sm:$0xff]  ;;  %v3331_v20 = vld [vmem:[%s8390_s13 + $0x190] sm:$0xff] }
 0x4e7   :  { %3133 = vmatprep.mubr.f32.mxu0 %v2526_v1  ;;  %3246 = vmatprep.mubr.f32.mxu1 %v2528_v63  ;;  %v3328_v1 = vld [vmem:[%s8390_s13 + $0x178] sm:$0xff]  ;;  %v3327_v63 = vld [vmem:[%s8390_s13 + $0x170] sm:$0xff] }
 0x4e8   :  { %3365 = vmatprep.subr.mxu0 %v3304_v44  ;;  %v3324_v44 = vld [vmem:[%s8390_s13 + $0x158] sm:$0xff] }
 0x4e9   :  { %3366 = vmatpush1.msra.mxu0 %v3303_v53  ;;  %v3321_v53 = vld [vmem:[%s8390_s13 + $0x140] sm:$0xff] }
 0x4ea   :  { %3134 = vmatmul.mubr.f32.gmra.mxu0 %v2525_v22  ;;  %3247 = vmatmul.mubr.f32.gmra.mxu1 %v2527_v6  ;;  %v3320_v22 = vld [vmem:[%s8390_s13 + $0x138] sm:$0xff]  ;;  %v3319_v6 = vld [vmem:[%s8390_s13 + $0x130] sm:$0xff] }
 0x4eb   :  { %3139 = vmatprep.mubr.f32.mxu0 %v2534_v18  ;;  %3252 = vmatprep.mubr.f32.mxu1 %v2536_v27  ;;  %v3316_v18 = vld [vmem:[%s8390_s13 + $0x118] sm:$0xff]  ;;  %v3315_v27 = vld [vmem:[%s8390_s13 + $0x110] sm:$0xff] }
 0x4ec   :  { %3367 = vmatprep.subr.mxu0 %v3302_v60  ;;  %v3517_v60 = vld [vmem:[%s8392_s15 + $0xf8] sm:$0xff] }
 0x4ed   :  { %3368 = vmatpush1.msra.mxu0 %v3301_v29  ;;  %v3516_v29 = vld [vmem:[%s8392_s15 + $0xf0] sm:$0xff]  ;;  %3562 = vmatprep.subr.mxu1 %v3517_v60  ;;  %v3531_v60 = vld [vmem:[%s8392_s15 + $0x168] sm:$0xff] }
 0x4ee   :  { %3140 = vmatmul.mubr.f32.gmra.mxu0 %v2533_v13  ;;  %3253 = vmatmul.mubr.f32.gmra.mxu1 %v2535_v30  ;;  %v3515_v13 = vld [vmem:[%s8392_s15 + $0xe8] sm:$0xff]  ;;  %v3514_v30 = vld [vmem:[%s8392_s15 + $0xe0] sm:$0xff] }
 0x4ef   :  { %3145 = vmatprep.mubr.f32.mxu0 %v2542_v9  ;;  %3258 = vmatprep.mubr.f32.mxu1 %v2544_v4  ;;  %v3511_v9 = vld [vmem:[%s8392_s15 + $0xc8] sm:$0xff]  ;;  %v3510_v4 = vld [vmem:[%s8392_s15 + $0xc0] sm:$0xff] }
 0x4f0   :  { %3369 = vmatprep.subr.mxu0 %v3300_v51  ;;  %3563 = vmatpush1.msra.mxu1 %v3516_v29  ;;  %v3509_v51 = vld [vmem:[%s8392_s15 + $0xb8] sm:$0xff]  ;;  %v3530_v29 = vld [vmem:[%s8392_s15 + $0x160] sm:$0xff] }
 0x4f1   :  { %3370 = vmatpush1.msra.mxu0 %v3299_v28  ;;  %3564 = vmatprep.subr.mxu1 %v3515_v13  ;;  %v3508_v28 = vld [vmem:[%s8392_s15 + $0xb0] sm:$0xff]  ;;  %v3529_v13 = vld [vmem:[%s8392_s15 + $0x158] sm:$0xff] }
 0x4f2   :  { %3146 = vmatmul.mubr.f32.gmra.mxu0 %v2541_v19  ;;  %3259 = vmatmul.mubr.f32.gmra.mxu1 %v2543_v47  ;;  %v3507_v19 = vld [vmem:[%s8392_s15 + $0xa8] sm:$0xff]  ;;  %v3506_v47 = vld [vmem:[%s8392_s15 + $0xa0] sm:$0xff] }
 0x4f3   :  { %3371 = vmatprep.subr.mxu0 %v3298_v46  ;;  %3565 = vmatpush1.msra.mxu1 %v3514_v30  ;;  %v3505_v46 = vld [vmem:[%s8392_s15 + $0x98] sm:$0xff]  ;;  %v3528_v30 = vld [vmem:[%s8392_s15 + $0x150] sm:$0xff] }
 0x4f4   :  { %3372 = vmatpush1.msra.mxu0 %v3297_v48  ;;  %3566 = vmatprep.subr.mxu1 %v3513_v54  ;;  %v3504_v48 = vld [vmem:[%s8392_s15 + $0x90] sm:$0xff] }
 0x4f5   :  { %3373 = vmatprep.subr.mxu0 %v3296_v52  ;;  %3567 = vmatpush1.msra.mxu1 %v3512_v7  ;;  %v3503_v52 = vld [vmem:[%s8392_s15 + $0x88] sm:$0xff] }
 0x4f6   :  { %3374 = vmatpush1.msra.mxu0 %v3295_v26  ;;  %3568 = vmatprep.subr.mxu1 %v3511_v9  ;;  %v3502_v26 = vld [vmem:[%s8392_s15 + $0x80] sm:$0xff]  ;;  %v3527_v9 = vld [vmem:[%s8392_s15 + $0x148] sm:$0xff] }
 0x4f7   :  { %3375 = vmatprep.subr.mxu0 %v3294_v34  ;;  %3569 = vmatpush1.msra.mxu1 %v3510_v4  ;;  %v3501_v34 = vld [vmem:[%s8392_s15 + $0x78] sm:$0xff]  ;;  %v3526_v4 = vld [vmem:[%s8392_s15 + $0x140] sm:$0xff] }
 0x4f8   :  { %3376 = vmatpush1.msra.mxu0 %v3293_v31  ;;  %3570 = vmatprep.subr.mxu1 %v3509_v51  ;;  %v3500_v31 = vld [vmem:[%s8392_s15 + $0x70] sm:$0xff] }
 0x4f9   :  { %3377 = vmatprep.subr.mxu0 %v3292_v16  ;;  %3571 = vmatpush1.msra.mxu1 %v3508_v28  ;;  %v3499_v16 = vld [vmem:[%s8392_s15 + $0x68] sm:$0xff] }
 0x4fa   :  { %3378 = vmatpush1.msra.mxu0 %v3291_v62  ;;  %3572 = vmatprep.subr.mxu1 %v3507_v19  ;;  %v3498_v62 = vld [vmem:[%s8392_s15 + $0x60] sm:$0xff] }
 0x4fb   :  { %3379 = vmatprep.subr.mxu0 %v3290_v21  ;;  %3573 = vmatpush1.msra.mxu1 %v3506_v47  ;;  %v3497_v21 = vld [vmem:[%s8392_s15 + $0x58] sm:$0xff] }
 0x4fc   :  { %3380 = vmatpush1.msra.mxu0 %v3289_v37  ;;  %3574 = vmatprep.subr.mxu1 %v3505_v46  ;;  %v3496_v37 = vld [vmem:[%s8392_s15 + $0x50] sm:$0xff] }
 0x4fd   :  { %3381 = vmatprep.subr.mxu0 %v3288_v32  ;;  %3575 = vmatpush1.msra.mxu1 %v3504_v48  ;;  %v3495_v32 = vld [vmem:[%s8392_s15 + $0x48] sm:$0xff] }
 0x4fe   :  { %3382 = vmatpush1.msra.mxu0 %v3287_v8  ;;  %3576 = vmatprep.subr.mxu1 %v3503_v52  ;;  %v3494_v8 = vld [vmem:[%s8392_s15 + $0x40] sm:$0xff] }
 0x4ff   :  { %3383 = vmatprep.subr.mxu0 %v3286_v10  ;;  %3577 = vmatpush1.msra.mxu1 %v3502_v26  ;;  %v3493_v10 = vld [vmem:[%s8392_s15 + $0x38] sm:$0xff] }
 0x500   :  { %3384 = vmatpush1.msra.mxu0 %v3285_v45  ;;  %3578 = vmatprep.subr.mxu1 %v3501_v34  ;;  %v3492_v45 = vld [vmem:[%s8392_s15 + $0x30] sm:$0xff] }
 0x501   :  { %3385 = vmatprep.subr.mxu0 %v3284_v5  ;;  %3579 = vmatpush1.msra.mxu1 %v3500_v31  ;;  %v3491_v5 = vld [vmem:[%s8392_s15 + $0x28] sm:$0xff] }
 0x502   :  { %3386 = vmatpush1.msra.mxu0 %v3283_v17  ;;  %3580 = vmatprep.subr.mxu1 %v3499_v16  ;;  %v3490_v17 = vld [vmem:[%s8392_s15 + $0x20] sm:$0xff] }
 0x503   :  { %3387 = vmatprep.subr.mxu0 %v3282_v57  ;;  %3581 = vmatpush1.msra.mxu1 %v3498_v62  ;;  %v3489_v57 = vld [vmem:[%s8392_s15 + $0x18] sm:$0xff] }
 0x504   :  { %3388 = vmatpush1.msra.mxu0 %v3281_v24  ;;  %3582 = vmatprep.subr.mxu1 %v3497_v21  ;;  %v3488_v24 = vld [vmem:[%s8392_s15 + $0x10] sm:$0xff]  ;;  %v2801_v21 = vld [vmem:[%s8389_s12] sm:$0x3] }
 0x505   :  { %3389 = vmatprep.subr.mxu0 %v3344_v40  ;;  %3583 = vmatpush1.msra.mxu1 %v3496_v37 }
 0x506   :  { %3390 = vmatpush2.msra.mxu0 %v3343_v11  ;;  %3584 = vmatprep.subr.mxu1 %v3495_v32 }
 0x507   :  { %3391 = vmatprep.subr.mxu0 %v3342_v42  ;;  %3585 = vmatpush1.msra.mxu1 %v3494_v8  ;;  %v3487_v42 = vld [vmem:[%s8392_s15 + $0x8] sm:$0xff]  ;;  %v8246_v8 = vrot.slane %v2801_v21, %v5086_v12 }
 0x508   :  { %3392 = vmatpush2.msra.mxu0 %v3341_v49  ;;  %3586 = vmatprep.subr.mxu1 %v3493_v10  ;;  %v3486_v49 = vld [vmem:[%s8392_s15] sm:$0xff]  ;;  %v8249_v10 = vrot.slane %v2801_v21, %v5092_v14 }
 0x509   :  { %3393 = vmatprep.subr.mxu0 %v3340_v35  ;;  %3587 = vmatpush1.msra.mxu1 %v3492_v45  ;;  %v3549_v35 = vld [vmem:[%s8392_s15 + $0x1f8] sm:$0xff] }
 0x50a   :  { %3394 = vmatpush2.msra.mxu0 %v3339_v38  ;;  %3588 = vmatprep.subr.mxu1 %v3491_v5  ;;  %v3548_v38 = vld [vmem:[%s8392_s15 + $0x1f0] sm:$0xff] }
 0x50b   :  { %3395 = vmatprep.subr.mxu0 %v3338_v39  ;;  %3589 = vmatpush1.msra.mxu1 %v3490_v17 }
 0x50c   :  { %3396 = vmatpush2.msra.mxu0 %v3337_v41  ;;  %3590 = vmatprep.subr.mxu1 %v3489_v57 }
 0x50d   :  { %3397 = vmatprep.subr.mxu0 %v3336_v23  ;;  %3591 = vmatpush1.msra.mxu1 %v3488_v24  ;;  %v3547_v23 = vld [vmem:[%s8392_s15 + $0x1e8] sm:$0xff] }
 0x50e   :  { %3398 = vmatpush2.msra.mxu0 %v3335_v2  ;;  %3592 = vmatprep.subr.mxu1 %v3487_v42  ;;  %v3546_v2 = vld [vmem:[%s8392_s15 + $0x1e0] sm:$0xff] }
 0x50f   :  { %3399 = vmatprep.subr.mxu0 %v3334_v3  ;;  %3593 = vmatpush1.msra.mxu1 %v3486_v49  ;;  %v3545_v3 = vld [vmem:[%s8392_s15 + $0x1d8] sm:$0xff] }
 0x510   :  { %3400 = vmatpush2.msra.mxu0 %v3333_v25  ;;  %3594 = vmatprep.subr.mxu1 %v3549_v35  ;;  %v3544_v25 = vld [vmem:[%s8392_s15 + $0x1d0] sm:$0xff] }
 0x511   :  { %3401 = vmatprep.subr.mxu0 %v3332_v0  ;;  %3595 = vmatpush2.msra.mxu1 %v3548_v38 }
 0x512   :  { %3402 = vmatpush2.msra.mxu0 %v3331_v20  ;;  %3596 = vmatprep.subr.mxu1 %v3547_v23 }
 0x513   :  { %3403 = vmatprep.subr.mxu0 %v3330_v55  ;;  %3597 = vmatpush2.msra.mxu1 %v3546_v2  ;;  %v3543_v55 = vld [vmem:[%s8392_s15 + $0x1c8] sm:$0xff] }
 0x514   :  { %3404 = vmatpush2.msra.mxu0 %v3329_v58  ;;  %3598 = vmatprep.subr.mxu1 %v3545_v3  ;;  %v3542_v58 = vld [vmem:[%s8392_s15 + $0x1c0] sm:$0xff] }
 0x515   :  { %3405 = vmatprep.subr.mxu0 %v3328_v1  ;;  %3599 = vmatpush2.msra.mxu1 %v3544_v25  ;;  %v3541_v1 = vld [vmem:[%s8392_s15 + $0x1b8] sm:$0xff] }
 0x516   :  { %3406 = vmatpush2.msra.mxu0 %v3327_v63  ;;  %3600 = vmatprep.subr.mxu1 %v3543_v55  ;;  %v3540_v63 = vld [vmem:[%s8392_s15 + $0x1b0] sm:$0xff] }
 0x517   :  { %3407 = vmatprep.subr.mxu0 %v3326_v50  ;;  %3601 = vmatpush2.msra.mxu1 %v3542_v58 }
 0x518   :  { %3408 = vmatpush2.msra.mxu0 %v3325_v33  ;;  %3602 = vmatprep.subr.mxu1 %v3541_v1 }
 0x519   :  { %3409 = vmatprep.subr.mxu0 %v3324_v44  ;;  %v3539_v44 = vld [vmem:[%s8392_s15 + $0x1a8] sm:$0xff]  ;;  %3603 = vmatpush2.msra.mxu1 %v3540_v63 }
 0x51a   :  { %3410 = vmatpush2.msra.mxu0 %v3323_v15  ;;  %v3538_v15 = vld [vmem:[%s8392_s15 + $0x1a0] sm:$0xff]  ;;  %3604 = vmatprep.subr.mxu1 %v3539_v44 }
 0x51b   :  { %3411 = vmatprep.subr.mxu0 %v3322_v56  ;;  %v3537_v56 = vld [vmem:[%s8392_s15 + $0x198] sm:$0xff]  ;;  %3605 = vmatpush2.msra.mxu1 %v3538_v15 }
 0x51c   :  { %3412 = vmatpush2.msra.mxu0 %v3321_v53  ;;  %v3536_v53 = vld [vmem:[%s8392_s15 + $0x190] sm:$0xff]  ;;  %3606 = vmatprep.subr.mxu1 %v3537_v56 }
 0x51d   :  { %3413 = vmatprep.subr.mxu0 %v3320_v22  ;;  %3607 = vmatpush2.msra.mxu1 %v3536_v53 }
 0x51e   :  { %3414 = vmatpush2.msra.mxu0 %v3319_v6 }
 0x51f   :  { %3415 = vmatprep.subr.mxu0 %v3318_v43  ;;  %v3535_v43 = vld [vmem:[%s8392_s15 + $0x188] sm:$0xff] }
 0x520   :  { %3416 = vmatpush2.msra.mxu0 %v3317_v59  ;;  %v3534_v59 = vld [vmem:[%s8392_s15 + $0x180] sm:$0xff]  ;;  %3608 = vmatprep.subr.mxu1 %v3535_v43 }
 0x521   :  { %3417 = vmatprep.subr.mxu0 %v3316_v18  ;;  %v3533_v18 = vld [vmem:[%s8392_s15 + $0x178] sm:$0xff]  ;;  %3609 = vmatpush2.msra.mxu1 %v3534_v59 }
 0x522   :  { %3418 = vmatpush2.msra.mxu0 %v3315_v27  ;;  %v3532_v27 = vld [vmem:[%s8392_s15 + $0x170] sm:$0xff]  ;;  %3610 = vmatprep.subr.mxu1 %v3533_v18 }
 0x523   :  { %3419 = vmatprep.subr.mxu0 %v3314_v61  ;;  %3611 = vmatpush2.msra.mxu1 %v3532_v27 }
 0x524   :  { %3420 = vmatpush2.msra.mxu0 %v3313_v36  ;;  %3612 = vmatprep.subr.mxu1 %v3531_v60 }
 0x525   :  { %3613 = vmatpush2.msra.mxu1 %v3530_v29 }
 0x526   :  { %3614 = vmatprep.subr.mxu1 %v3529_v13 }
 0x527   :  { %3615 = vmatpush2.msra.mxu1 %v3528_v30 }
 0x528   :  { %3616 = vmatprep.subr.mxu1 %v3527_v9 }
 0x529   :  { %3617 = vmatpush2.msra.mxu1 %v3526_v4 }
 0x547   :  { %v8118_v40 = vpop.f32.mrf.mxu0  ;;  %v8120_v11 = vpop.f32.mrf.mxu1 }
 0x548   :  { %v2880_v17 = vadd.f32 %v8118_v40, %v8246_v8 }
 0x549   :  { %v8134_v39 = vpop.f32.mrf.mxu0  ;;  %v8136_v41 = vpop.f32.mrf.mxu1 }
 0x54a   :  { %v2882_v57 = vadd.f32 %v8134_v39, %v8249_v10  ;;  %v2993_v49 = vadd.f32 %v8120_v11, %v2880_v17 }
 0x54c   :  { %v2995_v2 = vadd.f32 %v8136_v41, %v2882_v57 }
 0x54d   :  { %v8150_v0 = vpop.f32.mrf.mxu0  ;;  %v8152_v20 = vpop.f32.mrf.mxu1 }
 0x54e   :  { %v2886_v35 = vadd.f32 %v8150_v0, %v8246_v8 }
 0x54f   :  { %v8166_v50 = vpop.f32.mrf.mxu0  ;;  %v8168_v33 = vpop.f32.mrf.mxu1 }
 0x550   :  { %v2888_v3 = vadd.f32 %v8166_v50, %v8249_v10  ;;  %v2999_v39 = vadd.f32 %v8152_v20, %v2886_v35 }
 0x552   :  { %v3001_v0 = vadd.f32 %v8168_v33, %v2888_v3 }
 0x553   :  { %v2891_v22 = vpop.f32.mrf.mxu0  ;;  %v8182_v6 = vpop.f32.mrf.mxu1 }
 0x554   :  { %v2892_v58 = vadd.f32 %v2891_v22, %v8246_v8 }
 0x555   :  { %v2893_v61 = vpop.f32.mrf.mxu0  ;;  %v8196_v36 = vpop.f32.mrf.mxu1 }
 0x556   :  { %v2894_v15 = vadd.f32 %v2893_v61, %v8249_v10  ;;  %v3005_v50 = vadd.f32 %v8182_v6, %v2892_v58 }
 0x558   :  { %v3007_v13 = vadd.f32 %v8196_v36, %v2894_v15 }
 0x559   :  { %v2897_v54 = vpop.f32.mrf.mxu0  ;;  %v8210_v7 = vpop.f32.mrf.mxu1 }
 0x55a   :  { %v2898_v59 = vadd.f32 %v2897_v54, %v8246_v8 }
 0x55b   :  { %v2899_v51 = vpop.f32.mrf.mxu0  ;;  %v8218_v28 = vpop.f32.mrf.mxu1 }
 0x55c   :  { %v2900_v33 = vadd.f32 %v2899_v51, %v8249_v10  ;;  %v3011_v6 = vadd.f32 %v8210_v7, %v2898_v59 }
 0x55e   :  { %v3013_v36 = vadd.f32 %v8218_v28, %v2900_v33 }
 0x55f   :  { %v2903_v19 = vpop.f32.mrf.mxu0  ;;  %v8220_v47 = vpop.f32.mrf.mxu1 }
 0x560   :  { %v2904_v54 = vadd.f32 %v2903_v19, %v8246_v8 }
 0x561   :  { %v8222_v46 = vpop.f32.mrf.mxu0  ;;  %v8224_v48 = vpop.f32.mrf.mxu1 }
 0x562   :  { %v2906_v51 = vadd.f32 %v8222_v46, %v8249_v10  ;;  %v3017_v7 = vadd.f32 %v8220_v47, %v2904_v54 }
 0x565   :  { %v8226_v52 = vpop.f32.mrf.mxu0  ;;  %v8228_v26 = vpop.f32.mrf.mxu1 }
 0x566   :  { %v2910_v19 = vadd.f32 %v8226_v52, %v8246_v8 }
 0x567   :  { %v8230_v34 = vpop.f32.mrf.mxu0  ;;  %v8232_v31 = vpop.f32.mrf.mxu1 }
 0x568   :  { %v2912_v46 = vadd.f32 %v8230_v34, %v8249_v10  ;;  %v3023_v47 = vadd.f32 %v8228_v26, %v2910_v19  ;;  %v3523_v19 = vld [vmem:[%s8392_s15 + $0x128] sm:$0xff] }
 0x56a   :  { %v3025_v59 = vadd.f32 %v8232_v31, %v2912_v46 }
 0x56b   :  { %v8234_v16 = vpop.f32.mrf.mxu0  ;;  %v8236_v62 = vpop.f32.mrf.mxu1 }
 0x56c   :  { %v2916_v52 = vadd.f32 %v8234_v16, %v8246_v8 }
 0x56d   :  { %v8241_v37 = vpop.f32.mrf.mxu0  ;;  %v8243_v32 = vpop.f32.mrf.mxu1 }
 0x56e   :  { %v2918_v34 = vadd.f32 %v8241_v37, %v8249_v10  ;;  %v3029_v26 = vadd.f32 %v8236_v62, %v2916_v52 }
 0x571   :  { %v8251_v45 = vpop.f32.mrf.mxu0  ;;  %v8253_v5 = vpop.f32.mrf.mxu1 }
 0x572   :  { %v2922_v16 = vadd.f32 %v8251_v45, %v8246_v8 }
 0x573   :  { %v8259_v24 = vpop.f32.mrf.mxu0  ;;  %v8261_v42 = vpop.f32.mrf.mxu1 }
 0x574   :  { %v2924_v37 = vadd.f32 %v8259_v24, %v8249_v10  ;;  %v3035_v62 = vadd.f32 %v8253_v5, %v2922_v16 }
 0x596   :  { %v3105_v38 = vpop.f32.mrf.mxu0  ;;  %v3218_v23 = vpop.f32.mrf.mxu1 }
 0x597   :  { %v3106_v40 = vadd.f32 %v3105_v38, %v2993_v49 }
 0x598   :  { %v3107_v25 = vpop.f32.mrf.mxu0  ;;  %v3220_v55 = vpop.f32.mrf.mxu1 }
 0x599   :  { %v3108_v1 = vadd.f32 %v3107_v25, %v2995_v2  ;;  %v3219_v63 = vadd.f32 %v3218_v23, %v3106_v40 }
 0x59a   :  { %v3111_v11 = vpop.f32.mrf.mxu0  ;;  %v3224_v44 = vpop.f32.mrf.mxu1 }
 0x59b   :  { %v3221_v56 = vadd.f32 %v3220_v55, %v3108_v1  ;;  %v3112_v41 = vadd.f32 %v3111_v11, %v2999_v39  ;;  %v3265_v27 = vmax.f32 %v3219_v63, 0.0  ;;  %v3019_v63 = vadd.f32 %v8224_v48, %v2906_v51 }
 0x59c   :  { %v3113_v53 = vpop.f32.mrf.mxu0  ;;  %v3226_v43 = vpop.f32.mrf.mxu1 }
 0x59d   :  { %v3266_v18 = vmax.f32 %v3221_v56, 0.0  ;;  %v3114_v20 = vadd.f32 %v3113_v53, %v3001_v0  ;;  %v3225_v22 = vadd.f32 %v3224_v44, %v3112_v41 }
 0x59e   :  { %v3117_v60 = vpop.f32.mrf.mxu0  ;;  %v3230_v29 = vpop.f32.mrf.mxu1 }
 0x59f   :  { %v3227_v30 = vadd.f32 %v3226_v43, %v3114_v20  ;;  %v3118_v61 = vadd.f32 %v3117_v60, %v3005_v50  ;;  %3421 = vmatprep.mubr.f32.mxu0 %v3266_v18  ;;  %v3267_v57 = vmax.f32 %v3225_v22, 0.0 }
 0x5a0   :  { %v3119_v9 = vpop.f32.mrf.mxu0  ;;  %v3232_v4 = vpop.f32.mrf.mxu1  ;;  %3422 = vmatmul.mubr.f32.vlgmr.msra.gmra.mxu0 %v3265_v27 }
 0x5a1   :  { %v3268_v21 = vmax.f32 %v3227_v30, 0.0  ;;  %v3120_v17 = vadd.f32 %v3119_v9, %v3007_v13  ;;  %v3231_v49 = vadd.f32 %v3230_v29, %v3118_v61  ;;  %v3031_v61 = vadd.f32 %v8243_v32, %v2918_v34 }
 0x5a2   :  { %v3123_v35 = vpop.f32.mrf.mxu0  ;;  %v3236_v38 = vpop.f32.mrf.mxu1 }
 0x5a3   :  { %v3233_v23 = vadd.f32 %v3232_v4, %v3120_v17  ;;  %v3124_v2 = vadd.f32 %v3123_v35, %v3011_v6  ;;  %3427 = vmatprep.mubr.f32.mxu0 %v3268_v21  ;;  %v3269_v39 = vmax.f32 %v3231_v49, 0.0  ;;  %v3037_v35 = vadd.f32 %v8261_v42, %v2924_v37  ;;  %v3525_v42 = vld [vmem:[%s8392_s15 + $0x138] sm:$0xff] }
 0x5a4   :  { %v3125_v3 = vpop.f32.mrf.mxu0  ;;  %v3238_v40 = vpop.f32.mrf.mxu1  ;;  %3428 = vmatmul.mubr.f32.gmra.mxu0 %v3267_v57  ;;  %3618 = vmatprep.subr.mxu1 %v3525_v42 }
 0x5a5   :  { %v3270_v25 = vmax.f32 %v3233_v23, 0.0  ;;  %v3126_v55 = vadd.f32 %v3125_v3, %v3013_v36  ;;  %v3237_v58 = vadd.f32 %v3236_v38, %v3124_v2 }
 0x5a6   :  { %v3129_v1 = vpop.f32.mrf.mxu0  ;;  %v3242_v28 = vpop.f32.mrf.mxu1 }
 0x5a7   :  { %v3239_v11 = vadd.f32 %v3238_v40, %v3126_v55  ;;  %v3130_v44 = vadd.f32 %v3129_v1, %v3017_v7  ;;  %3433 = vmatprep.mubr.f32.mxu0 %v3270_v25  ;;  %v3271_v53 = vmax.f32 %v3237_v58, 0.0  ;;  %v3524_v7 = vld [vmem:[%s8392_s15 + $0x130] sm:$0xff]  ;;  %v3522_v25 = vld [vmem:[%s8392_s15 + $0x120] sm:$0xff]  ;;  %v3521_v55 = vld [vmem:[%s8392_s15 + $0x118] sm:$0xff] }
 0x5a8   :  { %v3131_v0 = vpop.f32.mrf.mxu0  ;;  %v3244_v15 = vpop.f32.mrf.mxu1  ;;  %3434 = vmatmul.mubr.f32.gmra.mxu0 %v3269_v39  ;;  %3619 = vmatpush2.msra.mxu1 %v3524_v7  ;;  %v3520_v39 = vld [vmem:[%s8392_s15 + $0x110] sm:$0xff]  ;;  %v3519_v58 = vld [vmem:[%s8392_s15 + $0x108] sm:$0xff]  ;;  %v3518_v1 = vld [vmem:[%s8392_s15 + $0x100] sm:$0xff] }
 0x5a9   :  { %v3272_v56 = vmax.f32 %v3239_v11, 0.0  ;;  %v3132_v41 = vadd.f32 %v3131_v0, %v3019_v63  ;;  %v3243_v43 = vadd.f32 %v3242_v28, %v3130_v44  ;;  %3620 = vmatprep.subr.mxu1 %v3523_v19  ;;  %v3345_v28 = vld [vmem:[%s8391_s14] sm:$0x3]  ;;  %s4359_s14 = smov [#allocation4]  }
 0x5aa   :  { %v3135_v50 = vpop.f32.mrf.mxu0  ;;  %v3248_v48 = vpop.f32.mrf.mxu1  ;;  %3621 = vmatpush2.msra.mxu1 %v3522_v25  ;;  %v3350_v63 = vrot.slane %v3345_v28, %v5086_v12  ;;  %v3354_v46 = vrot.slane %v3345_v28, %v5092_v14  ;;  %s3908_s15 = sshll.u32 %s4359_s14, 4  ;;  %s3909_s15 = int_to_ptr.vmem [resolvable:$true] %s3908_s15 }
 0x5ab   :  { %v3245_v18 = vadd.f32 %v3244_v15, %v3132_v41  ;;  %v3136_v20 = vadd.f32 %v3135_v50, %v3023_v47  ;;  %3439 = vmatprep.mubr.f32.mxu0 %v3272_v56  ;;  %v3273_v13 = vmax.f32 %v3243_v43, 0.0  ;;  %3622 = vmatprep.subr.mxu1 %v3521_v55  ;;  %s4272_s7 = scalar_lea.vmem %s3909_s15, 2048  ;;  %p4277_p1 = scmp.lt.s32.totalorder %s3909_s15, %s3909_s15 }
 0x5ac   :  { %v3137_v27 = vpop.f32.mrf.mxu0  ;;  %v3250_v22 = vpop.f32.mrf.mxu1  ;;  %3440 = vmatmul.mubr.f32.gmra.mxu0 %v3271_v53  ;;  %3623 = vmatpush2.msra.mxu1 %v3520_v39  ;;  %p4273_p0 = scmp.ne.s32.totalorder %s3909_s15, %s4272_s7  ;;  %p4278_p2 = scmp.lt.s32.totalorder %s4272_s7, %s4272_s7 }
 0x5ad   :  { %v3274_v60 = vmax.f32 %v3245_v18, 0.0  ;;  %v3138_v29 = vadd.f32 %v3137_v27, %v3025_v59  ;;  %v3249_v33 = vadd.f32 %v3248_v48, %v3136_v20  ;;  %3624 = vmatprep.subr.mxu1 %v3519_v58 }
 0x5ae   :  { %v3141_v30 = vpop.f32.mrf.mxu0  ;;  %v3254_v31 = vpop.f32.mrf.mxu1  ;;  %3625 = vmatpush2.msra.mxu1 %v3518_v1  ;;  %p4279_p3 = por %p4278_p2, %p4277_p1 }
 0x5af   :  { %v3251_v9 = vadd.f32 %v3250_v22, %v3138_v29  ;;  %v3142_v4 = vadd.f32 %v3141_v30, %v3029_v26  ;;  %3445 = vmatprep.mubr.f32.mxu0 %v3274_v60  ;;  %v3275_v21 = vmax.f32 %v3249_v33, 0.0 }
 0x5b0   :  { %v3143_v6 = vpop.f32.mrf.mxu0  ;;  %v3256_v54 = vpop.f32.mrf.mxu1  ;;  %3446 = vmatmul.mubr.f32.gmra.mxu0 %v3273_v13  ;;  %p4280_p4 = pnand %p4279_p3, %p4273_p0 }
 0x5b1   :  { %v3276_v8 = vmax.f32 %v3251_v9, 0.0  ;;  %v3144_v45 = vadd.f32 %v3143_v6, %v3031_v61  ;;  %v3255_v17 = vadd.f32 %v3254_v31, %v3142_v4 }
 0x5b2   :  { %v3147_v57 = vpop.f32.mrf.mxu0  ;;  %v3260_v49 = vpop.f32.mrf.mxu1 }
 0x5b3   :  { %v3257_v32 = vadd.f32 %v3256_v54, %v3144_v45  ;;  %v3148_v38 = vadd.f32 %v3147_v57, %v3035_v62  ;;  %3451 = vmatprep.mubr.f32.mxu0 %v3276_v8  ;;  %v3277_v51 = vmax.f32 %v3255_v17, 0.0 }
 0x5b4   :  { %v3149_v10 = vpop.f32.mrf.mxu0  ;;  %3452 = vmatmul.mubr.f32.gmra.mxu0 %v3275_v21  ;;  %v3262_v2 = vpop.f32.mrf.mxu1 }
 0x5b5   :  { %v3278_v24 = vmax.f32 %v3257_v32, 0.0  ;;  %v3150_v36 = vadd.f32 %v3149_v10, %v3037_v35  ;;  %v3261_v23 = vadd.f32 %v3260_v49, %v3148_v38 }
 0x5b7   :  { %v3263_v3 = vadd.f32 %v3262_v2, %v3150_v36  ;;  %3457 = vmatprep.mubr.f32.mxu0 %v3278_v24  ;;  %v3279_v40 = vmax.f32 %v3261_v23, 0.0 }
 0x5b8   :  { %3458 = vmatmul.mubr.f32.gmra.mxu0 %v3277_v51 }
 0x5b9   :  { %v3280_v5 = vmax.f32 %v3263_v3, 0.0 }
 0x5bb   :  { %3463 = vmatprep.mubr.f32.mxu0 %v3280_v5 }
 0x5bc   :  { %3464 = vmatmul.mubr.f32.gmra.mxu0 %v3279_v40 }
 0x660   :  { %v3423_v11 = vpop.f32.mrf.mxu0 }
 0x661   :  { %v3424_v44 = vadd.f32 %v3423_v11, %v3350_v63 }
 0x662   :  { %v3425_v0 = vpop.f32.mrf.mxu0 }
 0x663   :  { %v3426_v15 = vadd.f32 %v3425_v0, %v3354_v46  ;;  %v3470_v56 = vmax.f32 %v3424_v44, 0.0 }
 0x664   :  { %v3429_v47 = vpop.f32.mrf.mxu0 }
 0x665   :  { %v3471_v52 = vmax.f32 %v3426_v15, 0.0  ;;  %v3430_v41 = vadd.f32 %v3429_v47, %v3350_v63 }
 0x666   :  { %v3431_v53 = vpop.f32.mrf.mxu0 }
 0x667   :  { %v3432_v43 = vadd.f32 %v3431_v53, %v3354_v46  ;;  %3626 = vmatprep.mubr.f32.mxu1 %v3471_v52  ;;  %v3472_v59 = vmax.f32 %v3430_v41, 0.0 }
 0x668   :  { %v3435_v50 = vpop.f32.mrf.mxu0  ;;  %3627 = vmatmul.mubr.f32.vlgmr.msra.gmra.mxu1 %v3470_v56 }
 0x669   :  { %v3473_v48 = vmax.f32 %v3432_v43, 0.0  ;;  %v3436_v34 = vadd.f32 %v3435_v50, %v3350_v63 }
 0x66a   :  { %v3437_v18 = vpop.f32.mrf.mxu0 }
 0x66b   :  { %v3438_v20 = vadd.f32 %v3437_v18, %v3354_v46  ;;  %3632 = vmatprep.mubr.f32.mxu1 %v3473_v48  ;;  %v3474_v26 = vmax.f32 %v3436_v34, 0.0 }
 0x66c   :  { %v3441_v27 = vpop.f32.mrf.mxu0  ;;  %3633 = vmatmul.mubr.f32.gmra.mxu1 %v3472_v59 }
 0x66d   :  { %v3475_v22 = vmax.f32 %v3438_v20, 0.0  ;;  %v3442_v16 = vadd.f32 %v3441_v27, %v3350_v63 }
 0x66e   :  { %v3443_v60 = vpop.f32.mrf.mxu0 }
 0x66f   :  { %v3444_v29 = vadd.f32 %v3443_v60, %v3354_v46  ;;  %3638 = vmatprep.mubr.f32.mxu1 %v3475_v22  ;;  %v3476_v30 = vmax.f32 %v3442_v16, 0.0 }
 0x670   :  { %v3447_v13 = vpop.f32.mrf.mxu0  ;;  %3639 = vmatmul.mubr.f32.gmra.mxu1 %v3474_v26 }
 0x671   :  { %v3477_v33 = vmax.f32 %v3444_v29, 0.0  ;;  %v3448_v31 = vadd.f32 %v3447_v13, %v3350_v63 }
 0x672   :  { %v3449_v61 = vpop.f32.mrf.mxu0 }
 0x673   :  { %v3450_v37 = vadd.f32 %v3449_v61, %v3354_v46  ;;  %3644 = vmatprep.mubr.f32.mxu1 %v3477_v33  ;;  %v3478_v6 = vmax.f32 %v3448_v31, 0.0 }
 0x674   :  { %v3453_v9 = vpop.f32.mrf.mxu0  ;;  %3645 = vmatmul.mubr.f32.gmra.mxu1 %v3476_v30 }
 0x675   :  { %v3479_v4 = vmax.f32 %v3450_v37, 0.0  ;;  %v3454_v54 = vadd.f32 %v3453_v9, %v3350_v63 }
 0x676   :  { %v3455_v62 = vpop.f32.mrf.mxu0 }
 0x677   :  { %v3456_v8 = vadd.f32 %v3455_v62, %v3354_v46  ;;  %3650 = vmatprep.mubr.f32.mxu1 %v3479_v4  ;;  %v3480_v17 = vmax.f32 %v3454_v54, 0.0 }
 0x678   :  { %v3459_v45 = vpop.f32.mrf.mxu0  ;;  %3651 = vmatmul.mubr.f32.gmra.mxu1 %v3478_v6 }
 0x679   :  { %v3481_v21 = vmax.f32 %v3456_v8, 0.0  ;;  %v3460_v57 = vadd.f32 %v3459_v45, %v3350_v63 }
 0x67a   :  { %v3461_v49 = vpop.f32.mrf.mxu0 }
 0x67b   :  { %v3462_v35 = vadd.f32 %v3461_v49, %v3354_v46  ;;  %3656 = vmatprep.mubr.f32.mxu1 %v3481_v21  ;;  %v3482_v10 = vmax.f32 %v3460_v57, 0.0 }
 0x67c   :  { %v3465_v32 = vpop.f32.mrf.mxu0  ;;  %3657 = vmatmul.mubr.f32.gmra.mxu1 %v3480_v17 }
 0x67d   :  { %v3483_v38 = vmax.f32 %v3462_v35, 0.0  ;;  %v3466_v24 = vadd.f32 %v3465_v32, %v3350_v63 }
 0x67e   :  { %v3467_v36 = vpop.f32.mrf.mxu0 }
 0x67f   :  { %v3468_v51 = vadd.f32 %v3467_v36, %v3354_v46  ;;  %3662 = vmatprep.mubr.f32.mxu1 %v3483_v38  ;;  %v3484_v2 = vmax.f32 %v3466_v24, 0.0 }
 0x680   :  { %3663 = vmatmul.mubr.f32.gmra.mxu1 %v3482_v10 }
 0x681   :  { %v3485_v23 = vmax.f32 %v3468_v51, 0.0 }
 0x683   :  { %3668 = vmatprep.mubr.f32.mxu1 %v3485_v23 }
 0x684   :  { %3669 = vmatmul.mubr.f32.gmra.mxu1 %v3484_v2 }
 0x685   :  { %4283 = shalt.err (!%p4280_p4)
}
 0x686   :  { %s4360_s29 = smov 256   ;;  %s4361_s0 = smov 16  }
 0x687   :  { %3914 = dma.vmem_to_hbm [thread:$0]  %s3909_s15, 2048, %s8395_s18, [#allocation5], %s4360_s29, %s4360_s29, %s4361_s0  }
 0x688   :  { %s4362_s6 = smov [#allocation6]   ;;  %s4363_s23 = smov [#allocation7]  }
 0x689   :  { %s3920_s12 = sshll.u32 %s4362_s6, 4  ;;  %s3932_s1 = sshll.u32 %s4363_s23, 4  ;;  %s3921_s12 = int_to_ptr.vmem [resolvable:$true] %s3920_s12  ;;  %s3933_s1 = int_to_ptr.vmem [resolvable:$true] %s3932_s1 }
 0x68a   :  { %s4292_s24 = scalar_lea.vmem %s3921_s12, 2048  ;;  %p4297_p6 = scmp.lt.s32.totalorder %s3921_s12, %s3921_s12 }
 0x68b   :  { %p4293_p5 = scmp.ne.s32.totalorder %s3921_s12, %s4292_s24  ;;  %p4298_p7 = scmp.lt.s32.totalorder %s4292_s24, %s4292_s24 }
 0x68d   :  { %p4299_p8 = por %p4298_p7, %p4297_p6 }
 0x68f   :  { %p4300_p9 = pnand %p4299_p8, %p4293_p5 }
 0x691   :  { %4303 = shalt.err (!%p4300_p9)
}
 0x692   :  { %3926 = dma.vmem_to_hbm [thread:$0]  %s3921_s12, 2048, %s8396_s19, [#allocation5], %s4360_s29, %s4360_s29, %s4361_s0  }
 0x693   :  { %s4312_s18 = scalar_lea.vmem %s3933_s1, 8192  ;;  %p4317_p11 = scmp.lt.s32.totalorder %s3933_s1, %s3933_s1 }
 0x694   :  { %p4313_p10 = scmp.ne.s32.totalorder %s3933_s1, %s4312_s18  ;;  %p4318_p12 = scmp.lt.s32.totalorder %s4312_s18, %s4312_s18 }
 0x696   :  { %p4319_p13 = por %p4318_p12, %p4317_p11 }
 0x698   :  { %p4320_p0 = pnand %p4319_p13, %p4313_p10 }
 0x69a   :  { %4323 = shalt.err (!%p4320_p0)
}
 0x69b   :  { %s4364_s11 = smov 1024   ;;  %s4365_s10 = smov 64   ;;  %v3550_v3 = vld [vmem:[%s8393_s16] sm:$0x3] }
 0x69c   :  { %3938 = dma.vmem_to_hbm [thread:$0]  %s3933_s1, 8192, %s8397_s20, [#allocation8], %s4364_s11, %s4364_s11, %s4365_s10   ;;  %v8350_v5 = vrot.slane %v3550_v3, %v5086_v12  ;;  %v8353_v40 = vrot.slane %v3550_v3, %v5092_v14 }
 0x69d   :  { %s4366_s16 = smov [#allocation2]  }
 0x69e   :  { %s3896_s19 = sshll.u32 %s4366_s16, 4  ;;  %s3897_s19 = int_to_ptr.vmem [resolvable:$true] %s3896_s19 }
 0x69f   :  { %s4332_s20 = scalar_lea.vmem %s3897_s19, 2048  ;;  %p4337_p2 = scmp.lt.s32.totalorder %s3897_s19, %s3897_s19 }
 0x6a0   :  { %p4333_p1 = scmp.ne.s32.totalorder %s3897_s19, %s4332_s20  ;;  %p4338_p3 = scmp.lt.s32.totalorder %s4332_s20, %s4332_s20 }
 0x6a2   :  { %p4339_p4 = por %p4338_p3, %p4337_p2 }
 0x6a4   :  { %p4340_p5 = pnand %p4339_p4, %p4333_p1 }
 0x728   :  { %v3628_v42 = vpop.f32.mrf.mxu1 }
 0x729   :  { %v3629_v7 = vadd.f32 %v3628_v42, %v8350_v5 }
 0x72a   :  { %v3630_v19 = vpop.f32.mrf.mxu1 }
 0x72b   :  { %v3959_v25 = vmul.f32 -1.442695, %v3629_v7  ;;  %v3631_v55 = vadd.f32 %v3630_v19, %v8353_v40 }
 0x72c   :  { %v3634_v39 = vpop.f32.mrf.mxu1 }
 0x72d   :  { %4208 = vpow2.f32 %v3959_v25  ;;  %v3960_v58 = vmul.f32 -1.442695, %v3631_v55  ;;  %v3635_v1 = vadd.f32 %v3634_v39, %v8350_v5 }
 0x72e   :  { %v3636_v28 = vpop.f32.mrf.mxu1 }
 0x72f   :  { %4210 = vpow2.f32 %v3960_v58  ;;  %v3961_v63 = vmul.f32 -1.442695, %v3635_v1  ;;  %v3637_v12 = vadd.f32 %v3636_v28, %v8353_v40 }
 0x730   :  { %v3640_v46 = vpop.f32.mrf.mxu1 }
 0x731   :  { %4212 = vpow2.f32 %v3961_v63  ;;  %v3962_v14 = vmul.f32 -1.442695, %v3637_v12  ;;  %v3641_v11 = vadd.f32 %v3640_v46, %v8350_v5 }
 0x732   :  { %v3642_v44 = vpop.f32.mrf.mxu1 }
 0x733   :  { %4214 = vpow2.f32 %v3962_v14  ;;  %v3963_v0 = vmul.f32 -1.442695, %v3641_v11  ;;  %v3643_v15 = vadd.f32 %v3642_v44, %v8353_v40 }
 0x734   :  { %v3646_v47 = vpop.f32.mrf.mxu1 }
 0x735   :  { %4216 = vpow2.f32 %v3963_v0  ;;  %v3964_v52 = vmul.f32 -1.442695, %v3643_v15  ;;  %v3647_v56 = vadd.f32 %v3646_v47, %v8350_v5 }
 0x736   :  { %v3648_v41 = vpop.f32.mrf.mxu1 }
 0x737   :  { %4218 = vpow2.f32 %v3964_v52  ;;  %v3965_v53 = vmul.f32 -1.442695, %v3647_v56  ;;  %v3649_v43 = vadd.f32 %v3648_v41, %v8353_v40 }
 0x738   :  { %v3652_v50 = vpop.f32.mrf.mxu1 }
 0x739   :  { %4220 = vpow2.f32 %v3965_v53  ;;  %v3966_v48 = vmul.f32 -1.442695, %v3649_v43  ;;  %v3653_v59 = vadd.f32 %v3652_v50, %v8350_v5 }
 0x73a   :  { %v4209_v34 = vpop.eup %4208  ;;  %v3654_v18 = vpop.f32.mrf.mxu1 }
 0x73b   :  { %v3723_v20 = vadd.f32 1.0, %v4209_v34  ;;  %4222 = vpow2.f32 %v3966_v48  ;;  %v3967_v27 = vmul.f32 -1.442695, %v3653_v59  ;;  %v3655_v22 = vadd.f32 %v3654_v18, %v8353_v40 }
 0x73c   :  { %v4211_v26 = vpop.eup %4210  ;;  %v3658_v16 = vpop.f32.mrf.mxu1 }
 0x73d   :  { %4224 = vrcp.f32 %v3723_v20  ;;  %v3724_v60 = vadd.f32 1.0, %v4211_v26  ;;  %v3968_v29 = vmul.f32 -1.442695, %v3655_v22  ;;  %v3659_v13 = vadd.f32 %v3658_v16, %v8350_v5 }
 0x73e   :  { %v4213_v33 = vpop.eup %4212  ;;  %4226 = vpow2.f32 %v3967_v27  ;;  %v3660_v30 = vpop.f32.mrf.mxu1 }
 0x73f   :  { %4228 = vrcp.f32 %v3724_v60  ;;  %v3725_v31 = vadd.f32 1.0, %v4213_v33  ;;  %v3969_v61 = vmul.f32 -1.442695, %v3659_v13  ;;  %v3661_v37 = vadd.f32 %v3660_v30, %v8353_v40 }
 0x740   :  { %v4215_v9 = vpop.eup %4214  ;;  %4230 = vpow2.f32 %v3968_v29  ;;  %v3664_v4 = vpop.f32.mrf.mxu1 }
 0x741   :  { %4232 = vrcp.f32 %v3725_v31  ;;  %v3726_v6 = vadd.f32 1.0, %v4215_v9  ;;  %v3970_v54 = vmul.f32 -1.442695, %v3661_v37  ;;  %v3665_v62 = vadd.f32 %v3664_v4, %v8350_v5 }
 0x742   :  { %v4217_v8 = vpop.eup %4216  ;;  %4234 = vpow2.f32 %v3969_v61  ;;  %v3666_v45 = vpop.f32.mrf.mxu1 }
 0x743   :  { %4236 = vrcp.f32 %v3726_v6  ;;  %v3727_v21 = vadd.f32 1.0, %v4217_v8  ;;  %v3971_v17 = vmul.f32 -1.442695, %v3665_v62  ;;  %v3667_v57 = vadd.f32 %v3666_v45, %v8353_v40 }
 0x744   :  { %v4219_v49 = vpop.eup %4218  ;;  %4238 = vpow2.f32 %v3970_v54  ;;  %v3670_v35 = vpop.f32.mrf.mxu1 }
 0x745   :  { %4240 = vrcp.f32 %v3727_v21  ;;  %v3728_v32 = vadd.f32 1.0, %v4219_v49  ;;  %v3972_v38 = vmul.f32 -1.442695, %v3667_v57  ;;  %v3671_v10 = vadd.f32 %v3670_v35, %v8350_v5 }
 0x746   :  { %v4221_v24 = vpop.eup %4220  ;;  %4242 = vpow2.f32 %v3971_v17  ;;  %v3672_v36 = vpop.f32.mrf.mxu1 }
 0x747   :  { %4244 = vrcp.f32 %v3728_v32  ;;  %v3729_v51 = vadd.f32 1.0, %v4221_v24  ;;  %v3973_v23 = vmul.f32 -1.442695, %v3671_v10  ;;  %v3673_v2 = vadd.f32 %v3672_v36, %v8353_v40 }
 0x748   :  { %v4223_v3 = vpop.eup %4222  ;;  %4246 = vpow2.f32 %v3972_v38 }
 0x749   :  { %4248 = vrcp.f32 %v3729_v51  ;;  %v3730_v42 = vadd.f32 1.0, %v4223_v3  ;;  %v3974_v7 = vmul.f32 -1.442695, %v3673_v2 }
 0x74a   :  { %v4225_v19 = vpop.eup %4224  ;;  %4250 = vpow2.f32 %v3973_v23 }
 0x74b   :  { %v4227_v25 = vpop.eup %4226  ;;  %3771 = vst [vmem:[#allocation2] sm:$0xff] %v4225_v19  ;;  %4252 = vrcp.f32 %v3730_v42 }
 0x74c   :  { %v4229_v55 = vpop.eup %4228  ;;  %v3731_v5 = vadd.f32 1.0, %v4227_v25  ;;  %4254 = vpow2.f32 %v3974_v7 }
 0x74d   :  { %v4231_v39 = vpop.eup %4230  ;;  %3772 = vst [vmem:[#allocation2 + $0x8] sm:$0xff] %v4229_v55 }
 0x74e   :  { %v4233_v58 = vpop.eup %4232  ;;  %4256 = vrcp.f32 %v3731_v5  ;;  %v3732_v1 = vadd.f32 1.0, %v4231_v39 }
 0x74f   :  { %v4235_v28 = vpop.eup %4234  ;;  %3773 = vst [vmem:[#allocation2 + $0x10] sm:$0xff] %v4233_v58 }
 0x750   :  { %v4237_v40 = vpop.eup %4236  ;;  %4258 = vrcp.f32 %v3732_v1  ;;  %v3733_v63 = vadd.f32 1.0, %v4235_v28 }
 0x751   :  { %v4239_v12 = vpop.eup %4238  ;;  %3774 = vst [vmem:[#allocation2 + $0x18] sm:$0xff] %v4237_v40 }
 0x752   :  { %v4241_v46 = vpop.eup %4240  ;;  %4260 = vrcp.f32 %v3733_v63  ;;  %v3734_v14 = vadd.f32 1.0, %v4239_v12 }
 0x753   :  { %v4243_v11 = vpop.eup %4242  ;;  %3775 = vst [vmem:[#allocation2 + $0x20] sm:$0xff] %v4241_v46 }
 0x754   :  { %v4245_v44 = vpop.eup %4244  ;;  %4262 = vrcp.f32 %v3734_v14  ;;  %v3735_v0 = vadd.f32 1.0, %v4243_v11 }
 0x755   :  { %v4247_v15 = vpop.eup %4246  ;;  %3776 = vst [vmem:[#allocation2 + $0x28] sm:$0xff] %v4245_v44 }
 0x756   :  { %v4249_v47 = vpop.eup %4248  ;;  %4264 = vrcp.f32 %v3735_v0  ;;  %v3736_v52 = vadd.f32 1.0, %v4247_v15 }
 0x757   :  { %v4251_v56 = vpop.eup %4250  ;;  %3777 = vst [vmem:[#allocation2 + $0x30] sm:$0xff] %v4249_v47 }
 0x758   :  { %v4253_v41 = vpop.eup %4252  ;;  %4266 = vrcp.f32 %v3736_v52  ;;  %v3737_v53 = vadd.f32 1.0, %v4251_v56 }
 0x759   :  { %v4255_v43 = vpop.eup %4254  ;;  %3778 = vst [vmem:[#allocation2 + $0x38] sm:$0xff] %v4253_v41 }
 0x75a   :  { %4268 = vrcp.f32 %v3737_v53  ;;  %v3738_v50 = vadd.f32 1.0, %v4255_v43 }
 0x75b   :  { %v4257_v48 = vpop.eup %4256 }
 0x75c   :  { %3779 = vst [vmem:[#allocation2 + $0x40] sm:$0xff] %v4257_v48  ;;  %4270 = vrcp.f32 %v3738_v50 }
 0x75d   :  { %v4259_v59 = vpop.eup %4258 }
 0x75e   :  { %3780 = vst [vmem:[#allocation2 + $0x48] sm:$0xff] %v4259_v59 }
 0x75f   :  { %v4261_v34 = vpop.eup %4260 }
 0x760   :  { %3781 = vst [vmem:[#allocation2 + $0x50] sm:$0xff] %v4261_v34 }
 0x761   :  { %v4263_v18 = vpop.eup %4262 }
 0x762   :  { %3782 = vst [vmem:[#allocation2 + $0x58] sm:$0xff] %v4263_v18 }
 0x763   :  { %v4265_v20 = vpop.eup %4264 }
 0x764   :  { %3783 = vst [vmem:[#allocation2 + $0x60] sm:$0xff] %v4265_v20 }
 0x765   :  { %v4267_v27 = vpop.eup %4266 }
 0x766   :  { %3784 = vst [vmem:[#allocation2 + $0x68] sm:$0xff] %v4267_v27 }
 0x767   :  { %v4269_v22 = vpop.eup %4268 }
 0x768   :  { %3785 = vst [vmem:[#allocation2 + $0x70] sm:$0xff] %v4269_v22 }
 0x769   :  { %v4271_v26 = vpop.eup %4270 }
 0x76a   :  { %3786 = vst [vmem:[#allocation2 + $0x78] sm:$0xff] %v4271_v26 }
 0x76b   :  { %4343 = shalt.err (!%p4340_p5)
}
 0x76c   :  { %3902 = dma.vmem_to_hbm [thread:$0]  %s3897_s19, 2048, %s8394_s17, [#allocation3], %s4360_s29, %s4360_s29, %s4361_s0  }
 0x76d   :  { %4352 = dma.done.wait [#allocation3], 2048  }
 0x76e   :  { %4353 = vsyncadd [#allocation3], 4294965248 }
 0x76f   :  { %4354 = dma.done.wait [#allocation5], 4096  }
 0x770   :  { %4355 = vsyncadd [#allocation5], 4294963200 }
 0x771   :  { %4356 = dma.done.wait [#allocation8], 8192  }
 0x772   :  { %4357 = vsyncadd [#allocation8], 4294959104 }
 0x773   :  { %3955 = vsyncpa [#allocation3], 1 }
 0x774   :  { %3956 = vsyncpa [#allocation5], 1 }
 0x775   :  { %3957 = vsyncpa [#allocation8], 1 }

</bundles_post_ra>
